<compile_context>
chip_gen: v7x
topology: tpu7x:2x2x1
jax: 0.10.0
libtpu: 0.0.40
codegen_flags: <defaults>
</compile_context>

<pallas_src>
import functools

import jax
import jax.numpy as jnp
from jax import lax
from jax.experimental import pallas as pl
from jax.experimental.pallas import tpu as pltpu

NEG_SLOPE = 0.2  # nn.LeakyReLU(0.2)


def _lrelu(v):
    return jnp.where(v > 0, v, NEG_SLOPE * v)


def _pad8(n):
    return ((n + 7) // 8) * 8


def _pad128(n):
    return ((n + 127) // 128) * 128


# ---------------------------------------------------------------------------
# Kernel: one grid step = GROUP independent encoder forwards (GROUP*B rows).
# ---------------------------------------------------------------------------
def encoder_kernel(k, B, group, offs, shapes, x_ref, slab_ref, out_ref):
    ek = 16 * k

    def param(i):
        r = offs[i]
        m, n = shapes[i]
        # Row offsets are multiples of 8, lane start 0 -> tile-aligned slices.
        return slab_ref[r:r + m, 0:n]

    w1f, b1f = param(0), param(1)          # (k, 128),  (1, 128)
    w2f, b2f = param(2), param(3)          # (128, 64), (1, 64)
    w3e, b3e = param(4), param(5)          # (64, 16k), (1, 16k)
    w3l, b3l = param(6), param(7)          # (64, 16),  (1, 16)
    wr,  br  = param(8), param(9)          # (16k, k),  (1, k)
    mask     = param(10)                   # (16k, 16k) 0/1 block-diag mask
    a_rep    = param(11)                   # (16k, 16)  vstack_k(I16)
    b_rep    = param(12)                   # (16, 16k)  hstack_k(I16)

    # ---- Shared fused G_e / G_l trunk over all GROUP*B rows (M = 128). ----
    x = x_ref[...]                                                # (G*B, k)
    h = _lrelu(jnp.dot(x, w1f, preferred_element_type=jnp.float32) + b1f)
    h = _lrelu(jnp.dot(h, w2f, preferred_element_type=jnp.float32) + b2f)
    hflat = _lrelu(jnp.dot(h, w3e, preferred_element_type=jnp.float32) + b3e)  # G_e(x): (G*B, 16k)
    lt    = _lrelu(jnp.dot(h, w3l, preferred_element_type=jnp.float32) + b3l)  # G_l(x): (G*B, 16)

    # ---- Per-instance L construction + application (static unrolled loop,
    # every slice starts at a multiple of 8 sublanes). ----------------------
    for g in range(group):
        r0 = g * B
        lt_g = lt[r0:r0 + B, :]             # (B, 16)
        hf_g = hflat[r0:r0 + B, :]          # (B, 16k)

        # L = L_t^T @ L_t (contract over this instance's batch rows).
        L = lax.dot_general(lt_g, lt_g, (((0,), (0,)), ((), ())),
                            preferred_element_type=jnp.float32)         # (16, 16)

        # blockdiag_k(L) = mask * (A @ (L @ Bm)): two small MXU matmuls plus
        # one elementwise multiply (replaces concats / iotas / selects).
        rep = jnp.dot(a_rep,
                      jnp.dot(L, b_rep, preferred_element_type=jnp.float32),
                      preferred_element_type=jnp.float32)                # (16k, 16k)
        l_bd = mask * rep

        # R1_flat = H_flat @ blockdiag_k(L);  out = LeakyReLU(R1_flat @ wr + br)
        r1 = jnp.dot(hf_g, l_bd, preferred_element_type=jnp.float32)     # (B, 16k)
        out_g = _lrelu(jnp.dot(r1, wr, preferred_element_type=jnp.float32) + br)
        out_ref[r0:r0 + B, :] = out_g.astype(out_ref.dtype)


# ---------------------------------------------------------------------------
# Wrapper
# ---------------------------------------------------------------------------
def encoder_forward(x3, slab, offs, shapes, k, group=16):
    """Apply the Encoder forward to N independent (B, k) inputs in a single
    pallas_call.  x3: (N, B, k) -> (N, B, k)."""
    N, B, kk = x3.shape
    assert kk == k
    group = max(1, min(group, N))
    while N % group:                 # fall back to a divisor of N
        group -= 1
    rows = group * B                 # rows per grid step (128 at defaults)

    x = x3.reshape(N * B, k)
    kern = functools.partial(encoder_kernel, k, B, group, offs, shapes)
    out = pl.pallas_call(
        kern,
        out_shape=jax.ShapeDtypeStruct((N * B, k), jnp.float32),
        grid=(N // group,),
        in_specs=[
            pl.BlockSpec((rows, k), lambda n: (n, 0)),     # row tile per step
            pl.BlockSpec(slab.shape, lambda n: (0, 0)),    # weights VMEM-resident
        ],
        out_specs=pl.BlockSpec((rows, k), lambda n: (n, 0)),
        compiler_params=pltpu.CompilerParams(
            dimension_semantics=("parallel",)),            # both TCs on v7x
    )(x, slab)
    return out.reshape(N, B, k)


# ---------------------------------------------------------------------------
# Parameter construction / fusion / packing (host/wrapper side, done once)
# ---------------------------------------------------------------------------
def _linear_params(key, fan_in, fan_out):
    # Deterministic PyTorch-style init: U(-1/sqrt(fan_in), 1/sqrt(fan_in)).
    kw, kb = jax.random.split(key)
    bound = 1.0 / jnp.sqrt(float(fan_in))
    w = jax.random.uniform(kw, (fan_in, fan_out), jnp.float32, -bound, bound)
    b = jax.random.uniform(kb, (1, fan_out), jnp.float32, -bound, bound)
    return w, b


def make_encoder_params(key, k):
    keys = jax.random.split(key, 7)
    # G_l: k -> 64 -> 32 -> 16
    wl1, bl1 = _linear_params(keys[0], k, 64)
    wl2, bl2 = _linear_params(keys[1], 64, 32)
    wl3, bl3 = _linear_params(keys[2], 32, 16)
    # G_e: k -> 64 -> 32 -> 16*k
    we1, be1 = _linear_params(keys[3], k, 64)
    we2, be2 = _linear_params(keys[4], 64, 32)
    we3, be3 = _linear_params(keys[5], 32, 16 * k)
    # G_r: 16*k -> k
    wr, br = _linear_params(keys[6], 16 * k, k)
    return (wl1, bl1, wl2, bl2, wl3, bl3,
            we1, be1, we2, be2, we3, be3, wr, br)


def pack_params(params, k):
    """Fuse G_e/G_l into one block-diagonal trunk, precompute the blockdiag
    machinery (mask, A, Bm), and pack everything into a single 128-lane-wide
    f32 slab (one HBM->VMEM DMA for the whole grid)."""
    (wl1, bl1, wl2, bl2, wl3, bl3,
     we1, be1, we2, be2, we3, be3, wr, br) = params
    ek = 16 * k

    # Layer 1 fused: output lanes ordered [G_e (64) | G_l (64)].
    w1f = jnp.concatenate([we1, wl1], axis=1)                  # (k, 128)
    b1f = jnp.concatenate([be1, bl1], axis=1)                  # (1, 128)
    # Layer 2 block-diagonal [we2 0; 0 wl2].
    w2f = jnp.zeros((128, 64), jnp.float32)
    w2f = w2f.at[0:64, 0:32].set(we2).at[64:128, 32:64].set(wl2)
    b2f = jnp.concatenate([be2, bl2], axis=1)                  # (1, 64)
    # Layer 3 split into two <=128-lane heads sharing the same input h2.
    w3e = jnp.zeros((64, ek), jnp.float32).at[0:32, :].set(we3)    # -> H_flat
    w3l = jnp.zeros((64, 16), jnp.float32).at[32:64, :].set(wl3)   # -> L_t
    b3e, b3l = be3, bl3

    # Static blockdiag_k machinery.
    eye16 = jnp.eye(16, dtype=jnp.float32)
    a_rep = jnp.tile(eye16, (k, 1))                            # (16k, 16)
    b_rep = jnp.tile(eye16, (1, k))                            # (16, 16k)
    rid = jnp.arange(ek)[:, None] // 16
    cid = jnp.arange(ek)[None, :] // 16
    mask = (rid == cid).astype(jnp.float32)                    # (16k, 16k)

    entries = [w1f, b1f, w2f, b2f, w3e, b3e, w3l, b3l, wr, br,
               mask, a_rep, b_rep]
    lane_w = _pad128(max(e.shape[1] for e in entries))         # 128 for k <= 8
    offs, row = [], 0
    for e in entries:
        offs.append(row)
        row += _pad8(e.shape[0])
    slab = jnp.zeros((_pad8(row), lane_w), jnp.float32)
    for e, off in zip(entries, offs):
        slab = slab.at[off:off + e.shape[0], 0:e.shape[1]].set(e)
    shapes = tuple(e.shape for e in entries)
    return slab, tuple(offs), shapes


# ---------------------------------------------------------------------------
# Pure-JAX reference (mirrors the PyTorch forward exactly, unfused params)
# ---------------------------------------------------------------------------
def encoder_ref(x, params, k):
    (wl1, bl1, wl2, bl2, wl3, bl3,
     we1, be1, we2, be2, we3, be3, wr, br) = params

    def mlp3(v, w1, b1, w2, b2, w3, b3):
        h = _lrelu(v @ w1 + b1)
        h = _lrelu(h @ w2 + b2)
        return _lrelu(h @ w3 + b3)

    B = x.shape[0]
    L_t = mlp3(x, wl1, bl1, wl2, bl2, wl3, bl3)                # (B, 16)
    H = mlp3(x, we1, be1, we2, be2, we3, be3).reshape(B, k, 16)
    L = L_t.T @ L_t                                            # (16, 16)
    R_t1 = jnp.einsum('bki,ij->bkj', H, L)                     # bmm with repeated L
    R_t2 = _lrelu(R_t1.reshape(B, k * 16) @ wr + br)
    return R_t2


if __name__ == "__main__":
    k = 8        # Encoder(k)
    B = 8        # batch of one encoder forward
    N = 32       # number of independent (B, k) inputs in one pallas_call
    GROUP = 16   # instances per grid step -> 128 MXU rows per step

    key = jax.random.PRNGKey(0)
    key_x, key_p = jax.random.split(key)
    x3 = jax.random.normal(key_x, (N, B, k), jnp.float32)
    params = make_encoder_params(key_p, k)
    slab, offs, shapes = pack_params(params, k)

    out = encoder_forward(x3, slab, offs, shapes, k, group=GROUP)
    out = jax.block_until_ready(out)

    ref = jax.vmap(lambda xb: encoder_ref(xb, params, k))(x3)
    assert out.shape == (N, B, k)
    err = jnp.max(jnp.abs(out - ref))
    assert jnp.allclose(out, ref, atol=1e-4, rtol=1e-4), f"mismatch: max abs err {err}"

    print("KERNEL_OK")
</pallas_src>

<mosaic_0001>
module attributes {stable_mosaic.version = 11 : i64} {
  func.func @encoder_kernel(%arg0: i32, %arg1: memref<128x8xf32, #tpu.memory_space<vmem>>, %arg2: memref<704x128xf32, #tpu.memory_space<vmem>>, %arg3: memref<128x8xf32, #tpu.memory_space<vmem>>) attributes {dimension_semantics = [#tpu.dimension_semantics<parallel>], iteration_bounds = array<i64: 2>, scalar_prefetch = 0 : i64, scratch_operands = 0 : i64, tpu.core_type = #tpu.core_type<tc>, window_params = [{transform_indices = @transform_0, window_bounds = array<i64: 128, 8>}, {pipeline_mode = #tpu.pipeline_mode<synchronous>, transform_indices = @transform_1, window_bounds = array<i64: 704, 128>}, {transform_indices = @transform_2, window_bounds = array<i64: 128, 8>}]} {
    %c0 = arith.constant 0 : index
    %c0_0 = arith.constant 0 : index
    %0 = vector.load %arg2[%c0, %c0_0] : memref<704x128xf32, #tpu.memory_space<vmem>>, vector<8x128xf32>
    %c8 = arith.constant 8 : index
    %c0_1 = arith.constant 0 : index
    %1 = vector.load %arg2[%c8, %c0_1] : memref<704x128xf32, #tpu.memory_space<vmem>>, vector<1x128xf32>
    %c16 = arith.constant 16 : index
    %c0_2 = arith.constant 0 : index
    %2 = vector.load %arg2[%c16, %c0_2] : memref<704x128xf32, #tpu.memory_space<vmem>>, vector<128x64xf32>
    %c144 = arith.constant 144 : index
    %c0_3 = arith.constant 0 : index
    %3 = vector.load %arg2[%c144, %c0_3] : memref<704x128xf32, #tpu.memory_space<vmem>>, vector<1x64xf32>
    %c152 = arith.constant 152 : index
    %c0_4 = arith.constant 0 : index
    %4 = vector.load %arg2[%c152, %c0_4] : memref<704x128xf32, #tpu.memory_space<vmem>>, vector<64x128xf32>
    %c216 = arith.constant 216 : index
    %c0_5 = arith.constant 0 : index
    %5 = vector.load %arg2[%c216, %c0_5] : memref<704x128xf32, #tpu.memory_space<vmem>>, vector<1x128xf32>
    %c224 = arith.constant 224 : index
    %c0_6 = arith.constant 0 : index
    %6 = vector.load %arg2[%c224, %c0_6] : memref<704x128xf32, #tpu.memory_space<vmem>>, vector<64x16xf32>
    %c288 = arith.constant 288 : index
    %c0_7 = arith.constant 0 : index
    %7 = vector.load %arg2[%c288, %c0_7] : memref<704x128xf32, #tpu.memory_space<vmem>>, vector<1x16xf32>
    %c296 = arith.constant 296 : index
    %c0_8 = arith.constant 0 : index
    %8 = vector.load %arg2[%c296, %c0_8] : memref<704x128xf32, #tpu.memory_space<vmem>>, vector<128x8xf32>
    %c424 = arith.constant 424 : index
    %c0_9 = arith.constant 0 : index
    %9 = vector.load %arg2[%c424, %c0_9] : memref<704x128xf32, #tpu.memory_space<vmem>>, vector<1x8xf32>
    %c432 = arith.constant 432 : index
    %c0_10 = arith.constant 0 : index
    %10 = vector.load %arg2[%c432, %c0_10] : memref<704x128xf32, #tpu.memory_space<vmem>>, vector<128x128xf32>
    %c560 = arith.constant 560 : index
    %c0_11 = arith.constant 0 : index
    %11 = vector.load %arg2[%c560, %c0_11] : memref<704x128xf32, #tpu.memory_space<vmem>>, vector<128x16xf32>
    %c688 = arith.constant 688 : index
    %c0_12 = arith.constant 0 : index
    %12 = vector.load %arg2[%c688, %c0_12] : memref<704x128xf32, #tpu.memory_space<vmem>>, vector<16x128xf32>
    %c0_13 = arith.constant 0 : index
    %c0_14 = arith.constant 0 : index
    %13 = vector.load %arg1[%c0_13, %c0_14] : memref<128x8xf32, #tpu.memory_space<vmem>>, vector<128x8xf32>
    %cst = arith.constant dense<0.000000e+00> : vector<128x128xf32>
    %14 = tpu.matmul %13, %0, %cst {dimension_numbers = #tpu.dot_dimension_numbers<[1], [0], [0], [1], [0, 0, 1, 1], [], []>} : vector<128x8xf32>, vector<8x128xf32>, vector<128x128xf32> -> vector<128x128xf32>
    %15 = vector.broadcast %1 : vector<1x128xf32> to vector<128x128xf32>
    %16 = arith.addf %14, %15 : vector<128x128xf32>
    %cst_15 = arith.constant 0.000000e+00 : f32
    %17 = vector.broadcast %cst_15 : f32 to vector<128x128xf32>
    %18 = arith.cmpf ogt, %16, %17 : vector<128x128xf32>
    %cst_16 = arith.constant 2.000000e-01 : f32
    %19 = vector.broadcast %cst_16 : f32 to vector<128x128xf32>
    %20 = arith.mulf %19, %16 : vector<128x128xf32>
    %21 = arith.select %18, %16, %20 : vector<128x128xi1>, vector<128x128xf32>
    %cst_17 = arith.constant dense<0.000000e+00> : vector<128x64xf32>
    %22 = tpu.matmul %21, %2, %cst_17 {dimension_numbers = #tpu.dot_dimension_numbers<[1], [0], [0], [1], [0, 0, 1, 1], [], []>} : vector<128x128xf32>, vector<128x64xf32>, vector<128x64xf32> -> vector<128x64xf32>
    %23 = vector.broadcast %3 : vector<1x64xf32> to vector<128x64xf32>
    %24 = arith.addf %22, %23 : vector<128x64xf32>
    %cst_18 = arith.constant 0.000000e+00 : f32
    %25 = vector.broadcast %cst_18 : f32 to vector<128x64xf32>
    %26 = arith.cmpf ogt, %24, %25 : vector<128x64xf32>
    %cst_19 = arith.constant 2.000000e-01 : f32
    %27 = vector.broadcast %cst_19 : f32 to vector<128x64xf32>
    %28 = arith.mulf %27, %24 : vector<128x64xf32>
    %29 = arith.select %26, %24, %28 : vector<128x64xi1>, vector<128x64xf32>
    %cst_20 = arith.constant dense<0.000000e+00> : vector<128x128xf32>
    %30 = tpu.matmul %29, %4, %cst_20 {dimension_numbers = #tpu.dot_dimension_numbers<[1], [0], [0], [1], [0, 0, 1, 1], [], []>} : vector<128x64xf32>, vector<64x128xf32>, vector<128x128xf32> -> vector<128x128xf32>
    %31 = vector.broadcast %5 : vector<1x128xf32> to vector<128x128xf32>
    %32 = arith.addf %30, %31 : vector<128x128xf32>
    %cst_21 = arith.constant 0.000000e+00 : f32
    %33 = vector.broadcast %cst_21 : f32 to vector<128x128xf32>
    %34 = arith.cmpf ogt, %32, %33 : vector<128x128xf32>
    %cst_22 = arith.constant 2.000000e-01 : f32
    %35 = vector.broadcast %cst_22 : f32 to vector<128x128xf32>
    %36 = arith.mulf %35, %32 : vector<128x128xf32>
    %37 = arith.select %34, %32, %36 : vector<128x128xi1>, vector<128x128xf32>
    %cst_23 = arith.constant dense<0.000000e+00> : vector<128x16xf32>
    %38 = tpu.matmul %29, %6, %cst_23 {dimension_numbers = #tpu.dot_dimension_numbers<[1], [0], [0], [1], [0, 0, 1, 1], [], []>} : vector<128x64xf32>, vector<64x16xf32>, vector<128x16xf32> -> vector<128x16xf32>
    %39 = vector.broadcast %7 : vector<1x16xf32> to vector<128x16xf32>
    %40 = arith.addf %38, %39 : vector<128x16xf32>
    %cst_24 = arith.constant 0.000000e+00 : f32
    %41 = vector.broadcast %cst_24 : f32 to vector<128x16xf32>
    %42 = arith.cmpf ogt, %40, %41 : vector<128x16xf32>
    %cst_25 = arith.constant 2.000000e-01 : f32
    %43 = vector.broadcast %cst_25 : f32 to vector<128x16xf32>
    %44 = arith.mulf %43, %40 : vector<128x16xf32>
    %45 = arith.select %42, %40, %44 : vector<128x16xi1>, vector<128x16xf32>
    %46 = vector.extract_strided_slice %45 {offsets = [0, 0], sizes = [8, 16], strides = [1, 1]} : vector<128x16xf32> to vector<8x16xf32>
    %47 = vector.extract_strided_slice %37 {offsets = [0, 0], sizes = [8, 128], strides = [1, 1]} : vector<128x128xf32> to vector<8x128xf32>
    %cst_26 = arith.constant dense<0.000000e+00> : vector<16x16xf32>
    %48 = tpu.matmul %46, %46, %cst_26 {dimension_numbers = #tpu.dot_dimension_numbers<[0], [0], [1], [1], [0, 1, 1, 1], [], []>} : vector<8x16xf32>, vector<8x16xf32>, vector<16x16xf32> -> vector<16x16xf32>
    %cst_27 = arith.constant dense<0.000000e+00> : vector<16x128xf32>
    %49 = tpu.matmul %48, %12, %cst_27 {dimension_numbers = #tpu.dot_dimension_numbers<[1], [0], [0], [1], [0, 0, 1, 1], [], []>} : vector<16x16xf32>, vector<16x128xf32>, vector<16x128xf32> -> vector<16x128xf32>
    %cst_28 = arith.constant dense<0.000000e+00> : vector<128x128xf32>
    %50 = tpu.matmul %11, %49, %cst_28 {dimension_numbers = #tpu.dot_dimension_numbers<[1], [0], [0], [1], [0, 0, 1, 1], [], []>} : vector<128x16xf32>, vector<16x128xf32>, vector<128x128xf32> -> vector<128x128xf32>
    %51 = arith.mulf %10, %50 : vector<128x128xf32>
    %cst_29 = arith.constant dense<0.000000e+00> : vector<8x128xf32>
    %52 = tpu.matmul %47, %51, %cst_29 {dimension_numbers = #tpu.dot_dimension_numbers<[1], [0], [0], [1], [0, 0, 1, 1], [], []>} : vector<8x128xf32>, vector<128x128xf32>, vector<8x128xf32> -> vector<8x128xf32>
    %cst_30 = arith.constant dense<0.000000e+00> : vector<8x8xf32>
    %53 = tpu.matmul %52, %8, %cst_30 {dimension_numbers = #tpu.dot_dimension_numbers<[1], [0], [0], [1], [0, 0, 1, 1], [], []>} : vector<8x128xf32>, vector<128x8xf32>, vector<8x8xf32> -> vector<8x8xf32>
    %54 = vector.broadcast %9 : vector<1x8xf32> to vector<8x8xf32>
    %55 = arith.addf %53, %54 : vector<8x8xf32>
    %cst_31 = arith.constant 0.000000e+00 : f32
    %56 = vector.broadcast %cst_31 : f32 to vector<8x8xf32>
    %57 = arith.cmpf ogt, %55, %56 : vector<8x8xf32>
    %cst_32 = arith.constant 2.000000e-01 : f32
    %58 = vector.broadcast %cst_32 : f32 to vector<8x8xf32>
    %59 = arith.mulf %58, %55 : vector<8x8xf32>
    %60 = arith.select %57, %55, %59 : vector<8x8xi1>, vector<8x8xf32>
    %c0_33 = arith.constant 0 : index
    %c0_34 = arith.constant 0 : index
    %61 = vector.load %arg3[%c0_33, %c0_34] : memref<128x8xf32, #tpu.memory_space<vmem>>, vector<8x8xf32>
    tpu.vector_store %arg3[%c0_33, %c0_34], %60 {strides = array<i32>} : memref<128x8xf32, #tpu.memory_space<vmem>>, vector<8x8xf32>,
    %62 = vector.extract_strided_slice %45 {offsets = [8, 0], sizes = [8, 16], strides = [1, 1]} : vector<128x16xf32> to vector<8x16xf32>
    %63 = vector.extract_strided_slice %37 {offsets = [8, 0], sizes = [8, 128], strides = [1, 1]} : vector<128x128xf32> to vector<8x128xf32>
    %cst_35 = arith.constant dense<0.000000e+00> : vector<16x16xf32>
    %64 = tpu.matmul %62, %62, %cst_35 {dimension_numbers = #tpu.dot_dimension_numbers<[0], [0], [1], [1], [0, 1, 1, 1], [], []>} : vector<8x16xf32>, vector<8x16xf32>, vector<16x16xf32> -> vector<16x16xf32>
    %cst_36 = arith.constant dense<0.000000e+00> : vector<16x128xf32>
    %65 = tpu.matmul %64, %12, %cst_36 {dimension_numbers = #tpu.dot_dimension_numbers<[1], [0], [0], [1], [0, 0, 1, 1], [], []>} : vector<16x16xf32>, vector<16x128xf32>, vector<16x128xf32> -> vector<16x128xf32>
    %cst_37 = arith.constant dense<0.000000e+00> : vector<128x128xf32>
    %66 = tpu.matmul %11, %65, %cst_37 {dimension_numbers = #tpu.dot_dimension_numbers<[1], [0], [0], [1], [0, 0, 1, 1], [], []>} : vector<128x16xf32>, vector<16x128xf32>, vector<128x128xf32> -> vector<128x128xf32>
    %67 = arith.mulf %10, %66 : vector<128x128xf32>
    %cst_38 = arith.constant dense<0.000000e+00> : vector<8x128xf32>
    %68 = tpu.matmul %63, %67, %cst_38 {dimension_numbers = #tpu.dot_dimension_numbers<[1], [0], [0], [1], [0, 0, 1, 1], [], []>} : vector<8x128xf32>, vector<128x128xf32>, vector<8x128xf32> -> vector<8x128xf32>
    %cst_39 = arith.constant dense<0.000000e+00> : vector<8x8xf32>
    %69 = tpu.matmul %68, %8, %cst_39 {dimension_numbers = #tpu.dot_dimension_numbers<[1], [0], [0], [1], [0, 0, 1, 1], [], []>} : vector<8x128xf32>, vector<128x8xf32>, vector<8x8xf32> -> vector<8x8xf32>
    %70 = vector.broadcast %9 : vector<1x8xf32> to vector<8x8xf32>
    %71 = arith.addf %69, %70 : vector<8x8xf32>
    %cst_40 = arith.constant 0.000000e+00 : f32
    %72 = vector.broadcast %cst_40 : f32 to vector<8x8xf32>
    %73 = arith.cmpf ogt, %71, %72 : vector<8x8xf32>
    %cst_41 = arith.constant 2.000000e-01 : f32
    %74 = vector.broadcast %cst_41 : f32 to vector<8x8xf32>
    %75 = arith.mulf %74, %71 : vector<8x8xf32>
    %76 = arith.select %73, %71, %75 : vector<8x8xi1>, vector<8x8xf32>
    %c8_42 = arith.constant 8 : index
    %c0_43 = arith.constant 0 : index
    %77 = vector.load %arg3[%c8_42, %c0_43] : memref<128x8xf32, #tpu.memory_space<vmem>>, vector<8x8xf32>
    tpu.vector_store %arg3[%c8_42, %c0_43], %76 {strides = array<i32>} : memref<128x8xf32, #tpu.memory_space<vmem>>, vector<8x8xf32>,
    %78 = vector.extract_strided_slice %45 {offsets = [16, 0], sizes = [8, 16], strides = [1, 1]} : vector<128x16xf32> to vector<8x16xf32>
    %79 = vector.extract_strided_slice %37 {offsets = [16, 0], sizes = [8, 128], strides = [1, 1]} : vector<128x128xf32> to vector<8x128xf32>
    %cst_44 = arith.constant dense<0.000000e+00> : vector<16x16xf32>
    %80 = tpu.matmul %78, %78, %cst_44 {dimension_numbers = #tpu.dot_dimension_numbers<[0], [0], [1], [1], [0, 1, 1, 1], [], []>} : vector<8x16xf32>, vector<8x16xf32>, vector<16x16xf32> -> vector<16x16xf32>
    %cst_45 = arith.constant dense<0.000000e+00> : vector<16x128xf32>
    %81 = tpu.matmul %80, %12, %cst_45 {dimension_numbers = #tpu.dot_dimension_numbers<[1], [0], [0], [1], [0, 0, 1, 1], [], []>} : vector<16x16xf32>, vector<16x128xf32>, vector<16x128xf32> -> vector<16x128xf32>
    %cst_46 = arith.constant dense<0.000000e+00> : vector<128x128xf32>
    %82 = tpu.matmul %11, %81, %cst_46 {dimension_numbers = #tpu.dot_dimension_numbers<[1], [0], [0], [1], [0, 0, 1, 1], [], []>} : vector<128x16xf32>, vector<16x128xf32>, vector<128x128xf32> -> vector<128x128xf32>
    %83 = arith.mulf %10, %82 : vector<128x128xf32>
    %cst_47 = arith.constant dense<0.000000e+00> : vector<8x128xf32>
    %84 = tpu.matmul %79, %83, %cst_47 {dimension_numbers = #tpu.dot_dimension_numbers<[1], [0], [0], [1], [0, 0, 1, 1], [], []>} : vector<8x128xf32>, vector<128x128xf32>, vector<8x128xf32> -> vector<8x128xf32>
    %cst_48 = arith.constant dense<0.000000e+00> : vector<8x8xf32>
    %85 = tpu.matmul %84, %8, %cst_48 {dimension_numbers = #tpu.dot_dimension_numbers<[1], [0], [0], [1], [0, 0, 1, 1], [], []>} : vector<8x128xf32>, vector<128x8xf32>, vector<8x8xf32> -> vector<8x8xf32>
    %86 = vector.broadcast %9 : vector<1x8xf32> to vector<8x8xf32>
    %87 = arith.addf %85, %86 : vector<8x8xf32>
    %cst_49 = arith.constant 0.000000e+00 : f32
    %88 = vector.broadcast %cst_49 : f32 to vector<8x8xf32>
    %89 = arith.cmpf ogt, %87, %88 : vector<8x8xf32>
    %cst_50 = arith.constant 2.000000e-01 : f32
    %90 = vector.broadcast %cst_50 : f32 to vector<8x8xf32>
    %91 = arith.mulf %90, %87 : vector<8x8xf32>
    %92 = arith.select %89, %87, %91 : vector<8x8xi1>, vector<8x8xf32>
    %c16_51 = arith.constant 16 : index
    %c0_52 = arith.constant 0 : index
    %93 = vector.load %arg3[%c16_51, %c0_52] : memref<128x8xf32, #tpu.memory_space<vmem>>, vector<8x8xf32>
    tpu.vector_store %arg3[%c16_51, %c0_52], %92 {strides = array<i32>} : memref<128x8xf32, #tpu.memory_space<vmem>>, vector<8x8xf32>,
    %94 = vector.extract_strided_slice %45 {offsets = [24, 0], sizes = [8, 16], strides = [1, 1]} : vector<128x16xf32> to vector<8x16xf32>
    %95 = vector.extract_strided_slice %37 {offsets = [24, 0], sizes = [8, 128], strides = [1, 1]} : vector<128x128xf32> to vector<8x128xf32>
    %cst_53 = arith.constant dense<0.000000e+00> : vector<16x16xf32>
    %96 = tpu.matmul %94, %94, %cst_53 {dimension_numbers = #tpu.dot_dimension_numbers<[0], [0], [1], [1], [0, 1, 1, 1], [], []>} : vector<8x16xf32>, vector<8x16xf32>, vector<16x16xf32> -> vector<16x16xf32>
    %cst_54 = arith.constant dense<0.000000e+00> : vector<16x128xf32>
    %97 = tpu.matmul %96, %12, %cst_54 {dimension_numbers = #tpu.dot_dimension_numbers<[1], [0], [0], [1], [0, 0, 1, 1], [], []>} : vector<16x16xf32>, vector<16x128xf32>, vector<16x128xf32> -> vector<16x128xf32>
    %cst_55 = arith.constant dense<0.000000e+00> : vector<128x128xf32>
    %98 = tpu.matmul %11, %97, %cst_55 {dimension_numbers = #tpu.dot_dimension_numbers<[1], [0], [0], [1], [0, 0, 1, 1], [], []>} : vector<128x16xf32>, vector<16x128xf32>, vector<128x128xf32> -> vector<128x128xf32>
    %99 = arith.mulf %10, %98 : vector<128x128xf32>
    %cst_56 = arith.constant dense<0.000000e+00> : vector<8x128xf32>
    %100 = tpu.matmul %95, %99, %cst_56 {dimension_numbers = #tpu.dot_dimension_numbers<[1], [0], [0], [1], [0, 0, 1, 1], [], []>} : vector<8x128xf32>, vector<128x128xf32>, vector<8x128xf32> -> vector<8x128xf32>
    %cst_57 = arith.constant dense<0.000000e+00> : vector<8x8xf32>
    %101 = tpu.matmul %100, %8, %cst_57 {dimension_numbers = #tpu.dot_dimension_numbers<[1], [0], [0], [1], [0, 0, 1, 1], [], []>} : vector<8x128xf32>, vector<128x8xf32>, vector<8x8xf32> -> vector<8x8xf32>
    %102 = vector.broadcast %9 : vector<1x8xf32> to vector<8x8xf32>
    %103 = arith.addf %101, %102 : vector<8x8xf32>
    %cst_58 = arith.constant 0.000000e+00 : f32
    %104 = vector.broadcast %cst_58 : f32 to vector<8x8xf32>
    %105 = arith.cmpf ogt, %103, %104 : vector<8x8xf32>
    %cst_59 = arith.constant 2.000000e-01 : f32
    %106 = vector.broadcast %cst_59 : f32 to vector<8x8xf32>
    %107 = arith.mulf %106, %103 : vector<8x8xf32>
    %108 = arith.select %105, %103, %107 : vector<8x8xi1>, vector<8x8xf32>
    %c24 = arith.constant 24 : index
    %c0_60 = arith.constant 0 : index
    %109 = vector.load %arg3[%c24, %c0_60] : memref<128x8xf32, #tpu.memory_space<vmem>>, vector<8x8xf32>
    tpu.vector_store %arg3[%c24, %c0_60], %108 {strides = array<i32>} : memref<128x8xf32, #tpu.memory_space<vmem>>, vector<8x8xf32>,
    %110 = vector.extract_strided_slice %45 {offsets = [32, 0], sizes = [8, 16], strides = [1, 1]} : vector<128x16xf32> to vector<8x16xf32>
    %111 = vector.extract_strided_slice %37 {offsets = [32, 0], sizes = [8, 128], strides = [1, 1]} : vector<128x128xf32> to vector<8x128xf32>
    %cst_61 = arith.constant dense<0.000000e+00> : vector<16x16xf32>
    %112 = tpu.matmul %110, %110, %cst_61 {dimension_numbers = #tpu.dot_dimension_numbers<[0], [0], [1], [1], [0, 1, 1, 1], [], []>} : vector<8x16xf32>, vector<8x16xf32>, vector<16x16xf32> -> vector<16x16xf32>
    %cst_62 = arith.constant dense<0.000000e+00> : vector<16x128xf32>
    %113 = tpu.matmul %112, %12, %cst_62 {dimension_numbers = #tpu.dot_dimension_numbers<[1], [0], [0], [1], [0, 0, 1, 1], [], []>} : vector<16x16xf32>, vector<16x128xf32>, vector<16x128xf32> -> vector<16x128xf32>
    %cst_63 = arith.constant dense<0.000000e+00> : vector<128x128xf32>
    %114 = tpu.matmul %11, %113, %cst_63 {dimension_numbers = #tpu.dot_dimension_numbers<[1], [0], [0], [1], [0, 0, 1, 1], [], []>} : vector<128x16xf32>, vector<16x128xf32>, vector<128x128xf32> -> vector<128x128xf32>
    %115 = arith.mulf %10, %114 : vector<128x128xf32>
    %cst_64 = arith.constant dense<0.000000e+00> : vector<8x128xf32>
    %116 = tpu.matmul %111, %115, %cst_64 {dimension_numbers = #tpu.dot_dimension_numbers<[1], [0], [0], [1], [0, 0, 1, 1], [], []>} : vector<8x128xf32>, vector<128x128xf32>, vector<8x128xf32> -> vector<8x128xf32>
    %cst_65 = arith.constant dense<0.000000e+00> : vector<8x8xf32>
    %117 = tpu.matmul %116, %8, %cst_65 {dimension_numbers = #tpu.dot_dimension_numbers<[1], [0], [0], [1], [0, 0, 1, 1], [], []>} : vector<8x128xf32>, vector<128x8xf32>, vector<8x8xf32> -> vector<8x8xf32>
    %118 = vector.broadcast %9 : vector<1x8xf32> to vector<8x8xf32>
    %119 = arith.addf %117, %118 : vector<8x8xf32>
    %cst_66 = arith.constant 0.000000e+00 : f32
    %120 = vector.broadcast %cst_66 : f32 to vector<8x8xf32>
    %121 = arith.cmpf ogt, %119, %120 : vector<8x8xf32>
    %cst_67 = arith.constant 2.000000e-01 : f32
    %122 = vector.broadcast %cst_67 : f32 to vector<8x8xf32>
    %123 = arith.mulf %122, %119 : vector<8x8xf32>
    %124 = arith.select %121, %119, %123 : vector<8x8xi1>, vector<8x8xf32>
    %c32 = arith.constant 32 : index
    %c0_68 = arith.constant 0 : index
    %125 = vector.load %arg3[%c32, %c0_68] : memref<128x8xf32, #tpu.memory_space<vmem>>, vector<8x8xf32>
    tpu.vector_store %arg3[%c32, %c0_68], %124 {strides = array<i32>} : memref<128x8xf32, #tpu.memory_space<vmem>>, vector<8x8xf32>,
    %126 = vector.extract_strided_slice %45 {offsets = [40, 0], sizes = [8, 16], strides = [1, 1]} : vector<128x16xf32> to vector<8x16xf32>
    %127 = vector.extract_strided_slice %37 {offsets = [40, 0], sizes = [8, 128], strides = [1, 1]} : vector<128x128xf32> to vector<8x128xf32>
    %cst_69 = arith.constant dense<0.000000e+00> : vector<16x16xf32>
    %128 = tpu.matmul %126, %126, %cst_69 {dimension_numbers = #tpu.dot_dimension_numbers<[0], [0], [1], [1], [0, 1, 1, 1], [], []>} : vector<8x16xf32>, vector<8x16xf32>, vector<16x16xf32> -> vector<16x16xf32>
    %cst_70 = arith.constant dense<0.000000e+00> : vector<16x128xf32>
    %129 = tpu.matmul %128, %12, %cst_70 {dimension_numbers = #tpu.dot_dimension_numbers<[1], [0], [0], [1], [0, 0, 1, 1], [], []>} : vector<16x16xf32>, vector<16x128xf32>, vector<16x128xf32> -> vector<16x128xf32>
    %cst_71 = arith.constant dense<0.000000e+00> : vector<128x128xf32>
    %130 = tpu.matmul %11, %129, %cst_71 {dimension_numbers = #tpu.dot_dimension_numbers<[1], [0], [0], [1], [0, 0, 1, 1], [], []>} : vector<128x16xf32>, vector<16x128xf32>, vector<128x128xf32> -> vector<128x128xf32>
    %131 = arith.mulf %10, %130 : vector<128x128xf32>
    %cst_72 = arith.constant dense<0.000000e+00> : vector<8x128xf32>
    %132 = tpu.matmul %127, %131, %cst_72 {dimension_numbers = #tpu.dot_dimension_numbers<[1], [0], [0], [1], [0, 0, 1, 1], [], []>} : vector<8x128xf32>, vector<128x128xf32>, vector<8x128xf32> -> vector<8x128xf32>
    %cst_73 = arith.constant dense<0.000000e+00> : vector<8x8xf32>
    %133 = tpu.matmul %132, %8, %cst_73 {dimension_numbers = #tpu.dot_dimension_numbers<[1], [0], [0], [1], [0, 0, 1, 1], [], []>} : vector<8x128xf32>, vector<128x8xf32>, vector<8x8xf32> -> vector<8x8xf32>
    %134 = vector.broadcast %9 : vector<1x8xf32> to vector<8x8xf32>
    %135 = arith.addf %133, %134 : vector<8x8xf32>
    %cst_74 = arith.constant 0.000000e+00 : f32
    %136 = vector.broadcast %cst_74 : f32 to vector<8x8xf32>
    %137 = arith.cmpf ogt, %135, %136 : vector<8x8xf32>
    %cst_75 = arith.constant 2.000000e-01 : f32
    %138 = vector.broadcast %cst_75 : f32 to vector<8x8xf32>
    %139 = arith.mulf %138, %135 : vector<8x8xf32>
    %140 = arith.select %137, %135, %139 : vector<8x8xi1>, vector<8x8xf32>
    %c40 = arith.constant 40 : index
    %c0_76 = arith.constant 0 : index
    %141 = vector.load %arg3[%c40, %c0_76] : memref<128x8xf32, #tpu.memory_space<vmem>>, vector<8x8xf32>
    tpu.vector_store %arg3[%c40, %c0_76], %140 {strides = array<i32>} : memref<128x8xf32, #tpu.memory_space<vmem>>, vector<8x8xf32>,
    %142 = vector.extract_strided_slice %45 {offsets = [48, 0], sizes = [8, 16], strides = [1, 1]} : vector<128x16xf32> to vector<8x16xf32>
    %143 = vector.extract_strided_slice %37 {offsets = [48, 0], sizes = [8, 128], strides = [1, 1]} : vector<128x128xf32> to vector<8x128xf32>
    %cst_77 = arith.constant dense<0.000000e+00> : vector<16x16xf32>
    %144 = tpu.matmul %142, %142, %cst_77 {dimension_numbers = #tpu.dot_dimension_numbers<[0], [0], [1], [1], [0, 1, 1, 1], [], []>} : vector<8x16xf32>, vector<8x16xf32>, vector<16x16xf32> -> vector<16x16xf32>
    %cst_78 = arith.constant dense<0.000000e+00> : vector<16x128xf32>
    %145 = tpu.matmul %144, %12, %cst_78 {dimension_numbers = #tpu.dot_dimension_numbers<[1], [0], [0], [1], [0, 0, 1, 1], [], []>} : vector<16x16xf32>, vector<16x128xf32>, vector<16x128xf32> -> vector<16x128xf32>
    %cst_79 = arith.constant dense<0.000000e+00> : vector<128x128xf32>
    %146 = tpu.matmul %11, %145, %cst_79 {dimension_numbers = #tpu.dot_dimension_numbers<[1], [0], [0], [1], [0, 0, 1, 1], [], []>} : vector<128x16xf32>, vector<16x128xf32>, vector<128x128xf32> -> vector<128x128xf32>
    %147 = arith.mulf %10, %146 : vector<128x128xf32>
    %cst_80 = arith.constant dense<0.000000e+00> : vector<8x128xf32>
    %148 = tpu.matmul %143, %147, %cst_80 {dimension_numbers = #tpu.dot_dimension_numbers<[1], [0], [0], [1], [0, 0, 1, 1], [], []>} : vector<8x128xf32>, vector<128x128xf32>, vector<8x128xf32> -> vector<8x128xf32>
    %cst_81 = arith.constant dense<0.000000e+00> : vector<8x8xf32>
    %149 = tpu.matmul %148, %8, %cst_81 {dimension_numbers = #tpu.dot_dimension_numbers<[1], [0], [0], [1], [0, 0, 1, 1], [], []>} : vector<8x128xf32>, vector<128x8xf32>, vector<8x8xf32> -> vector<8x8xf32>
    %150 = vector.broadcast %9 : vector<1x8xf32> to vector<8x8xf32>
    %151 = arith.addf %149, %150 : vector<8x8xf32>
    %cst_82 = arith.constant 0.000000e+00 : f32
    %152 = vector.broadcast %cst_82 : f32 to vector<8x8xf32>
    %153 = arith.cmpf ogt, %151, %152 : vector<8x8xf32>
    %cst_83 = arith.constant 2.000000e-01 : f32
    %154 = vector.broadcast %cst_83 : f32 to vector<8x8xf32>
    %155 = arith.mulf %154, %151 : vector<8x8xf32>
    %156 = arith.select %153, %151, %155 : vector<8x8xi1>, vector<8x8xf32>
    %c48 = arith.constant 48 : index
    %c0_84 = arith.constant 0 : index
    %157 = vector.load %arg3[%c48, %c0_84] : memref<128x8xf32, #tpu.memory_space<vmem>>, vector<8x8xf32>
    tpu.vector_store %arg3[%c48, %c0_84], %156 {strides = array<i32>} : memref<128x8xf32, #tpu.memory_space<vmem>>, vector<8x8xf32>,
    %158 = vector.extract_strided_slice %45 {offsets = [56, 0], sizes = [8, 16], strides = [1, 1]} : vector<128x16xf32> to vector<8x16xf32>
    %159 = vector.extract_strided_slice %37 {offsets = [56, 0], sizes = [8, 128], strides = [1, 1]} : vector<128x128xf32> to vector<8x128xf32>
    %cst_85 = arith.constant dense<0.000000e+00> : vector<16x16xf32>
    %160 = tpu.matmul %158, %158, %cst_85 {dimension_numbers = #tpu.dot_dimension_numbers<[0], [0], [1], [1], [0, 1, 1, 1], [], []>} : vector<8x16xf32>, vector<8x16xf32>, vector<16x16xf32> -> vector<16x16xf32>
    %cst_86 = arith.constant dense<0.000000e+00> : vector<16x128xf32>
    %161 = tpu.matmul %160, %12, %cst_86 {dimension_numbers = #tpu.dot_dimension_numbers<[1], [0], [0], [1], [0, 0, 1, 1], [], []>} : vector<16x16xf32>, vector<16x128xf32>, vector<16x128xf32> -> vector<16x128xf32>
    %cst_87 = arith.constant dense<0.000000e+00> : vector<128x128xf32>
    %162 = tpu.matmul %11, %161, %cst_87 {dimension_numbers = #tpu.dot_dimension_numbers<[1], [0], [0], [1], [0, 0, 1, 1], [], []>} : vector<128x16xf32>, vector<16x128xf32>, vector<128x128xf32> -> vector<128x128xf32>
    %163 = arith.mulf %10, %162 : vector<128x128xf32>
    %cst_88 = arith.constant dense<0.000000e+00> : vector<8x128xf32>
    %164 = tpu.matmul %159, %163, %cst_88 {dimension_numbers = #tpu.dot_dimension_numbers<[1], [0], [0], [1], [0, 0, 1, 1], [], []>} : vector<8x128xf32>, vector<128x128xf32>, vector<8x128xf32> -> vector<8x128xf32>
    %cst_89 = arith.constant dense<0.000000e+00> : vector<8x8xf32>
    %165 = tpu.matmul %164, %8, %cst_89 {dimension_numbers = #tpu.dot_dimension_numbers<[1], [0], [0], [1], [0, 0, 1, 1], [], []>} : vector<8x128xf32>, vector<128x8xf32>, vector<8x8xf32> -> vector<8x8xf32>
    %166 = vector.broadcast %9 : vector<1x8xf32> to vector<8x8xf32>
    %167 = arith.addf %165, %166 : vector<8x8xf32>
    %cst_90 = arith.constant 0.000000e+00 : f32
    %168 = vector.broadcast %cst_90 : f32 to vector<8x8xf32>
    %169 = arith.cmpf ogt, %167, %168 : vector<8x8xf32>
    %cst_91 = arith.constant 2.000000e-01 : f32
    %170 = vector.broadcast %cst_91 : f32 to vector<8x8xf32>
    %171 = arith.mulf %170, %167 : vector<8x8xf32>
    %172 = arith.select %169, %167, %171 : vector<8x8xi1>, vector<8x8xf32>
    %c56 = arith.constant 56 : index
    %c0_92 = arith.constant 0 : index
    %173 = vector.load %arg3[%c56, %c0_92] : memref<128x8xf32, #tpu.memory_space<vmem>>, vector<8x8xf32>
    tpu.vector_store %arg3[%c56, %c0_92], %172 {strides = array<i32>} : memref<128x8xf32, #tpu.memory_space<vmem>>, vector<8x8xf32>,
    %174 = vector.extract_strided_slice %45 {offsets = [64, 0], sizes = [8, 16], strides = [1, 1]} : vector<128x16xf32> to vector<8x16xf32>
    %175 = vector.extract_strided_slice %37 {offsets = [64, 0], sizes = [8, 128], strides = [1, 1]} : vector<128x128xf32> to vector<8x128xf32>
    %cst_93 = arith.constant dense<0.000000e+00> : vector<16x16xf32>
    %176 = tpu.matmul %174, %174, %cst_93 {dimension_numbers = #tpu.dot_dimension_numbers<[0], [0], [1], [1], [0, 1, 1, 1], [], []>} : vector<8x16xf32>, vector<8x16xf32>, vector<16x16xf32> -> vector<16x16xf32>
    %cst_94 = arith.constant dense<0.000000e+00> : vector<16x128xf32>
    %177 = tpu.matmul %176, %12, %cst_94 {dimension_numbers = #tpu.dot_dimension_numbers<[1], [0], [0], [1], [0, 0, 1, 1], [], []>} : vector<16x16xf32>, vector<16x128xf32>, vector<16x128xf32> -> vector<16x128xf32>
    %cst_95 = arith.constant dense<0.000000e+00> : vector<128x128xf32>
    %178 = tpu.matmul %11, %177, %cst_95 {dimension_numbers = #tpu.dot_dimension_numbers<[1], [0], [0], [1], [0, 0, 1, 1], [], []>} : vector<128x16xf32>, vector<16x128xf32>, vector<128x128xf32> -> vector<128x128xf32>
    %179 = arith.mulf %10, %178 : vector<128x128xf32>
    %cst_96 = arith.constant dense<0.000000e+00> : vector<8x128xf32>
    %180 = tpu.matmul %175, %179, %cst_96 {dimension_numbers = #tpu.dot_dimension_numbers<[1], [0], [0], [1], [0, 0, 1, 1], [], []>} : vector<8x128xf32>, vector<128x128xf32>, vector<8x128xf32> -> vector<8x128xf32>
    %cst_97 = arith.constant dense<0.000000e+00> : vector<8x8xf32>
    %181 = tpu.matmul %180, %8, %cst_97 {dimension_numbers = #tpu.dot_dimension_numbers<[1], [0], [0], [1], [0, 0, 1, 1], [], []>} : vector<8x128xf32>, vector<128x8xf32>, vector<8x8xf32> -> vector<8x8xf32>
    %182 = vector.broadcast %9 : vector<1x8xf32> to vector<8x8xf32>
    %183 = arith.addf %181, %182 : vector<8x8xf32>
    %cst_98 = arith.constant 0.000000e+00 : f32
    %184 = vector.broadcast %cst_98 : f32 to vector<8x8xf32>
    %185 = arith.cmpf ogt, %183, %184 : vector<8x8xf32>
    %cst_99 = arith.constant 2.000000e-01 : f32
    %186 = vector.broadcast %cst_99 : f32 to vector<8x8xf32>
    %187 = arith.mulf %186, %183 : vector<8x8xf32>
    %188 = arith.select %185, %183, %187 : vector<8x8xi1>, vector<8x8xf32>
    %c64 = arith.constant 64 : index
    %c0_100 = arith.constant 0 : index
    %189 = vector.load %arg3[%c64, %c0_100] : memref<128x8xf32, #tpu.memory_space<vmem>>, vector<8x8xf32>
    tpu.vector_store %arg3[%c64, %c0_100], %188 {strides = array<i32>} : memref<128x8xf32, #tpu.memory_space<vmem>>, vector<8x8xf32>,
    %190 = vector.extract_strided_slice %45 {offsets = [72, 0], sizes = [8, 16], strides = [1, 1]} : vector<128x16xf32> to vector<8x16xf32>
    %191 = vector.extract_strided_slice %37 {offsets = [72, 0], sizes = [8, 128], strides = [1, 1]} : vector<128x128xf32> to vector<8x128xf32>
    %cst_101 = arith.constant dense<0.000000e+00> : vector<16x16xf32>
    %192 = tpu.matmul %190, %190, %cst_101 {dimension_numbers = #tpu.dot_dimension_numbers<[0], [0], [1], [1], [0, 1, 1, 1], [], []>} : vector<8x16xf32>, vector<8x16xf32>, vector<16x16xf32> -> vector<16x16xf32>
    %cst_102 = arith.constant dense<0.000000e+00> : vector<16x128xf32>
    %193 = tpu.matmul %192, %12, %cst_102 {dimension_numbers = #tpu.dot_dimension_numbers<[1], [0], [0], [1], [0, 0, 1, 1], [], []>} : vector<16x16xf32>, vector<16x128xf32>, vector<16x128xf32> -> vector<16x128xf32>
    %cst_103 = arith.constant dense<0.000000e+00> : vector<128x128xf32>
    %194 = tpu.matmul %11, %193, %cst_103 {dimension_numbers = #tpu.dot_dimension_numbers<[1], [0], [0], [1], [0, 0, 1, 1], [], []>} : vector<128x16xf32>, vector<16x128xf32>, vector<128x128xf32> -> vector<128x128xf32>
    %195 = arith.mulf %10, %194 : vector<128x128xf32>
    %cst_104 = arith.constant dense<0.000000e+00> : vector<8x128xf32>
    %196 = tpu.matmul %191, %195, %cst_104 {dimension_numbers = #tpu.dot_dimension_numbers<[1], [0], [0], [1], [0, 0, 1, 1], [], []>} : vector<8x128xf32>, vector<128x128xf32>, vector<8x128xf32> -> vector<8x128xf32>
    %cst_105 = arith.constant dense<0.000000e+00> : vector<8x8xf32>
    %197 = tpu.matmul %196, %8, %cst_105 {dimension_numbers = #tpu.dot_dimension_numbers<[1], [0], [0], [1], [0, 0, 1, 1], [], []>} : vector<8x128xf32>, vector<128x8xf32>, vector<8x8xf32> -> vector<8x8xf32>
    %198 = vector.broadcast %9 : vector<1x8xf32> to vector<8x8xf32>
    %199 = arith.addf %197, %198 : vector<8x8xf32>
    %cst_106 = arith.constant 0.000000e+00 : f32
    %200 = vector.broadcast %cst_106 : f32 to vector<8x8xf32>
    %201 = arith.cmpf ogt, %199, %200 : vector<8x8xf32>
    %cst_107 = arith.constant 2.000000e-01 : f32
    %202 = vector.broadcast %cst_107 : f32 to vector<8x8xf32>
    %203 = arith.mulf %202, %199 : vector<8x8xf32>
    %204 = arith.select %201, %199, %203 : vector<8x8xi1>, vector<8x8xf32>
    %c72 = arith.constant 72 : index
    %c0_108 = arith.constant 0 : index
    %205 = vector.load %arg3[%c72, %c0_108] : memref<128x8xf32, #tpu.memory_space<vmem>>, vector<8x8xf32>
    tpu.vector_store %arg3[%c72, %c0_108], %204 {strides = array<i32>} : memref<128x8xf32, #tpu.memory_space<vmem>>, vector<8x8xf32>,
    %206 = vector.extract_strided_slice %45 {offsets = [80, 0], sizes = [8, 16], strides = [1, 1]} : vector<128x16xf32> to vector<8x16xf32>
    %207 = vector.extract_strided_slice %37 {offsets = [80, 0], sizes = [8, 128], strides = [1, 1]} : vector<128x128xf32> to vector<8x128xf32>
    %cst_109 = arith.constant dense<0.000000e+00> : vector<16x16xf32>
    %208 = tpu.matmul %206, %206, %cst_109 {dimension_numbers = #tpu.dot_dimension_numbers<[0], [0], [1], [1], [0, 1, 1, 1], [], []>} : vector<8x16xf32>, vector<8x16xf32>, vector<16x16xf32> -> vector<16x16xf32>
    %cst_110 = arith.constant dense<0.000000e+00> : vector<16x128xf32>
    %209 = tpu.matmul %208, %12, %cst_110 {dimension_numbers = #tpu.dot_dimension_numbers<[1], [0], [0], [1], [0, 0, 1, 1], [], []>} : vector<16x16xf32>, vector<16x128xf32>, vector<16x128xf32> -> vector<16x128xf32>
    %cst_111 = arith.constant dense<0.000000e+00> : vector<128x128xf32>
    %210 = tpu.matmul %11, %209, %cst_111 {dimension_numbers = #tpu.dot_dimension_numbers<[1], [0], [0], [1], [0, 0, 1, 1], [], []>} : vector<128x16xf32>, vector<16x128xf32>, vector<128x128xf32> -> vector<128x128xf32>
    %211 = arith.mulf %10, %210 : vector<128x128xf32>
    %cst_112 = arith.constant dense<0.000000e+00> : vector<8x128xf32>
    %212 = tpu.matmul %207, %211, %cst_112 {dimension_numbers = #tpu.dot_dimension_numbers<[1], [0], [0], [1], [0, 0, 1, 1], [], []>} : vector<8x128xf32>, vector<128x128xf32>, vector<8x128xf32> -> vector<8x128xf32>
    %cst_113 = arith.constant dense<0.000000e+00> : vector<8x8xf32>
    %213 = tpu.matmul %212, %8, %cst_113 {dimension_numbers = #tpu.dot_dimension_numbers<[1], [0], [0], [1], [0, 0, 1, 1], [], []>} : vector<8x128xf32>, vector<128x8xf32>, vector<8x8xf32> -> vector<8x8xf32>
    %214 = vector.broadcast %9 : vector<1x8xf32> to vector<8x8xf32>
    %215 = arith.addf %213, %214 : vector<8x8xf32>
    %cst_114 = arith.constant 0.000000e+00 : f32
    %216 = vector.broadcast %cst_114 : f32 to vector<8x8xf32>
    %217 = arith.cmpf ogt, %215, %216 : vector<8x8xf32>
    %cst_115 = arith.constant 2.000000e-01 : f32
    %218 = vector.broadcast %cst_115 : f32 to vector<8x8xf32>
    %219 = arith.mulf %218, %215 : vector<8x8xf32>
    %220 = arith.select %217, %215, %219 : vector<8x8xi1>, vector<8x8xf32>
    %c80 = arith.constant 80 : index
    %c0_116 = arith.constant 0 : index
    %221 = vector.load %arg3[%c80, %c0_116] : memref<128x8xf32, #tpu.memory_space<vmem>>, vector<8x8xf32>
    tpu.vector_store %arg3[%c80, %c0_116], %220 {strides = array<i32>} : memref<128x8xf32, #tpu.memory_space<vmem>>, vector<8x8xf32>,
    %222 = vector.extract_strided_slice %45 {offsets = [88, 0], sizes = [8, 16], strides = [1, 1]} : vector<128x16xf32> to vector<8x16xf32>
    %223 = vector.extract_strided_slice %37 {offsets = [88, 0], sizes = [8, 128], strides = [1, 1]} : vector<128x128xf32> to vector<8x128xf32>
    %cst_117 = arith.constant dense<0.000000e+00> : vector<16x16xf32>
    %224 = tpu.matmul %222, %222, %cst_117 {dimension_numbers = #tpu.dot_dimension_numbers<[0], [0], [1], [1], [0, 1, 1, 1], [], []>} : vector<8x16xf32>, vector<8x16xf32>, vector<16x16xf32> -> vector<16x16xf32>
    %cst_118 = arith.constant dense<0.000000e+00> : vector<16x128xf32>
    %225 = tpu.matmul %224, %12, %cst_118 {dimension_numbers = #tpu.dot_dimension_numbers<[1], [0], [0], [1], [0, 0, 1, 1], [], []>} : vector<16x16xf32>, vector<16x128xf32>, vector<16x128xf32> -> vector<16x128xf32>
    %cst_119 = arith.constant dense<0.000000e+00> : vector<128x128xf32>
    %226 = tpu.matmul %11, %225, %cst_119 {dimension_numbers = #tpu.dot_dimension_numbers<[1], [0], [0], [1], [0, 0, 1, 1], [], []>} : vector<128x16xf32>, vector<16x128xf32>, vector<128x128xf32> -> vector<128x128xf32>
    %227 = arith.mulf %10, %226 : vector<128x128xf32>
    %cst_120 = arith.constant dense<0.000000e+00> : vector<8x128xf32>
    %228 = tpu.matmul %223, %227, %cst_120 {dimension_numbers = #tpu.dot_dimension_numbers<[1], [0], [0], [1], [0, 0, 1, 1], [], []>} : vector<8x128xf32>, vector<128x128xf32>, vector<8x128xf32> -> vector<8x128xf32>
    %cst_121 = arith.constant dense<0.000000e+00> : vector<8x8xf32>
    %229 = tpu.matmul %228, %8, %cst_121 {dimension_numbers = #tpu.dot_dimension_numbers<[1], [0], [0], [1], [0, 0, 1, 1], [], []>} : vector<8x128xf32>, vector<128x8xf32>, vector<8x8xf32> -> vector<8x8xf32>
    %230 = vector.broadcast %9 : vector<1x8xf32> to vector<8x8xf32>
    %231 = arith.addf %229, %230 : vector<8x8xf32>
    %cst_122 = arith.constant 0.000000e+00 : f32
    %232 = vector.broadcast %cst_122 : f32 to vector<8x8xf32>
    %233 = arith.cmpf ogt, %231, %232 : vector<8x8xf32>
    %cst_123 = arith.constant 2.000000e-01 : f32
    %234 = vector.broadcast %cst_123 : f32 to vector<8x8xf32>
    %235 = arith.mulf %234, %231 : vector<8x8xf32>
    %236 = arith.select %233, %231, %235 : vector<8x8xi1>, vector<8x8xf32>
    %c88 = arith.constant 88 : index
    %c0_124 = arith.constant 0 : index
    %237 = vector.load %arg3[%c88, %c0_124] : memref<128x8xf32, #tpu.memory_space<vmem>>, vector<8x8xf32>
    tpu.vector_store %arg3[%c88, %c0_124], %236 {strides = array<i32>} : memref<128x8xf32, #tpu.memory_space<vmem>>, vector<8x8xf32>,
    %238 = vector.extract_strided_slice %45 {offsets = [96, 0], sizes = [8, 16], strides = [1, 1]} : vector<128x16xf32> to vector<8x16xf32>
    %239 = vector.extract_strided_slice %37 {offsets = [96, 0], sizes = [8, 128], strides = [1, 1]} : vector<128x128xf32> to vector<8x128xf32>
    %cst_125 = arith.constant dense<0.000000e+00> : vector<16x16xf32>
    %240 = tpu.matmul %238, %238, %cst_125 {dimension_numbers = #tpu.dot_dimension_numbers<[0], [0], [1], [1], [0, 1, 1, 1], [], []>} : vector<8x16xf32>, vector<8x16xf32>, vector<16x16xf32> -> vector<16x16xf32>
    %cst_126 = arith.constant dense<0.000000e+00> : vector<16x128xf32>
    %241 = tpu.matmul %240, %12, %cst_126 {dimension_numbers = #tpu.dot_dimension_numbers<[1], [0], [0], [1], [0, 0, 1, 1], [], []>} : vector<16x16xf32>, vector<16x128xf32>, vector<16x128xf32> -> vector<16x128xf32>
    %cst_127 = arith.constant dense<0.000000e+00> : vector<128x128xf32>
    %242 = tpu.matmul %11, %241, %cst_127 {dimension_numbers = #tpu.dot_dimension_numbers<[1], [0], [0], [1], [0, 0, 1, 1], [], []>} : vector<128x16xf32>, vector<16x128xf32>, vector<128x128xf32> -> vector<128x128xf32>
    %243 = arith.mulf %10, %242 : vector<128x128xf32>
    %cst_128 = arith.constant dense<0.000000e+00> : vector<8x128xf32>
    %244 = tpu.matmul %239, %243, %cst_128 {dimension_numbers = #tpu.dot_dimension_numbers<[1], [0], [0], [1], [0, 0, 1, 1], [], []>} : vector<8x128xf32>, vector<128x128xf32>, vector<8x128xf32> -> vector<8x128xf32>
    %cst_129 = arith.constant dense<0.000000e+00> : vector<8x8xf32>
    %245 = tpu.matmul %244, %8, %cst_129 {dimension_numbers = #tpu.dot_dimension_numbers<[1], [0], [0], [1], [0, 0, 1, 1], [], []>} : vector<8x128xf32>, vector<128x8xf32>, vector<8x8xf32> -> vector<8x8xf32>
    %246 = vector.broadcast %9 : vector<1x8xf32> to vector<8x8xf32>
    %247 = arith.addf %245, %246 : vector<8x8xf32>
    %cst_130 = arith.constant 0.000000e+00 : f32
    %248 = vector.broadcast %cst_130 : f32 to vector<8x8xf32>
    %249 = arith.cmpf ogt, %247, %248 : vector<8x8xf32>
    %cst_131 = arith.constant 2.000000e-01 : f32
    %250 = vector.broadcast %cst_131 : f32 to vector<8x8xf32>
    %251 = arith.mulf %250, %247 : vector<8x8xf32>
    %252 = arith.select %249, %247, %251 : vector<8x8xi1>, vector<8x8xf32>
    %c96 = arith.constant 96 : index
    %c0_132 = arith.constant 0 : index
    %253 = vector.load %arg3[%c96, %c0_132] : memref<128x8xf32, #tpu.memory_space<vmem>>, vector<8x8xf32>
    tpu.vector_store %arg3[%c96, %c0_132], %252 {strides = array<i32>} : memref<128x8xf32, #tpu.memory_space<vmem>>, vector<8x8xf32>,
    %254 = vector.extract_strided_slice %45 {offsets = [104, 0], sizes = [8, 16], strides = [1, 1]} : vector<128x16xf32> to vector<8x16xf32>
    %255 = vector.extract_strided_slice %37 {offsets = [104, 0], sizes = [8, 128], strides = [1, 1]} : vector<128x128xf32> to vector<8x128xf32>
    %cst_133 = arith.constant dense<0.000000e+00> : vector<16x16xf32>
    %256 = tpu.matmul %254, %254, %cst_133 {dimension_numbers = #tpu.dot_dimension_numbers<[0], [0], [1], [1], [0, 1, 1, 1], [], []>} : vector<8x16xf32>, vector<8x16xf32>, vector<16x16xf32> -> vector<16x16xf32>
    %cst_134 = arith.constant dense<0.000000e+00> : vector<16x128xf32>
    %257 = tpu.matmul %256, %12, %cst_134 {dimension_numbers = #tpu.dot_dimension_numbers<[1], [0], [0], [1], [0, 0, 1, 1], [], []>} : vector<16x16xf32>, vector<16x128xf32>, vector<16x128xf32> -> vector<16x128xf32>
    %cst_135 = arith.constant dense<0.000000e+00> : vector<128x128xf32>
    %258 = tpu.matmul %11, %257, %cst_135 {dimension_numbers = #tpu.dot_dimension_numbers<[1], [0], [0], [1], [0, 0, 1, 1], [], []>} : vector<128x16xf32>, vector<16x128xf32>, vector<128x128xf32> -> vector<128x128xf32>
    %259 = arith.mulf %10, %258 : vector<128x128xf32>
    %cst_136 = arith.constant dense<0.000000e+00> : vector<8x128xf32>
    %260 = tpu.matmul %255, %259, %cst_136 {dimension_numbers = #tpu.dot_dimension_numbers<[1], [0], [0], [1], [0, 0, 1, 1], [], []>} : vector<8x128xf32>, vector<128x128xf32>, vector<8x128xf32> -> vector<8x128xf32>
    %cst_137 = arith.constant dense<0.000000e+00> : vector<8x8xf32>
    %261 = tpu.matmul %260, %8, %cst_137 {dimension_numbers = #tpu.dot_dimension_numbers<[1], [0], [0], [1], [0, 0, 1, 1], [], []>} : vector<8x128xf32>, vector<128x8xf32>, vector<8x8xf32> -> vector<8x8xf32>
    %262 = vector.broadcast %9 : vector<1x8xf32> to vector<8x8xf32>
    %263 = arith.addf %261, %262 : vector<8x8xf32>
    %cst_138 = arith.constant 0.000000e+00 : f32
    %264 = vector.broadcast %cst_138 : f32 to vector<8x8xf32>
    %265 = arith.cmpf ogt, %263, %264 : vector<8x8xf32>
    %cst_139 = arith.constant 2.000000e-01 : f32
    %266 = vector.broadcast %cst_139 : f32 to vector<8x8xf32>
    %267 = arith.mulf %266, %263 : vector<8x8xf32>
    %268 = arith.select %265, %263, %267 : vector<8x8xi1>, vector<8x8xf32>
    %c104 = arith.constant 104 : index
    %c0_140 = arith.constant 0 : index
    %269 = vector.load %arg3[%c104, %c0_140] : memref<128x8xf32, #tpu.memory_space<vmem>>, vector<8x8xf32>
    tpu.vector_store %arg3[%c104, %c0_140], %268 {strides = array<i32>} : memref<128x8xf32, #tpu.memory_space<vmem>>, vector<8x8xf32>,
    %270 = vector.extract_strided_slice %45 {offsets = [112, 0], sizes = [8, 16], strides = [1, 1]} : vector<128x16xf32> to vector<8x16xf32>
    %271 = vector.extract_strided_slice %37 {offsets = [112, 0], sizes = [8, 128], strides = [1, 1]} : vector<128x128xf32> to vector<8x128xf32>
    %cst_141 = arith.constant dense<0.000000e+00> : vector<16x16xf32>
    %272 = tpu.matmul %270, %270, %cst_141 {dimension_numbers = #tpu.dot_dimension_numbers<[0], [0], [1], [1], [0, 1, 1, 1], [], []>} : vector<8x16xf32>, vector<8x16xf32>, vector<16x16xf32> -> vector<16x16xf32>
    %cst_142 = arith.constant dense<0.000000e+00> : vector<16x128xf32>
    %273 = tpu.matmul %272, %12, %cst_142 {dimension_numbers = #tpu.dot_dimension_numbers<[1], [0], [0], [1], [0, 0, 1, 1], [], []>} : vector<16x16xf32>, vector<16x128xf32>, vector<16x128xf32> -> vector<16x128xf32>
    %cst_143 = arith.constant dense<0.000000e+00> : vector<128x128xf32>
    %274 = tpu.matmul %11, %273, %cst_143 {dimension_numbers = #tpu.dot_dimension_numbers<[1], [0], [0], [1], [0, 0, 1, 1], [], []>} : vector<128x16xf32>, vector<16x128xf32>, vector<128x128xf32> -> vector<128x128xf32>
    %275 = arith.mulf %10, %274 : vector<128x128xf32>
    %cst_144 = arith.constant dense<0.000000e+00> : vector<8x128xf32>
    %276 = tpu.matmul %271, %275, %cst_144 {dimension_numbers = #tpu.dot_dimension_numbers<[1], [0], [0], [1], [0, 0, 1, 1], [], []>} : vector<8x128xf32>, vector<128x128xf32>, vector<8x128xf32> -> vector<8x128xf32>
    %cst_145 = arith.constant dense<0.000000e+00> : vector<8x8xf32>
    %277 = tpu.matmul %276, %8, %cst_145 {dimension_numbers = #tpu.dot_dimension_numbers<[1], [0], [0], [1], [0, 0, 1, 1], [], []>} : vector<8x128xf32>, vector<128x8xf32>, vector<8x8xf32> -> vector<8x8xf32>
    %278 = vector.broadcast %9 : vector<1x8xf32> to vector<8x8xf32>
    %279 = arith.addf %277, %278 : vector<8x8xf32>
    %cst_146 = arith.constant 0.000000e+00 : f32
    %280 = vector.broadcast %cst_146 : f32 to vector<8x8xf32>
    %281 = arith.cmpf ogt, %279, %280 : vector<8x8xf32>
    %cst_147 = arith.constant 2.000000e-01 : f32
    %282 = vector.broadcast %cst_147 : f32 to vector<8x8xf32>
    %283 = arith.mulf %282, %279 : vector<8x8xf32>
    %284 = arith.select %281, %279, %283 : vector<8x8xi1>, vector<8x8xf32>
    %c112 = arith.constant 112 : index
    %c0_148 = arith.constant 0 : index
    %285 = vector.load %arg3[%c112, %c0_148] : memref<128x8xf32, #tpu.memory_space<vmem>>, vector<8x8xf32>
    tpu.vector_store %arg3[%c112, %c0_148], %284 {strides = array<i32>} : memref<128x8xf32, #tpu.memory_space<vmem>>, vector<8x8xf32>,
    %286 = vector.extract_strided_slice %45 {offsets = [120, 0], sizes = [8, 16], strides = [1, 1]} : vector<128x16xf32> to vector<8x16xf32>
    %287 = vector.extract_strided_slice %37 {offsets = [120, 0], sizes = [8, 128], strides = [1, 1]} : vector<128x128xf32> to vector<8x128xf32>
    %cst_149 = arith.constant dense<0.000000e+00> : vector<16x16xf32>
    %288 = tpu.matmul %286, %286, %cst_149 {dimension_numbers = #tpu.dot_dimension_numbers<[0], [0], [1], [1], [0, 1, 1, 1], [], []>} : vector<8x16xf32>, vector<8x16xf32>, vector<16x16xf32> -> vector<16x16xf32>
    %cst_150 = arith.constant dense<0.000000e+00> : vector<16x128xf32>
    %289 = tpu.matmul %288, %12, %cst_150 {dimension_numbers = #tpu.dot_dimension_numbers<[1], [0], [0], [1], [0, 0, 1, 1], [], []>} : vector<16x16xf32>, vector<16x128xf32>, vector<16x128xf32> -> vector<16x128xf32>
    %cst_151 = arith.constant dense<0.000000e+00> : vector<128x128xf32>
    %290 = tpu.matmul %11, %289, %cst_151 {dimension_numbers = #tpu.dot_dimension_numbers<[1], [0], [0], [1], [0, 0, 1, 1], [], []>} : vector<128x16xf32>, vector<16x128xf32>, vector<128x128xf32> -> vector<128x128xf32>
    %291 = arith.mulf %10, %290 : vector<128x128xf32>
    %cst_152 = arith.constant dense<0.000000e+00> : vector<8x128xf32>
    %292 = tpu.matmul %287, %291, %cst_152 {dimension_numbers = #tpu.dot_dimension_numbers<[1], [0], [0], [1], [0, 0, 1, 1], [], []>} : vector<8x128xf32>, vector<128x128xf32>, vector<8x128xf32> -> vector<8x128xf32>
    %cst_153 = arith.constant dense<0.000000e+00> : vector<8x8xf32>
    %293 = tpu.matmul %292, %8, %cst_153 {dimension_numbers = #tpu.dot_dimension_numbers<[1], [0], [0], [1], [0, 0, 1, 1], [], []>} : vector<8x128xf32>, vector<128x8xf32>, vector<8x8xf32> -> vector<8x8xf32>
    %294 = vector.broadcast %9 : vector<1x8xf32> to vector<8x8xf32>
    %295 = arith.addf %293, %294 : vector<8x8xf32>
    %cst_154 = arith.constant 0.000000e+00 : f32
    %296 = vector.broadcast %cst_154 : f32 to vector<8x8xf32>
    %297 = arith.cmpf ogt, %295, %296 : vector<8x8xf32>
    %cst_155 = arith.constant 2.000000e-01 : f32
    %298 = vector.broadcast %cst_155 : f32 to vector<8x8xf32>
    %299 = arith.mulf %298, %295 : vector<8x8xf32>
    %300 = arith.select %297, %295, %299 : vector<8x8xi1>, vector<8x8xf32>
    %c120 = arith.constant 120 : index
    %c0_156 = arith.constant 0 : index
    %301 = vector.load %arg3[%c120, %c0_156] : memref<128x8xf32, #tpu.memory_space<vmem>>, vector<8x8xf32>
    tpu.vector_store %arg3[%c120, %c0_156], %300 {strides = array<i32>} : memref<128x8xf32, #tpu.memory_space<vmem>>, vector<8x8xf32>,
    return
  }
  func.func @transform_0(%arg0: i32) -> (i32, i32) {
    %c0_i32 = arith.constant 0 : i32
    %c0_i32_0 = arith.constant 0 : i32
    return %arg0, %c0_i32 : i32, i32
  }
  func.func @transform_1(%arg0: i32) -> (i32, i32) {
    %c0_i32 = arith.constant 0 : i32
    %c0_i32_0 = arith.constant 0 : i32
    %c0_i32_1 = arith.constant 0 : i32
    return %c0_i32, %c0_i32_0 : i32, i32
  }
  func.func @transform_2(%arg0: i32) -> (i32, i32) {
    %c0_i32 = arith.constant 0 : i32
    %c0_i32_0 = arith.constant 0 : i32
    return %arg0, %c0_i32 : i32, i32
  }
}

</mosaic_0001>

<bundles_post_ra>
// kernel: tpu_custom_call.1
= control target key start
LH: loop header
LB: loop body
LE: loop exit
PB: predicated region body
PF: predicated region fallthrough
CT: control target
= control target key end

     0   :  { %7 = vsyncpa [#allocation3], 0  ;;  %s13750_s9 = smov 0   ;;  %s15700_s0 = inlined_call_operand.vmem [shape: f32[256,8], index: 0, kind: input, shape index: {}]   ;;  %s15701_s1 = inlined_call_operand.hbm [shape: f32[704,128], index: 1, kind: input, shape index: {}]   ;;  %s15702_s2 = inlined_call_operand.vmem [shape: f32[256,8], index: 2, kind: output, shape index: {}]  }
   0x1 LB: > { %s9257_s10 = sadd.s32 4294967295, %s13727_s9   ;;  %p9259_p0 = scmp.ge.s32.totalorder %s13727_s9, 1  ;;  %s13727_s9 = sphi %s13750_s9, %s13_s9  }
   0x2   : > { %p91_p1 = scmp.lt.s32.totalorder %s13727_s9, 3  ;;  %s13729_s11 = smov [#allocation2]  }
   0x3   : > { %s103_s12 = sshll.u32 %s13729_s11, 4  ;;  %p13764_p3 = scmp.eq.s32.totalorder %s9257_s10, 0  ;;  %s104_s12 = int_to_ptr.vmem [resolvable:$true] %s103_s12 }
   0x4   : > { %p13758_p2 = pnand %p9259_p0, %p91_p1  ;;  %s13689_s18 = scalar_lea.hbm %s15701_s1, 11264 }
   0x5   : > { %s15744_s14 = scalar_select %p13764_p3, 1, 0 }
   0x6   : > { %s15743_s13 = scalar_select %p13758_p2, 1, 0 }
   0x7   : > { %p13570_p4 = pneg %p13758_p2  ;;  %p13690_p6 = scmp.ne.s32.totalorder %s15701_s1, %s13689_s18 }
   0x8   : > { %p13696_p10 = scmp.lt.u32.totalorder %s13689_s18, %s15701_s1 }
   0x9   : > { %p13772_p5 = pnand %p13764_p3, %p13570_p4 }
   0xb   : > { %p13691_p7 = pneg %p13772_p5 }
   0xd   : > { %p13692_p8 = pnand %p13691_p7, %p13690_p6 }
   0xf   : > { %p13693_p9 = pneg %p13692_p8 }
  0x11   : > { %p13698_p11 = pnand %p13696_p10, %p13693_p9 }
  0x13   : > { %13701 = shalt.err (!%p13698_p11)
}
  0x14   : > { %s13702_s23 = scalar_lea.vmem %s104_s12, 11264  ;;  %p13710_p1 = scmp.lt.s32.totalorder %s104_s12, %s104_s12 }
  0x15   : > { %p13703_p12 = scmp.ne.s32.totalorder %s104_s12, %s13702_s23  ;;  %p13711_p4 = scmp.lt.s32.totalorder %s13702_s23, %s13702_s23 }
  0x17   : > { %p13705_p13 = pnand %p13703_p12, %p13691_p7  ;;  %p13712_p3 = por %p13711_p4, %p13710_p1 }
  0x19   : > { %p13706_p0 = pneg %p13705_p13 }
  0x1b   : > { %p13713_p2 = pnand %p13712_p3, %p13706_p0 }
  0x1d   : > { %13716 = shalt.err (!%p13713_p2)
}
  0x1e   : > { %s13730_s24 = smov 128   ;;  %s13731_s25 = smov 8  }
  0x1f   : > { %13573 = dma.hbm_to_vmem [thread:$0]  (!%p13772_p5), %s15701_s1, 11264, %s104_s12, [#allocation3], %s13730_s24, %s13730_s24, %s13731_s25  }
  0x20   : > { %p15746_p6 = scmp.ne.s32.totalorder %s15743_s13, 0 }
  0x22   : > { %128 = sbr.rel (%p15746_p6) target bundleno = 12227 (0x2fc3), region = 28 }
  0x29   : > { %p15747_p8 = scmp.ne.s32.totalorder %s15744_s14, 0 }
  0x2b   : > { %13722 = dma.done.wait (%p15747_p8), [#allocation3], 11264  }
  0x2c   : > { %13724 = vsyncadd (%p15747_p8), [#allocation3], 4294956032  ;;  %s9264_s28 = sshll.u32 %s9257_s10, 4  ;;  %vm270_vm0 = vcmask 64512   ;;  %v162_v0 = vld [vmem:[#allocation2] sm:$0xff]  ;;  %v164_v4 = vld [vmem:[#allocation2 + $0x10] sm:$0xff] }
  0x2d   : > { %p151_p2 = scmp.lt.s32.totalorder %s9264_s28, 31  ;;  %10684 = vmatprep.subr.mxu0 %v162_v0  ;;  %v165_v5 = vld [vmem:[#allocation2 + $0x18] sm:$0xff]  ;;  %v166_v8 = vld [vmem:[#allocation2 + $0x20] sm:$0xff]  ;;  %v167_v9 = vld [vmem:[#allocation2 + $0x28] sm:$0xff] }
  0x2e   : > { %10685 = vmatpush3.msra.mxu0 %v162_v0  ;;  %v12606_v7 = vpack.c.bf16 %v165_v5, %v164_v4  ;;  %v12610_v11 = vpack.c.bf16 %v167_v9, %v166_v8  ;;  %v168_v12 = vld [vmem:[#allocation2 + $0x30] sm:$0xff]  ;;  %v169_v13 = vld [vmem:[#allocation2 + $0x38] sm:$0xff]  ;;  %v170_v17 = vld [vmem:[#allocation2 + $0x40] sm:$0xff] }
  0x2f   : > { %s15795_s28 = smov (!%p151_p2, %s9264_s28), 31  ;;  %v12614_v15 = vpack.c.bf16 %v169_v13, %v168_v12  ;;  %v171_v18 = vld [vmem:[#allocation2 + $0x48] sm:$0xff]  ;;  %v172_v22 = vld [vmem:[#allocation2 + $0x50] sm:$0xff]  ;;  %v173_v23 = vld [vmem:[#allocation2 + $0x58] sm:$0xff] }
  0x30   : > { %s9265_s29 = sshll.u32 %s15795_s28, 3  ;;  %12607 = vmatprep.subr.bf16.mxu1 %v12606_v7  ;;  %v12618_v20 = vpack.c.bf16 %v171_v18, %v170_v17  ;;  %v12622_v25 = vpack.c.bf16 %v173_v23, %v172_v22  ;;  %v174_v27 = vld [vmem:[#allocation2 + $0x60] sm:$0xff]  ;;  %v175_v28 = vld [vmem:[#allocation2 + $0x68] sm:$0xff]  ;;  %v176_v35 = vld [vmem:[#allocation2 + $0x70] sm:$0xff] }
  0x31   : > { %s13808_s4 = scalar_lea.vmem %s15700_s0, %s9265_s29  ;;  %12609 = vmatpush3.bf16.msra.mxu1 %v12606_v7  ;;  %v12626_v30 = vpack.c.bf16 %v175_v28, %v174_v27  ;;  %v177_v36 = vld [vmem:[#allocation2 + $0x78] sm:$0xff]  ;;  %v178_v38 = vld [vmem:[#allocation2 + $0x80] sm:$0xff]  ;;  %v179_v39 = vld [vmem:[#allocation2 + $0x88] sm:$0xff]  ;;  %s14209_s7 = scalar_lea.vmem %s15702_s2, %s9265_s29 }
  0x32   : > { %v250_v1 = vld [vmem:[%s13808_s4] sm:$0xff]  ;;  %v251_v2 = vld [vmem:[%s13808_s4 + $0x8] sm:$0xff]  ;;  %v252_v3 = vld [vmem:[%s13808_s4 + $0x10] sm:$0xff]  ;;  %12611 = vmatprep.subr.bf16.mxu1 %v12610_v11  ;;  %v12630_v37 = vpack.c.bf16 %v177_v36, %v176_v35  ;;  %v12634_v40 = vpack.c.bf16 %v179_v39, %v178_v38 }
  0x33   : > { %10686 = vmatprep.mubr.msk.f32.mxu0 %vm270_vm0, %v250_v1  ;;  %v253_v6 = vld [vmem:[%s13808_s4 + $0x18] sm:$0xff]  ;;  %v254_v10 = vld [vmem:[%s13808_s4 + $0x20] sm:$0xff]  ;;  %v255_v14 = vld [vmem:[%s13808_s4 + $0x28] sm:$0xff] }
  0x34   : > { %10687 = vmatmul.mubr.msk.f32.vlgmr.msra.gmra.mrb[0].mxu0 %vm270_vm0, %v251_v2  ;;  %v256_v16 = vld [vmem:[%s13808_s4 + $0x30] sm:$0xff]  ;;  %v257_v19 = vld [vmem:[%s13808_s4 + $0x38] sm:$0xff]  ;;  %v258_v21 = vld [vmem:[%s13808_s4 + $0x40] sm:$0xff] }
  0x35   : > { %10689 = vmatprep.mubr.msk.f32.mxu0 %vm270_vm0, %v252_v3  ;;  %12613 = vmatpush3.bf16.msra.mxu1 %v12610_v11  ;;  %v259_v24 = vld [vmem:[%s13808_s4 + $0x48] sm:$0xff]  ;;  %v260_v26 = vld [vmem:[%s13808_s4 + $0x50] sm:$0xff]  ;;  %v261_v29 = vld [vmem:[%s13808_s4 + $0x58] sm:$0xff] }
  0x36   : > { %12615 = vmatprep.subr.bf16.mxu1 %v12614_v15  ;;  %v262_v31 = vld [vmem:[%s13808_s4 + $0x60] sm:$0xff]  ;;  %v263_v32 = vld [vmem:[%s13808_s4 + $0x68] sm:$0xff]  ;;  %v264_v33 = vld [vmem:[%s13808_s4 + $0x70] sm:$0xff] }
  0x37   : > { %v265_v34 = vld [vmem:[%s13808_s4 + $0x78] sm:$0xff]  ;;  %v190_v41 = vld [vmem:[#allocation2 + $0xe0] sm:$0xff]  ;;  %v191_v42 = vld [vmem:[#allocation2 + $0xe8] sm:$0xff] }
  0x38   : > { %10690 = vmatmul.mubr.msk.f32.gmra.mrb[2].mxu0 %vm270_vm0, %v253_v6  ;;  %v12654_v43 = vpack.c.bf16 %v191_v42, %v190_v41  ;;  %v181_v44 = vld [vmem:[#allocation2 + $0x98] sm:$0xff]  ;;  %v182_v45 = vld [vmem:[#allocation2 + $0xa0] sm:$0xff]  ;;  %v183_v47 = vld [vmem:[#allocation2 + $0xa8] sm:$0xff] }
  0x39   : > { %10692 = vmatprep.mubr.msk.f32.mxu0 %vm270_vm0, %v254_v10  ;;  %12617 = vmatpush3.bf16.msra.mxu1 %v12614_v15  ;;  %v12638_v46 = vpack.c.bf16 %v182_v45, %v181_v44  ;;  %v184_v48 = vld [vmem:[#allocation2 + $0xb0] sm:$0xff]  ;;  %v13842_v50 = vld [vmem:[#allocation2 + $0x8] ss:$0 sm:$0xff]  ;;  %v193_v57 = vld [vmem:[#allocation2 + $0xf8] sm:$0xff] }
  0x3a   : > { %12619 = vmatprep.subr.bf16.mxu1 %v12618_v20  ;;  %v12642_v49 = vpack.c.bf16 %v184_v48, %v183_v47  ;;  %v192_v56 = vld [vmem:[#allocation2 + $0xf0] sm:$0xff]  ;;  %v194_v3 = vld [vmem:[#allocation2 + $0x100] sm:$0xff]  ;;  %v195_v4 = vld [vmem:[#allocation2 + $0x108] sm:$0xff] }
  0x3b   : > { %12639 = vmatprep.subr.bf16.mxu0 %v12638_v46  ;;  %v12658_v0 = vpack.c.bf16 %v193_v57, %v192_v56  ;;  %v12662_v12 = vpack.c.bf16 %v195_v4, %v194_v3 }
  0x3c   : > { %10693 = vmatmul.mubr.msk.f32.gmra.mrb[4].mxu0 %vm270_vm0, %v255_v14 }
  0x3d   : > { %10695 = vmatprep.mubr.msk.f32.mxu0 %vm270_vm0, %v256_v16  ;;  %12621 = vmatpush3.bf16.msra.mxu1 %v12618_v20 }
  0x3e   : > { %12623 = vmatprep.subr.bf16.mxu1 %v12622_v25  ;;  %12641 = vmatpush3.bf16.msra.mxu0 %v12638_v46 }
  0x3f   : > { %12643 = vmatprep.subr.bf16.mxu0 %v12642_v49 }
  0x40   : > { %10696 = vmatmul.mubr.msk.f32.gmra.mrb[6].mxu0 %vm270_vm0, %v257_v19 }
  0x41   : > { %10698 = vmatprep.mubr.msk.f32.mxu0 %vm270_vm0, %v258_v21  ;;  %12625 = vmatpush3.bf16.msra.mxu1 %v12622_v25 }
  0x42   : > { %12627 = vmatprep.subr.bf16.mxu1 %v12626_v30  ;;  %12645 = vmatpush3.bf16.msra.mxu0 %v12642_v49 }
  0x44   : > { %10699 = vmatmul.mubr.msk.f32.gmra.mrb[8].mxu0 %vm270_vm0, %v259_v24 }
  0x45   : > { %10701 = vmatprep.mubr.msk.f32.mxu0 %vm270_vm0, %v260_v26  ;;  %12629 = vmatpush3.bf16.msra.mxu1 %v12626_v30 }
  0x46   : > { %12631 = vmatprep.subr.bf16.mxu1 %v12630_v37 }
  0x48   : > { %10702 = vmatmul.mubr.msk.f32.gmra.mrb[10].mxu0 %vm270_vm0, %v261_v29 }
  0x49   : > { %10704 = vmatprep.mubr.msk.f32.mxu0 %vm270_vm0, %v262_v31  ;;  %12633 = vmatpush3.bf16.msra.mxu1 %v12630_v37 }
  0x4a   : > { %12635 = vmatprep.subr.bf16.mxu1 %v12634_v40 }
  0x4c   : > { %10705 = vmatmul.mubr.msk.f32.gmra.mrb[12].mxu0 %vm270_vm0, %v263_v32 }
  0x4d   : > { %10707 = vmatprep.mubr.msk.f32.mxu0 %vm270_vm0, %v264_v33  ;;  %12637 = vmatpush3.bf16.msra.mxu1 %v12634_v40 }
  0x4e   : > { %12655 = vmatprep.subr.bf16.mxu1 %v12654_v43 }
  0x50   : > { %10708 = vmatmul.mubr.msk.f32.gmra.mrb[14].mxu0 %vm270_vm0, %v265_v34 }
 0x107   : > { %v10688_v51 = vpop.f32.mrb[0].mxu0 }
 0x108   : > { %v391_v52 = vadd.f32 %v10688_v51, %v13842_v50  ;;  %v385_v53 = vpop.f32.mrb[1].mxu0 }
 0x109   : > { %v386_v54 = vadd.f32 %v13842_v50, %v385_v53 }
 0x10a   : > { %v481_v55 = vmul.f32 0.2, %v391_v52  ;;  %vm465_vm2 = vcmp.gt.f32.partialorder %v391_v52, 0.0 }
 0x10b   : > { %vm464_vm1 = vcmp.gt.f32.partialorder %v386_v54, 0.0  ;;  %v480_v58 = vmul.f32 0.2, %v386_v54  ;;  %v10691_v59 = vpop.f32.mrb[2].mxu0 }
 0x10c   : > { %v401_v60 = vadd.f32 %v10691_v59, %v13842_v50  ;;  %v395_v61 = vpop.f32.mrb[3].mxu0  ;;  %v497_v1 = vsel %vm465_vm2, %v391_v52, %v481_v55  ;;  %v186_v59 = vld [vmem:[#allocation2 + $0xc0] sm:$0xff] }
 0x10d   : > { %v496_v62 = vsel %vm464_vm1, %v386_v54, %v480_v58  ;;  %v396_v63 = vadd.f32 %v13842_v50, %v395_v61  ;;  %v185_v58 = vld [vmem:[#allocation2 + $0xb8] sm:$0xff]  ;;  %v196_v61 = vld [vmem:[#allocation2 + $0x110] sm:$0xff] }
 0x10e   : > { %10742 = vmatprep.mubr.f32.mxu1 %v496_v62  ;;  %v483_v2 = vmul.f32 0.2, %v401_v60  ;;  %vm467_vm3 = vcmp.gt.f32.partialorder %v401_v60, 0.0  ;;  %v197_v62 = vld [vmem:[#allocation2 + $0x118] sm:$0xff] }
 0x10f   : > { %10743 = vmatmul.mubr.f32.vlgmr.msra.gmra.mrb[0].mxu1 %v497_v1  ;;  %v482_v5 = vmul.f32 0.2, %v396_v63  ;;  %vm466_vm4 = vcmp.gt.f32.partialorder %v396_v63, 0.0  ;;  %v10694_v6 = vpop.f32.mrb[4].mxu0 }
 0x110   : > { %v499_v7 = vsel %vm467_vm3, %v401_v60, %v483_v2  ;;  %v411_v8 = vadd.f32 %v10694_v6, %v13842_v50  ;;  %v405_v9 = vpop.f32.mrb[5].mxu0  ;;  %12657 = vmatpush3.bf16.msra.mxu1 %v12654_v43  ;;  %v12646_v60 = vpack.c.bf16 %v186_v59, %v185_v58  ;;  %v13860_v2 = vld [vmem:[#allocation2 + $0x90] ss:$0 sm:$0xff] }
 0x111   : > { %v498_v10 = vsel %vm466_vm4, %v396_v63, %v482_v5  ;;  %v406_v11 = vadd.f32 %v13842_v50, %v405_v9  ;;  %12659 = vmatprep.subr.bf16.mxu1 %v12658_v0  ;;  %v187_v63 = vld [vmem:[#allocation2 + $0xc8] sm:$0xff]  ;;  %vm713_vm4 = vcmask 523264  }
 0x112   : > { %10745 = vmatprep.mubr.f32.mxu1 %v498_v10  ;;  %v485_v13 = vmul.f32 0.2, %v411_v8  ;;  %vm469_vm5 = vcmp.gt.f32.partialorder %v411_v8, 0.0  ;;  %12647 = vmatprep.subr.bf16.mxu0 %v12646_v60 }
 0x113   : > { %10746 = vmatmul.mubr.f32.gmra.mrb[2].mxu1 %v499_v7  ;;  %v484_v14 = vmul.f32 0.2, %v406_v11  ;;  %v10697_v15 = vpop.f32.mrb[6].mxu0  ;;  %vm468_vm6 = vcmp.gt.f32.partialorder %v406_v11, 0.0  ;;  %12649 = vmatpush3.bf16.msra.mxu0 %v12646_v60 }
 0x114   : > { %v421_v16 = vadd.f32 %v10697_v15, %v13842_v50  ;;  %v415_v17 = vpop.f32.mrb[7].mxu0  ;;  %v501_v18 = vsel %vm469_vm5, %v411_v8, %v485_v13  ;;  %12661 = vmatpush3.bf16.msra.mxu1 %v12658_v0  ;;  %v188_v0 = vld [vmem:[#allocation2 + $0xd0] sm:$0xff] }
 0x115   : > { %v416_v19 = vadd.f32 %v13842_v50, %v415_v17  ;;  %v500_v20 = vsel %vm468_vm6, %v406_v11, %v484_v14  ;;  %12663 = vmatprep.subr.bf16.mxu1 %v12662_v12  ;;  %v12650_v1 = vpack.c.bf16 %v188_v0, %v187_v63 }
 0x116   : > { %v487_v21 = vmul.f32 0.2, %v421_v16  ;;  %10748 = vmatprep.mubr.f32.mxu1 %v500_v20  ;;  %vm471_vm7 = vcmp.gt.f32.partialorder %v421_v16, 0.0 }
 0x117   : > { %v486_v22 = vmul.f32 0.2, %v416_v19  ;;  %10749 = vmatmul.mubr.f32.gmra.mrb[4].mxu1 %v501_v18  ;;  %v10700_v23 = vpop.f32.mrb[8].mxu0  ;;  %vm470_vm8 = vcmp.gt.f32.partialorder %v416_v19, 0.0  ;;  %12651 = vmatprep.subr.bf16.mxu0 %v12650_v1 }
 0x118   : > { %v431_v24 = vadd.f32 %v10700_v23, %v13842_v50  ;;  %v425_v25 = vpop.f32.mrb[9].mxu0  ;;  %v503_v26 = vsel %vm471_vm7, %v421_v16, %v487_v21  ;;  %12665 = vmatpush3.bf16.msra.mxu1 %v12662_v12  ;;  %12653 = vmatpush3.bf16.msra.mxu0 %v12650_v1 }
 0x119   : > { %v426_v27 = vadd.f32 %v13842_v50, %v425_v25  ;;  %v502_v28 = vsel %vm470_vm8, %v416_v19, %v486_v22 }
 0x11a   : > { %v489_v29 = vmul.f32 0.2, %v431_v24  ;;  %10751 = vmatprep.mubr.f32.mxu1 %v502_v28  ;;  %vm473_vm9 = vcmp.gt.f32.partialorder %v431_v24, 0.0 }
 0x11b   : > { %v488_v30 = vmul.f32 0.2, %v426_v27  ;;  %10752 = vmatmul.mubr.f32.gmra.mrb[6].mxu1 %v503_v26  ;;  %v10703_v31 = vpop.f32.mrb[10].mxu0  ;;  %vm472_vm10 = vcmp.gt.f32.partialorder %v426_v27, 0.0 }
 0x11c   : > { %v441_v32 = vadd.f32 %v10703_v31, %v13842_v50  ;;  %v435_v33 = vpop.f32.mrb[11].mxu0  ;;  %v505_v34 = vsel %vm473_vm9, %v431_v24, %v489_v29 }
 0x11d   : > { %v436_v35 = vadd.f32 %v13842_v50, %v435_v33  ;;  %v504_v36 = vsel %vm472_vm10, %v426_v27, %v488_v30 }
 0x11e   : > { %v491_v37 = vmul.f32 0.2, %v441_v32  ;;  %10754 = vmatprep.mubr.f32.mxu1 %v504_v36  ;;  %vm475_vm11 = vcmp.gt.f32.partialorder %v441_v32, 0.0 }
 0x11f   : > { %v490_v38 = vmul.f32 0.2, %v436_v35  ;;  %10755 = vmatmul.mubr.f32.gmra.mrb[8].mxu1 %v505_v34  ;;  %v10706_v39 = vpop.f32.mrb[12].mxu0  ;;  %vm474_vm12 = vcmp.gt.f32.partialorder %v436_v35, 0.0 }
 0x120   : > { %v451_v40 = vadd.f32 %v10706_v39, %v13842_v50  ;;  %v445_v41 = vpop.f32.mrb[13].mxu0  ;;  %v507_v42 = vsel %vm475_vm11, %v441_v32, %v491_v37 }
 0x121   : > { %v446_v43 = vadd.f32 %v13842_v50, %v445_v41  ;;  %v506_v44 = vsel %vm474_vm12, %v436_v35, %v490_v38 }
 0x122   : > { %v493_v45 = vmul.f32 0.2, %v451_v40  ;;  %10757 = vmatprep.mubr.f32.mxu1 %v506_v44  ;;  %vm477_vm13 = vcmp.gt.f32.partialorder %v451_v40, 0.0 }
 0x123   : > { %v492_v46 = vmul.f32 0.2, %v446_v43  ;;  %10758 = vmatmul.mubr.f32.gmra.mrb[10].mxu1 %v507_v42  ;;  %v10709_v47 = vpop.f32.mrb[14].mxu0  ;;  %vm476_vm14 = vcmp.gt.f32.partialorder %v446_v43, 0.0 }
 0x124   : > { %v461_v48 = vadd.f32 %v10709_v47, %v13842_v50  ;;  %v455_v49 = vpop.f32.mrb[15].mxu0  ;;  %v509_v51 = vsel %vm477_vm13, %v451_v40, %v493_v45 }
 0x125   : > { %v456_v52 = vadd.f32 %v13842_v50, %v455_v49  ;;  %v508_v53 = vsel %vm476_vm14, %v446_v43, %v492_v46  ;;  %v12666_v50 = vpack.c.bf16 %v197_v62, %v196_v61 }
 0x126   : > { %v495_v54 = vmul.f32 0.2, %v461_v48  ;;  %10760 = vmatprep.mubr.f32.mxu1 %v508_v53  ;;  %vm479_vm15 = vcmp.gt.f32.partialorder %v461_v48, 0.0 }
 0x127   : > { %v494_v55 = vmul.f32 0.2, %v456_v52  ;;  %10761 = vmatmul.mubr.f32.gmra.mrb[12].mxu1 %v509_v51  ;;  %vm478_vm1 = vcmp.gt.f32.partialorder %v456_v52, 0.0  ;;  %12667 = vmatprep.subr.bf16.mxu1 %v12666_v50 }
 0x128   : > { %v511_v56 = vsel %vm479_vm15, %v461_v48, %v495_v54  ;;  %12669 = vmatpush3.bf16.msra.mxu1 %v12666_v50 }
 0x129   : > { %v510_v57 = vsel %vm478_vm1, %v456_v52, %v494_v55 }
 0x12a   : > { %10763 = vmatprep.mubr.f32.mxu1 %v510_v57 }
 0x12b   : > { %10764 = vmatmul.mubr.f32.gmra.mrb[14].mxu1 %v511_v56 }
 0x1e2   : > { %v10744_v3 = vpop.f32.mrb[0].mxu1 }
 0x1e3   : > { %v588_v4 = vadd.f32 %v10744_v3, %v13860_v2  ;;  %v582_v5 = vpop.f32.mrb[1].mxu1 }
 0x1e4   : > { %v583_v6 = vadd.f32 %v13860_v2, %v582_v5 }
 0x1e5   : > { %v678_v7 = vmul.f32 0.2, %v588_v4  ;;  %vm662_vm2 = vcmp.gt.f32.partialorder %v588_v4, 0.0 }
 0x1e6   : > { %vm661_vm3 = vcmp.gt.f32.partialorder %v583_v6, 0.0  ;;  %v677_v8 = vmul.f32 0.2, %v583_v6  ;;  %v10747_v9 = vpop.f32.mrb[2].mxu1 }
 0x1e7   : > { %v598_v10 = vadd.f32 %v10747_v9, %v13860_v2  ;;  %v592_v11 = vpop.f32.mrb[3].mxu1  ;;  %v694_v14 = vsel %vm662_vm2, %v588_v4, %v678_v7  ;;  %v13912_v4 = vld [vmem:[#allocation2 + $0x120] ss:$0 sm:$0xff] }
 0x1e8   : > { %v693_v12 = vsel %vm661_vm3, %v583_v6, %v677_v8  ;;  %v593_v13 = vadd.f32 %v13860_v2, %v592_v11 }
 0x1e9   : > { %10782 = vmatprep.mubr.msk.f32.mxu0 %vm713_vm4, %v693_v12  ;;  %10822 = vmatprep.mubr.msk.f32.mxu1 %vm713_vm4, %v693_v12  ;;  %vm664_vm5 = vcmp.gt.f32.partialorder %v598_v10, 0.0  ;;  %v680_v15 = vmul.f32 0.2, %v598_v10 }
 0x1ea   : > { %10783 = vmatmul.mubr.msk.f32.vlgmr.msra.gmra.mrb[16].mxu0 %vm713_vm4, %v694_v14  ;;  %10823 = vmatmul.mubr.msk.f32.vlgmr.msra.gmra.mrb[16].mxu1 %vm713_vm4, %v694_v14  ;;  %vm663_vm6 = vcmp.gt.f32.partialorder %v593_v13, 0.0  ;;  %v679_v16 = vmul.f32 0.2, %v593_v13  ;;  %v10750_v17 = vpop.f32.mrb[4].mxu1 }
 0x1eb   : > { %v696_v18 = vsel %vm664_vm5, %v598_v10, %v680_v15  ;;  %v608_v19 = vadd.f32 %v10750_v17, %v13860_v2  ;;  %v602_v20 = vpop.f32.mrb[5].mxu1 }
 0x1ec   : > { %v695_v21 = vsel %vm663_vm6, %v593_v13, %v679_v16  ;;  %v603_v22 = vadd.f32 %v13860_v2, %v602_v20 }
 0x1ed   : > { %10825 = vmatprep.mubr.msk.f32.mxu1 %vm713_vm4, %v695_v21  ;;  %vm666_vm7 = vcmp.gt.f32.partialorder %v608_v19, 0.0  ;;  %v682_v23 = vmul.f32 0.2, %v608_v19  ;;  %10785 = vmatprep.mubr.msk.f32.mxu0 %vm713_vm4, %v695_v21 }
 0x1ee   : > { %10826 = vmatmul.mubr.msk.f32.gmra.mrb[18].mxu1 %vm713_vm4, %v696_v18  ;;  %vm665_vm8 = vcmp.gt.f32.partialorder %v603_v22, 0.0  ;;  %v681_v24 = vmul.f32 0.2, %v603_v22  ;;  %v10753_v25 = vpop.f32.mrb[6].mxu1  ;;  %10786 = vmatmul.mubr.msk.f32.gmra.mrb[18].mxu0 %vm713_vm4, %v696_v18  ;;  %v248_v18 = vld [vmem:[#allocation2 + $0x2b0] sm:$0xff] }
 0x1ef   : > { %v618_v26 = vadd.f32 %v10753_v25, %v13860_v2  ;;  %v612_v27 = vpop.f32.mrb[7].mxu1  ;;  %v698_v28 = vsel %vm666_vm7, %v608_v19, %v682_v23  ;;  %v249_v19 = vld [vmem:[#allocation2 + $0x2b8] sm:$0xff] }
 0x1f0   : > { %v613_v29 = vadd.f32 %v13860_v2, %v612_v27  ;;  %v697_v30 = vsel %vm665_vm8, %v603_v22, %v681_v24  ;;  %v13928_v24 = vpack.c.bf16 %v249_v19, %v248_v18 }
 0x1f1   : > { %vm668_vm9 = vcmp.gt.f32.partialorder %v618_v26, 0.0  ;;  %v684_v31 = vmul.f32 0.2, %v618_v26  ;;  %10828 = vmatprep.mubr.msk.f32.mxu1 %vm713_vm4, %v697_v30  ;;  %10788 = vmatprep.mubr.msk.f32.mxu0 %vm713_vm4, %v697_v30 }
 0x1f2   : > { %vm667_vm10 = vcmp.gt.f32.partialorder %v613_v29, 0.0  ;;  %v683_v32 = vmul.f32 0.2, %v613_v29  ;;  %10829 = vmatmul.mubr.msk.f32.gmra.mrb[20].mxu1 %vm713_vm4, %v698_v28  ;;  %v10756_v33 = vpop.f32.mrb[8].mxu1  ;;  %10789 = vmatmul.mubr.msk.f32.gmra.mrb[20].mxu0 %vm713_vm4, %v698_v28 }
 0x1f3   : > { %v628_v34 = vadd.f32 %v10756_v33, %v13860_v2  ;;  %v622_v35 = vpop.f32.mrb[9].mxu1  ;;  %v700_v36 = vsel %vm668_vm9, %v618_v26, %v684_v31 }
 0x1f4   : > { %v623_v37 = vadd.f32 %v13860_v2, %v622_v35  ;;  %v699_v38 = vsel %vm667_vm10, %v613_v29, %v683_v32 }
 0x1f5   : > { %vm670_vm11 = vcmp.gt.f32.partialorder %v628_v34, 0.0  ;;  %v686_v39 = vmul.f32 0.2, %v628_v34  ;;  %10831 = vmatprep.mubr.msk.f32.mxu1 %vm713_vm4, %v699_v38  ;;  %10791 = vmatprep.mubr.msk.f32.mxu0 %vm713_vm4, %v699_v38 }
 0x1f6   : > { %vm669_vm12 = vcmp.gt.f32.partialorder %v623_v37, 0.0  ;;  %v685_v40 = vmul.f32 0.2, %v623_v37  ;;  %10832 = vmatmul.mubr.msk.f32.gmra.mrb[22].mxu1 %vm713_vm4, %v700_v36  ;;  %v10759_v41 = vpop.f32.mrb[10].mxu1  ;;  %10792 = vmatmul.mubr.msk.f32.gmra.mrb[22].mxu0 %vm713_vm4, %v700_v36 }
 0x1f7   : > { %v638_v42 = vadd.f32 %v10759_v41, %v13860_v2  ;;  %v632_v43 = vpop.f32.mrb[11].mxu1  ;;  %v702_v44 = vsel %vm670_vm11, %v628_v34, %v686_v39 }
 0x1f8   : > { %v633_v45 = vadd.f32 %v13860_v2, %v632_v43  ;;  %v701_v46 = vsel %vm669_vm12, %v623_v37, %v685_v40 }
 0x1f9   : > { %vm672_vm13 = vcmp.gt.f32.partialorder %v638_v42, 0.0  ;;  %v688_v47 = vmul.f32 0.2, %v638_v42  ;;  %10834 = vmatprep.mubr.msk.f32.mxu1 %vm713_vm4, %v701_v46  ;;  %10794 = vmatprep.mubr.msk.f32.mxu0 %vm713_vm4, %v701_v46 }
 0x1fa   : > { %vm671_vm14 = vcmp.gt.f32.partialorder %v633_v45, 0.0  ;;  %v687_v48 = vmul.f32 0.2, %v633_v45  ;;  %10835 = vmatmul.mubr.msk.f32.gmra.mrb[24].mxu1 %vm713_vm4, %v702_v44  ;;  %v10762_v49 = vpop.f32.mrb[12].mxu1  ;;  %10795 = vmatmul.mubr.msk.f32.gmra.mrb[24].mxu0 %vm713_vm4, %v702_v44 }
 0x1fb   : > { %v648_v51 = vadd.f32 %v10762_v49, %v13860_v2  ;;  %v642_v52 = vpop.f32.mrb[13].mxu1  ;;  %v704_v53 = vsel %vm672_vm13, %v638_v42, %v688_v47 }
 0x1fc   : > { %v643_v54 = vadd.f32 %v13860_v2, %v642_v52  ;;  %v703_v55 = vsel %vm671_vm14, %v633_v45, %v687_v48 }
 0x1fd   : > { %vm674_vm15 = vcmp.gt.f32.partialorder %v648_v51, 0.0  ;;  %v690_v56 = vmul.f32 0.2, %v648_v51  ;;  %10837 = vmatprep.mubr.msk.f32.mxu1 %vm713_vm4, %v703_v55  ;;  %10797 = vmatprep.mubr.msk.f32.mxu0 %vm713_vm4, %v703_v55 }
 0x1fe   : > { %vm673_vm1 = vcmp.gt.f32.partialorder %v643_v54, 0.0  ;;  %v689_v57 = vmul.f32 0.2, %v643_v54  ;;  %10838 = vmatmul.mubr.msk.f32.gmra.mrb[26].mxu1 %vm713_vm4, %v704_v53  ;;  %v10765_v58 = vpop.f32.mrb[14].mxu1  ;;  %10798 = vmatmul.mubr.msk.f32.gmra.mrb[26].mxu0 %vm713_vm4, %v704_v53 }
 0x1ff   : > { %v658_v59 = vadd.f32 %v10765_v58, %v13860_v2  ;;  %v652_v60 = vpop.f32.mrb[15].mxu1  ;;  %v706_v61 = vsel %vm674_vm15, %v648_v51, %v690_v56 }
 0x200   : > { %v653_v62 = vadd.f32 %v13860_v2, %v652_v60  ;;  %v705_v63 = vsel %vm673_vm1, %v643_v54, %v689_v57  ;;  %v13910_v2 = vld [vmem:[#allocation2 + $0xd8] ss:$0 sm:$0xff] }
 0x201   : > { %vm676_vm2 = vcmp.gt.f32.partialorder %v658_v59, 0.0  ;;  %v692_v50 = vmul.f32 0.2, %v658_v59  ;;  %10840 = vmatprep.mubr.msk.f32.mxu1 %vm713_vm4, %v705_v63  ;;  %10800 = vmatprep.mubr.msk.f32.mxu0 %vm713_vm4, %v705_v63 }
 0x202   : > { %vm675_vm3 = vcmp.gt.f32.partialorder %v653_v62, 0.0  ;;  %v691_v0 = vmul.f32 0.2, %v653_v62  ;;  %10841 = vmatmul.mubr.msk.f32.gmra.mrb[28].mxu1 %vm713_vm4, %v706_v61  ;;  %10801 = vmatmul.mubr.msk.f32.gmra.mrb[28].mxu0 %vm713_vm4, %v706_v61 }
 0x203   : > { %v708_v1 = vsel %vm676_vm2, %v658_v59, %v692_v50 }
 0x204   : > { %v707_v3 = vsel %vm675_vm3, %v653_v62, %v691_v0 }
 0x205   : > { %10803 = vmatprep.mubr.msk.f32.mxu0 %vm713_vm4, %v707_v3  ;;  %10843 = vmatprep.mubr.msk.f32.mxu1 %vm713_vm4, %v707_v3 }
 0x206   : > { %10804 = vmatmul.mubr.msk.f32.gmra.mrb[30].mxu0 %vm713_vm4, %v708_v1  ;;  %10844 = vmatmul.mubr.msk.f32.gmra.mrb[30].mxu1 %vm713_vm4, %v708_v1 }
 0x2bd   : > { %v10784_v5 = vpop.f32.mrb[16].mxu0  ;;  %v10824_v6 = vpop.f32.mrb[16].mxu1 }
 0x2be   : > { %v13915_v7 = vadd.f32 %v10784_v5, %v13910_v2  ;;  %v13917_v8 = vpop.f32.mrb[17].mxu0  ;;  %v1025_v9 = vpop.f32.mrb[17].mxu1  ;;  %v1031_v11 = vadd.f32 %v10824_v6, %v13912_v4 }
 0x2bf   : > { %v1026_v10 = vadd.f32 %v13912_v4, %v1025_v9 }
 0x2c0   : > { %v1121_v14 = vmul.f32 0.2, %v1031_v11  ;;  %vm1105_vm4 = vcmp.gt.f32.partialorder %v1031_v11, 0.0 }
 0x2c1   : > { %v1120_v12 = vmul.f32 0.2, %v1026_v10  ;;  %vm1104_vm5 = vcmp.gt.f32.partialorder %v1026_v10, 0.0  ;;  %v10827_v16 = vpop.f32.mrb[18].mxu1  ;;  %v10787_v17 = vpop.f32.mrb[18].mxu0 }
 0x2c2   : > { %v13921_v15 = vsel %vm1105_vm4, %v1031_v11, %v1121_v14  ;;  %v1041_v20 = vadd.f32 %v10827_v16, %v13912_v4  ;;  %v1035_v21 = vpop.f32.mrb[19].mxu1  ;;  %v13926_v22 = vadd.f32 %v10787_v17, %v13910_v2  ;;  %v838_v23 = vpop.f32.mrb[19].mxu0  ;;  %vm1265_vm4 = vcmask 130048  }
 0x2c3   : > { %v1136_v13 = vsel %vm1104_vm5, %v1026_v10, %v1120_v12  ;;  %v1036_v25 = vadd.f32 %v13912_v4, %v1035_v21  ;;  %v13932_v27 = vadd.f32 %v13910_v2, %v838_v23 }
 0x2c4   : > { %1152 = vxpose.xlu0.b32.start.end [1/1] (short) (narrow) %v1136_v13, 16  ;;  %10846 = vmatprep.subr.mxu0 %v1136_v13  ;;  %v1123_v34 = vmul.f32 0.2, %v1041_v20  ;;  %vm1107_vm7 = vcmp.gt.f32.partialorder %v1041_v20, 0.0 }
 0x2c5   : > { %10847 = vmatpush3.msra.mxu0 %v1136_v13  ;;  %v10830_v26 = vpop.f32.mrb[20].mxu1  ;;  %v10790_v28 = vpop.f32.mrb[20].mxu0  ;;  %v1122_v30 = vmul.f32 0.2, %v1036_v25  ;;  %vm1106_vm6 = vcmp.gt.f32.partialorder %v1036_v25, 0.0 }
 0x2c6   : > { %v1045_v29 = vpop.f32.mrb[21].mxu1  ;;  %12671 = vmatprep.subr.bf16.mxu0 %v13928_v24  ;;  %v848_v33 = vpop.f32.mrb[21].mxu0  ;;  %v1051_v35 = vadd.f32 %v10830_v26, %v13912_v4  ;;  %v13940_v39 = vadd.f32 %v10790_v28, %v13910_v2  ;;  %v13947_v48 = vsel %vm1107_vm7, %v1041_v20, %v1123_v34 }
 0x2c7   : > { %v1046_v31 = vadd.f32 %v13912_v4, %v1045_v29  ;;  %v13937_v37 = vsel %vm1106_vm6, %v1036_v25, %v1122_v30  ;;  %v13944_v42 = vadd.f32 %v13910_v2, %v848_v33  ;;  %vm13733_vm6 = vmmov 0  }
 0x2c8   : > { %15748 = vst [vmem:[#allocation5_spill] sm:$0xff] %v13940_v39  ;;  %2203 = vxpose.xlu1.b32.start.end [1/1] (short) (narrow) %v13937_v37, 16  ;;  %v1125_v47 = vmul.f32 0.2, %v1051_v35  ;;  %vm1109_vm9 = vcmp.gt.f32.partialorder %v1051_v35, 0.0 }
 0x2c9   : > { %1704 = vxpose.xlu0.b32.start.end [1/1] (short) (narrow) %v13921_v15, 16  ;;  %v10833_v32 = vpop.f32.mrb[22].mxu1  ;;  %v1124_v38 = vmul.f32 0.2, %v1046_v31  ;;  %v10793_v40 = vpop.f32.mrb[22].mxu0  ;;  %vm1108_vm8 = vcmp.gt.f32.partialorder %v1046_v31, 0.0 }
 0x2ca   : > { %v1055_v36 = vpop.f32.mrb[23].mxu1  ;;  %v858_v44 = vpop.f32.mrb[23].mxu0  ;;  %v1061_v53 = vadd.f32 %v10833_v32, %v13912_v4  ;;  %v13954_v54 = vadd.f32 %v10793_v40, %v13910_v2  ;;  %v13969_v1 = vsel %vm1109_vm9, %v1051_v35, %v1125_v47  ;;  %vm908_vm9 = vcmp.gt.f32.partialorder %v13915_v7, 0.0 }
 0x2cb   : > { %v1056_v43 = vadd.f32 %v13912_v4, %v1055_v36  ;;  %v13949_v51 = vsel %vm1108_vm8, %v1046_v31, %v1124_v38  ;;  %v13957_v55 = vadd.f32 %v13910_v2, %v858_v44  ;;  %15754 = vst [vmem:[#allocation11_spill] sm:$0xff] %v13969_v1 }
 0x2cc   : > { %15749 = vst [vmem:[#allocation6_spill] sm:$0xff] %v13954_v54  ;;  %v1127_v3 = vmul.f32 0.2, %v1061_v53  ;;  %vm1111_vm12 = vcmp.gt.f32.partialorder %v1061_v53, 0.0 }
 0x2cd   : > { %v10836_v41 = vpop.f32.mrb[24].mxu1  ;;  %v10796_v46 = vpop.f32.mrb[24].mxu0  ;;  %v1126_v49 = vmul.f32 0.2, %v1056_v43  ;;  %15750 = vst [vmem:[#allocation7_spill] sm:$0xff] %v13957_v55  ;;  %vm1110_vm10 = vcmp.gt.f32.partialorder %v1056_v43, 0.0 }
 0x2ce   : > { %v1065_v45 = vpop.f32.mrb[25].mxu1  ;;  %v868_v52 = vpop.f32.mrb[25].mxu0  ;;  %3201 = vxpose.xlu0.b32.start.end [1/1] (short) (narrow) %v13949_v51, 16  ;;  %v13961_v59 = vadd.f32 %v10796_v46, %v13910_v2  ;;  %2702 = vxpose.xlu1.b32.start.end [1/1] (short) (narrow) %v13947_v48, 16  ;;  %v1071_v10 = vadd.f32 %v10836_v41, %v13912_v4  ;;  %v13986_v20 = vsel %vm1111_vm12, %v1061_v53, %v1127_v3  ;;  %v14036_v3 = vld [vmem:[#allocation2 + $0x240] sm:$0xff] }
 0x2cf   : > { %v1066_v56 = vadd.f32 %v13912_v4, %v1065_v45  ;;  %v13964_v60 = vadd.f32 %v13910_v2, %v868_v52  ;;  %v13967_v0 = vsel %vm1110_vm10, %v1056_v43, %v1126_v49  ;;  %15759 = vst [vmem:[#allocation16_spill] sm:$0xff] %v13986_v20 }
 0x2d0   : > { %15751 = vst [vmem:[#allocation8_spill] sm:$0xff] %v13961_v59  ;;  %15753 = vst [vmem:[#allocation10_spill] sm:$0xff] %v13967_v0  ;;  %v1129_v25 = vmul.f32 0.2, %v1071_v10  ;;  %vm1113_vm14 = vcmp.gt.f32.partialorder %v1071_v10, 0.0 }
 0x2d1   : > { %v10839_v57 = vpop.f32.mrb[26].mxu1  ;;  %v10799_v58 = vpop.f32.mrb[26].mxu0  ;;  %15752 = vst [vmem:[#allocation9_spill] sm:$0xff] %v13964_v60  ;;  %v1128_v50 = vmul.f32 0.2, %v1066_v56  ;;  %vm1112_vm11 = vcmp.gt.f32.partialorder %v1066_v56, 0.0 }
 0x2d2   : > { %v1075_v61 = vpop.f32.mrb[27].mxu1  ;;  %v878_v62 = vpop.f32.mrb[27].mxu0  ;;  %v13975_v11 = vadd.f32 %v10799_v58, %v13910_v2  ;;  %v1081_v30 = vadd.f32 %v10839_v57, %v13912_v4  ;;  %v14003_v34 = vsel %vm1113_vm14, %v1071_v10, %v1129_v25  ;;  %v14030_v58 = vld [vmem:[#allocation2 + $0x230] sm:$0xff]  ;;  %v14052_v10 = vld [vmem:[#allocation2 + $0x260] sm:$0xff]  ;;  %v14082_v25 = vld [vmem:[#allocation2 + $0x298] sm:$0xff] }
 0x2d3   : > { %4199 = vxpose.xlu0.b32.start.end [1/1] (short) (narrow) %v13967_v0, 16  ;;  %v1076_v5 = vadd.f32 %v13912_v4, %v1075_v61  ;;  %v13978_v12 = vadd.f32 %v13910_v2, %v878_v62  ;;  %3700 = vxpose.xlu1.b32.start.end [1/1] (short) (narrow) %v13969_v1, 16  ;;  %v13981_v16 = vsel %vm1112_vm11, %v1066_v56, %v1128_v50  ;;  %v14034_v50 = vld [vmem:[#allocation2 + $0x238] sm:$0xff]  ;;  %vm909_vm11 = vcmp.gt.f32.partialorder %v13932_v27, 0.0 }
 0x2d4   : > { %15755 = vst [vmem:[#allocation12_spill] sm:$0xff] %v13975_v11  ;;  %15757 = vst [vmem:[#allocation14_spill] sm:$0xff] %v13981_v16  ;;  %v1131_v36 = vmul.f32 0.2, %v1081_v30  ;;  %vm1115_vm1 = vcmp.gt.f32.partialorder %v1081_v30, 0.0 }
 0x2d5   : > { %v10842_v63 = vpop.f32.mrb[28].mxu1  ;;  %v10802_v6 = vpop.f32.mrb[28].mxu0  ;;  %15756 = vst [vmem:[#allocation13_spill] sm:$0xff] %v13978_v12  ;;  %v1130_v19 = vmul.f32 0.2, %v1076_v5  ;;  %vm1114_vm13 = vcmp.gt.f32.partialorder %v1076_v5, 0.0 }
 0x2d6   : > { %v1085_v9 = vpop.f32.mrb[29].mxu1  ;;  %v888_v13 = vpop.f32.mrb[29].mxu0  ;;  %v13984_v17 = vadd.f32 %v10802_v6, %v13910_v2  ;;  %15764 = vst [vmem:[#allocation21_spill] sm:$0xff] %v14003_v34  ;;  %v1091_v38 = vadd.f32 %v10842_v63, %v13912_v4  ;;  %v14011_v43 = vsel %vm1115_vm1, %v1081_v30, %v1131_v36  ;;  %v14044_v6 = vld [vmem:[#allocation2 + $0x250] sm:$0xff]  ;;  %v14090_v30 = vld [vmem:[#allocation2 + $0x2a8] sm:$0xff] }
 0x2d7   : > { %v1086_v21 = vadd.f32 %v13912_v4, %v1085_v9  ;;  %v13991_v26 = vadd.f32 %v13910_v2, %v888_v13  ;;  %v13998_v31 = vsel %vm1114_vm13, %v1076_v5, %v1130_v19  ;;  %15766 = vst [vmem:[#allocation23_spill] sm:$0xff] %v14011_v43  ;;  %v14042_v5 = vld [vmem:[#allocation2 + $0x248] sm:$0xff]  ;;  %v14050_v9 = vld [vmem:[#allocation2 + $0x258] sm:$0xff]  ;;  %v14068_v19 = vld [vmem:[#allocation2 + $0x280] sm:$0xff]  ;;  %vm910_vm13 = vcmp.gt.f32.partialorder %v13926_v22, 0.0 }
 0x2d8   : > { %15758 = vst [vmem:[#allocation15_spill] sm:$0xff] %v13984_v17  ;;  %5197 = vxpose.xlu0.b32.start.end [1/1] (short) (narrow) %v13981_v16, 16  ;;  %4698 = vxpose.xlu1.b32.start.end [1/1] (short) (narrow) %v13986_v20, 16  ;;  %15762 = vst [vmem:[#allocation19_spill] sm:$0xff] %v13998_v31  ;;  %v1133_v44 = vmul.f32 0.2, %v1091_v38 }
 0x2d9   : > { %v10845_v14 = vpop.f32.mrb[30].mxu1  ;;  %v10805_v18 = vpop.f32.mrb[30].mxu0  ;;  %15760 = vst [vmem:[#allocation17_spill] sm:$0xff] %v13991_v26  ;;  %v1132_v33 = vmul.f32 0.2, %v1086_v21  ;;  %vm1116_vm15 = vcmp.gt.f32.partialorder %v1086_v21, 0.0 }
 0x2da   : > { %v898_v23 = vpop.f32.mrb[31].mxu0  ;;  %v13994_v28 = vadd.f32 %v10805_v18, %v13910_v2  ;;  %v1095_v29 = vpop.f32.mrb[31].mxu1  ;;  %v1101_v45 = vadd.f32 %v10845_v14, %v13912_v4  ;;  %vm1117_vm3 = vcmp.gt.f32.partialorder %v1091_v38, 0.0  ;;  %v14058_v13 = vld [vmem:[#allocation2 + $0x268] sm:$0xff]  ;;  %v14060_v14 = vld [vmem:[#allocation2 + $0x270] sm:$0xff]  ;;  %v14066_v18 = vld [vmem:[#allocation2 + $0x278] sm:$0xff] }
 0x2db   : > { %v14001_v32 = vadd.f32 %v13910_v2, %v898_v23  ;;  %v1096_v35 = vadd.f32 %v13912_v4, %v1095_v29  ;;  %v14009_v40 = vsel %vm1116_vm15, %v1086_v21, %v1132_v33  ;;  %v14018_v47 = vsel %vm1117_vm3, %v1091_v38, %v1133_v44  ;;  %v14074_v21 = vld [vmem:[#allocation2 + $0x288] sm:$0xff]  ;;  %v14076_v23 = vld [vmem:[#allocation2 + $0x290] sm:$0xff]  ;;  %v14084_v29 = vld [vmem:[#allocation2 + $0x2a0] sm:$0xff] }
 0x2dc   : > { %15761 = vst [vmem:[#allocation18_spill] sm:$0xff] %v13994_v28  ;;  %15765 = vst [vmem:[#allocation22_spill] sm:$0xff] %v14009_v40  ;;  %v1135_v49 = vmul.f32 0.2, %v1101_v45  ;;  %vm1119_vm5 = vcmp.gt.f32.partialorder %v1101_v45, 0.0  ;;  %v15717_v33 = vmov 0.0|0.0  }
 0x2dd   : > { %15763 = vst [vmem:[#allocation20_spill] sm:$0xff] %v14001_v32  ;;  %6195 = vxpose.xlu0.b32.start.end [1/1] (short) (narrow) %v13998_v31, 16  ;;  %5696 = vxpose.xlu1.b32.start.end [1/1] (short) (narrow) %v14003_v34, 16  ;;  %v1134_v41 = vmul.f32 0.2, %v1096_v35  ;;  %vm1118_vm2 = vcmp.gt.f32.partialorder %v1096_v35, 0.0 }
 0x2de   : > { %15768 = vst [vmem:[#allocation25_spill] sm:$0xff] %v14018_v47  ;;  %v14022_v52 = vsel %vm1119_vm5, %v1101_v45, %v1135_v49  ;;  %12678 = vmatprep.subr.bf16.mxu1 %v15717_v33  ;;  %v199_v36 = vld [vmem:[#allocation2 + $0x128] sm:$0xff]  ;;  %v200_v38 = vld [vmem:[#allocation2 + $0x130] sm:$0xff]  ;;  %v202_v45 = vld [vmem:[#allocation2 + $0x140] sm:$0xff]  ;;  %vm911_vm15 = vcmp.gt.f32.partialorder %v13944_v42, 0.0 }
 0x2df   : > { %v14016_v46 = vsel %vm1118_vm2, %v1096_v35, %v1134_v41  ;;  %15769 = vst [vmem:[#allocation26_spill] sm:$0xff] %v14022_v52  ;;  %v15706_v35 = vmov 0.0   ;;  %v201_v41 = vld [vmem:[#allocation2 + $0x138] sm:$0xff]  ;;  %v14100_v44 = vpack.c.bf16 %v200_v38, %v199_v36  ;;  %v208_v36 = vld [vmem:[#allocation2 + $0x170] sm:$0xff]  ;;  %v14138_v32 = vld [vmem:[#allocation2 + $0x1c8] sm:$0xff] }
 0x2e0   : > { %15767 = vst [vmem:[#allocation24_spill] sm:$0xff] %v14016_v46  ;;  %10918 = vmatprep.mubr.msk.f32.mxu1 %vm13733_vm6, %v15706_v35  ;;  %v14103_v49 = vpack.c.bf16 %v202_v45, %v201_v41  ;;  %v209_v41 = vld [vmem:[#allocation2 + $0x178] sm:$0xff]  ;;  %v210_v45 = vld [vmem:[#allocation2 + $0x180] sm:$0xff] }
 0x2e1   : > { %v14144_v26 = vld [vmem:[#allocation2 + $0x1d8] sm:$0xff] }
 0x2e2   : > { %7193 = vxpose.xlu0.b32.start.end [1/1] (short) (narrow) %v14009_v40, 16  ;;  %6694 = vxpose.xlu1.b32.start.end [1/1] (short) (narrow) %v14011_v43, 16  ;;  %v14146_v40 = vld [vmem:[#allocation2 + $0x1d0] sm:$0xff] }
 0x2e7   : > { %8191 = vxpose.xlu0.b32.start.end [1/1] (short) (narrow) %v14016_v46, 16  ;;  %7692 = vxpose.xlu1.b32.start.end [1/1] (short) (narrow) %v14018_v47, 16 }
 0x2ec   : > { %8690 = vxpose.xlu1.b32.start.end [1/1] (short) (narrow) %v14022_v52, 16 }
 0x344   : > { %v1168_v53 = vpop.trf.xlu0 }
 0x345   : > { %10848 = vmatprep.mubr.msk.f32.mxu0 %vm270_vm0, %v1168_v53  ;;  %v203_v53 = vld [vmem:[#allocation2 + $0x148] sm:$0xff] }
 0x348   : > { %v1169_v4 = vpop.trf.xlu0 }
 0x349   : > { %10849 = vmatmul.mubr.msk.f32.vlgmr.msra.gmra.mrb[32].mxu0 %vm270_vm0, %v1169_v4  ;;  %v204_v4 = vld [vmem:[#allocation2 + $0x150] sm:$0xff] }
 0x34a   : > { %12673 = vmatpush3.bf16.msra.mxu0 %v13928_v24 }
 0x34c   : > { %v1720_v39 = vpop.trf.xlu0 }
 0x41c   : > { %v10850_v56 = vpop.f32.mrb[32].mxu0 }
 0x41d   : > { %v1256_v57 = vpop.f32.mrb[33].mxu0 }
 0x41e   : > { %10855 = vmatprep.mubr.msk.f32.mxu0 %vm1265_vm4, %v1256_v57  ;;  %v205_v57 = vld [vmem:[#allocation2 + $0x158] sm:$0xff] }
 0x41f   : > { %10856 = vmatmul.mubr.msk.f32.vlgmr.msra.gmra.mrb[34].mxu0 %vm1265_vm4, %v10850_v56  ;;  %v14107_v56 = vpack.c.bf16 %v204_v4, %v203_v53  ;;  %v14119_v53 = vpack.c.bf16 %v210_v45, %v209_v41  ;;  %v211_v4 = vld [vmem:[#allocation2 + $0x188] sm:$0xff]  ;;  %v14132_v41 = vld [vmem:[#allocation2 + $0x1b8] sm:$0xff]  ;;  %v14134_v45 = vld [vmem:[#allocation2 + $0x1b0] sm:$0xff] }
 0x420   : > { %10862 = vmatprep.mubr.msk.f32.mxu0 %vm1265_vm4, %v14030_v58 }
 0x4f2   : > { %v10857_v61 = vpop.f32.mrb[34].mxu0 }
 0x4f3   : > { %v1338_v62 = vpop.f32.mrb[35].mxu0 }
 0x4f4   : > { %v12674_v63 = vpack.c.bf16 %v10857_v61, %v1338_v62  ;;  %v206_v61 = vld [vmem:[#allocation2 + $0x160] sm:$0xff] }
 0x4f5   : > { %v14111_v62 = vpack.c.bf16 %v206_v61, %v205_v57  ;;  %v212_v57 = vld [vmem:[#allocation2 + $0x190] sm:$0xff] }
 0x4f6   : > { %12675 = vmatprep.subr.bf16.mxu0 %v12674_v63  ;;  %v14123_v61 = vpack.c.bf16 %v212_v57, %v211_v4 }
 0x4f7   : > { %12677 = vmatpush3.bf16.msra.mxu0 %v12674_v63  ;;  %v207_v63 = vld [vmem:[#allocation2 + $0x168] sm:$0xff] }
 0x4f8   : > { %12702 = vmatprep.subr.bf16.mxu0 %v15717_v33  ;;  %v14115_v38 = vpack.c.bf16 %v208_v36, %v207_v63  ;;  %v213_v63 = vld [vmem:[#allocation2 + $0x198] sm:$0xff]  ;;  %v214_v36 = vld [vmem:[#allocation2 + $0x1a0] sm:$0xff] }
 0x4fa   : > { %10863 = vmatmul.mubr.msk.f32.vlgmr.msra.gmra.mrb[36].mxu0 %vm1265_vm4, %v14034_v50 }
 0x4fb   : > { %10865 = vmatprep.mubr.msk.f32.mxu0 %vm1265_vm4, %v14036_v3  ;;  %12704 = vmatpush3.bf16.msra.mxu0 %v14100_v44 }
 0x4fc   : > { %12705 = vmatprep.subr.bf16.mxu0 %v15717_v33 }
 0x4fe   : > { %10866 = vmatmul.mubr.msk.f32.gmra.mrb[38].mxu0 %vm1265_vm4, %v14042_v5 }
 0x4ff   : > { %10868 = vmatprep.mubr.msk.f32.mxu0 %vm1265_vm4, %v14044_v6  ;;  %12707 = vmatpush3.bf16.msra.mxu0 %v14103_v49 }
 0x500   : > { %12708 = vmatprep.subr.bf16.mxu0 %v15717_v33 }
 0x502   : > { %10869 = vmatmul.mubr.msk.f32.gmra.mrb[40].mxu0 %vm1265_vm4, %v14050_v9 }
 0x503   : > { %10871 = vmatprep.mubr.msk.f32.mxu0 %vm1265_vm4, %v14052_v10  ;;  %12710 = vmatpush3.bf16.msra.mxu0 %v14107_v56 }
 0x504   : > { %12711 = vmatprep.subr.bf16.mxu0 %v15717_v33 }
 0x506   : > { %10872 = vmatmul.mubr.msk.f32.gmra.mrb[42].mxu0 %vm1265_vm4, %v14058_v13 }
 0x507   : > { %10874 = vmatprep.mubr.msk.f32.mxu0 %vm1265_vm4, %v14060_v14  ;;  %12713 = vmatpush3.bf16.msra.mxu0 %v14111_v62 }
 0x508   : > { %12714 = vmatprep.subr.bf16.mxu0 %v15717_v33 }
 0x50a   : > { %10875 = vmatmul.mubr.msk.f32.gmra.mrb[44].mxu0 %vm1265_vm4, %v14066_v18 }
 0x50b   : > { %10877 = vmatprep.mubr.msk.f32.mxu0 %vm1265_vm4, %v14068_v19  ;;  %12716 = vmatpush3.bf16.msra.mxu0 %v14115_v38 }
 0x50c   : > { %12717 = vmatprep.subr.bf16.mxu0 %v15717_v33 }
 0x50e   : > { %10878 = vmatmul.mubr.msk.f32.gmra.mrb[46].mxu0 %vm1265_vm4, %v14074_v21 }
 0x50f   : > { %10880 = vmatprep.mubr.msk.f32.mxu0 %vm1265_vm4, %v14076_v23  ;;  %12719 = vmatpush3.bf16.msra.mxu0 %v14119_v53 }
 0x510   : > { %12720 = vmatprep.subr.bf16.mxu0 %v15717_v33 }
 0x512   : > { %10881 = vmatmul.mubr.msk.f32.gmra.mrb[48].mxu0 %vm1265_vm4, %v14082_v25 }
 0x513   : > { %10883 = vmatprep.mubr.msk.f32.mxu0 %vm1265_vm4, %v14084_v29  ;;  %12722 = vmatpush3.bf16.msra.mxu0 %v14123_v61 }
 0x514   : > { %12723 = vmatprep.subr.bf16.mxu0 %v15717_v33 }
 0x516   : > { %10884 = vmatmul.mubr.msk.f32.gmra.mrb[50].mxu0 %vm1265_vm4, %v14090_v30 }
 0x517   : > { %10953 = vmatprep.mubr.msk.f32.mxu0 %vm13733_vm6, %v15706_v35  ;;  %v14127_v35 = vpack.c.bf16 %v214_v36, %v213_v63  ;;  %v14140_v63 = vld [vmem:[#allocation2 + $0x1c0] sm:$0xff] }
 0x519   : > { %12725 = vmatpush3.bf16.msra.mxu0 %v14127_v35 }
 0x51a   : > { %12734 = vmatprep.subr.bf16.mxu0 %v15717_v33 }
 0x5cd   : > { %v10864_v4 = vpop.f32.mrb[36].mxu0 }
 0x5ce   : > { %v1541_v57 = vmul.f32 %v10864_v4, %v14132_v41  ;;  %v1461_v28 = vpop.f32.mrb[37].mxu0  ;;  %v15770_v4 = vmov 0.0|0.0  }
 0x5cf   : > { %v1540_v52 = vmul.f32 %v1461_v28, %v14134_v45 }
 0x5d1   : > { %v12679_v36 = vpack.c.bf16 %v1541_v57, %v1540_v52  ;;  %v10867_v46 = vpop.f32.mrb[38].mxu0  ;;  %v14151_v57 = vld [vmem:[#allocation2 + $0x1e8] sm:$0xff] }
 0x5d2   : > { %v1543_v17 = vmul.f32 %v10867_v46, %v14138_v32  ;;  %v1471_v47 = vpop.f32.mrb[39].mxu0  ;;  %v14153_v46 = vld [vmem:[#allocation2 + $0x1e0] sm:$0xff] }
 0x5d3   : > { %v1542_v33 = vmul.f32 %v1471_v47, %v14140_v63  ;;  %12680 = vmatpush3.bf16.msra.mxu1 %v12679_v36 }
 0x5d4   : > { %12681 = vmatprep.subr.bf16.mxu1 %v15770_v4 }
 0x5d5   : > { %v12682_v11 = vpack.c.bf16 %v1543_v17, %v1542_v33  ;;  %v10870_v28 = vpop.f32.mrb[40].mxu0  ;;  %v14158_v33 = vld [vmem:[#allocation2 + $0x1f8] sm:$0xff] }
 0x5d6   : > { %v1545_v43 = vmul.f32 %v10870_v28, %v14144_v26  ;;  %v1481_v12 = vpop.f32.mrb[41].mxu0  ;;  %v14160_v28 = vld [vmem:[#allocation2 + $0x1f0] sm:$0xff] }
 0x5d7   : > { %v1544_v52 = vmul.f32 %v1481_v12, %v14146_v40  ;;  %12683 = vmatpush3.bf16.msra.mxu1 %v12682_v11 }
 0x5d8   : > { %12684 = vmatprep.subr.bf16.mxu1 %v15770_v4 }
 0x5d9   : > { %v12685_v47 = vpack.c.bf16 %v1545_v43, %v1544_v52  ;;  %v10873_v36 = vpop.f32.mrb[42].mxu0  ;;  %v14165_v52 = vld [vmem:[#allocation2 + $0x208] sm:$0xff] }
 0x5da   : > { %v1547_v31 = vmul.f32 %v10873_v36, %v14151_v57  ;;  %v1491_v59 = vpop.f32.mrb[43].mxu0  ;;  %v14167_v36 = vld [vmem:[#allocation2 + $0x200] sm:$0xff] }
 0x5db   : > { %v1546_v17 = vmul.f32 %v1491_v59, %v14153_v46  ;;  %12686 = vmatpush3.bf16.msra.mxu1 %v12685_v47 }
 0x5dc   : > { %12687 = vmatprep.subr.bf16.mxu1 %v15770_v4 }
 0x5dd   : > { %v12688_v11 = vpack.c.bf16 %v1547_v31, %v1546_v17  ;;  %v10876_v12 = vpop.f32.mrb[44].mxu0  ;;  %v14172_v17 = vld [vmem:[#allocation2 + $0x218] sm:$0xff] }
 0x5de   : > { %v1549_v34 = vmul.f32 %v10876_v12, %v14158_v33  ;;  %v1501_v60 = vpop.f32.mrb[45].mxu0  ;;  %v14174_v12 = vld [vmem:[#allocation2 + $0x210] sm:$0xff] }
 0x5df   : > { %v1548_v43 = vmul.f32 %v1501_v60, %v14160_v28  ;;  %12689 = vmatpush3.bf16.msra.mxu1 %v12688_v11 }
 0x5e0   : > { %12690 = vmatprep.subr.bf16.mxu1 %v15770_v4 }
 0x5e1   : > { %v12691_v59 = vpack.c.bf16 %v1549_v34, %v1548_v43  ;;  %v10879_v47 = vpop.f32.mrb[46].mxu0  ;;  %v14179_v43 = vld [vmem:[#allocation2 + $0x228] sm:$0xff] }
 0x5e2   : > { %v1551_v16 = vmul.f32 %v10879_v47, %v14165_v52  ;;  %v1511_v54 = vpop.f32.mrb[47].mxu0  ;;  %v14181_v47 = vld [vmem:[#allocation2 + $0x220] sm:$0xff] }
 0x5e3   : > { %v1550_v31 = vmul.f32 %v1511_v54, %v14167_v36  ;;  %12692 = vmatpush3.bf16.msra.mxu1 %v12691_v59  ;;  %v829_v54 = vadd.f32 %v13910_v2, %v13917_v8  ;;  %v1721_v2 = vpop.trf.xlu0 }
 0x5e4   : > { %12693 = vmatprep.subr.bf16.mxu1 %v15770_v4 }
 0x5e5   : > { %v12694_v60 = vpack.c.bf16 %v1551_v16, %v1550_v31  ;;  %v10882_v11 = vpop.f32.mrb[48].mxu0  ;;  %vm907_vm7 = vcmp.gt.f32.partialorder %v829_v54, 0.0 }
 0x5e6   : > { %v1553_v20 = vmul.f32 %v10882_v11, %v14172_v17  ;;  %v1521_v55 = vpop.f32.mrb[49].mxu0 }
 0x5e7   : > { %v1552_v34 = vmul.f32 %v1521_v55, %v14174_v12  ;;  %12695 = vmatpush3.bf16.msra.mxu1 %v12694_v60  ;;  %v923_v55 = vmul.f32 0.2, %v829_v54 }
 0x5e8   : > { %12696 = vmatprep.subr.bf16.mxu1 %v15770_v4 }
 0x5e9   : > { %v12697_v59 = vpack.c.bf16 %v1553_v20, %v1552_v34  ;;  %v10885_v0 = vpop.f32.mrb[50].mxu0  ;;  %v939_v1 = vsel %vm907_vm7, %v829_v54, %v923_v55  ;;  %v15771_v20 = vmov 0.0  }
 0x5ea   : > { %v1555_v16 = vmul.f32 %v10885_v0, %v14179_v43  ;;  %v1531_v31 = vpop.f32.mrb[51].mxu0 }
 0x5eb   : > { %v1554_v11 = vmul.f32 %v1531_v31, %v14181_v47  ;;  %12698 = vmatpush3.bf16.msra.mxu1 %v12697_v59 }
 0x5ec   : > { %12699 = vmatprep.subr.bf16.mxu1 %v15770_v4 }
 0x5ed   : > { %v12700_v60 = vpack.c.bf16 %v1555_v16, %v1554_v11 }
 0x5ef   : > { %12701 = vmatpush3.bf16.msra.mxu1 %v12700_v60 }
 0x5f0   : > { %10956 = vmatprep.subr.mxu1 %v13921_v15 }
 0x5f2   : > { %10919 = vmatmul.mubr.f32.vlgmr.msra.gmra.mrb[32].mxu1 %v939_v1 }
 0x5f3   : > { %10957 = vmatpush3.msra.mxu1 %v13921_v15  ;;  %10958 = vmatprep.mubr.msk.f32.mxu1 %vm270_vm0, %v1720_v39  ;;  %v14201_v15 = vld [vmem:[#allocation2 + $0x1a8] ss:$0 sm:$0xff] }
 0x5f4   : > { %12727 = vmatprep.subr.bf16.mxu1 %v13928_v24 }
 0x5f6   : > { %10959 = vmatmul.mubr.msk.f32.vlgmr.msra.gmra.mrb[34].mxu1 %vm270_vm0, %v1721_v2 }
 0x5f7   : > { %12729 = vmatpush3.bf16.msra.mxu1 %v13928_v24 }
 0x6c5   : > { %v1622_v8 = vpop.f32.mrb[32].mxu1 }
 0x6c6   : > { %v10920_v0 = vpop.f32.mrb[33].mxu1  ;;  %10954 = vmatmul.mubr.f32.vlgmr.msra.gmra.mrb[52].mxu0 %v1622_v8 }
 0x6c7   : > { %11028 = vmatprep.mubr.msk.f32.mxu0 %vm13733_vm6, %v15771_v20 }
 0x6c9   : > { %v10960_v34 = vpop.f32.mrb[34].mxu1 }
 0x6ca   : > { %v1808_v1 = vpop.f32.mrb[35].mxu1 }
 0x6cb   : > { %10965 = vmatprep.mubr.msk.f32.mxu1 %vm1265_vm4, %v1808_v1 }
 0x6cc   : > { %10966 = vmatmul.mubr.msk.f32.vlgmr.msra.gmra.mrb[36].mxu1 %vm1265_vm4, %v10960_v34 }
 0x6cd   : > { %10972 = vmatprep.mubr.msk.f32.mxu1 %vm1265_vm4, %v14030_v58 }
 0x799   : > { %v1696_v39 = vpop.f32.mrb[52].mxu0 }
 0x79a   : > { %v1697_v54 = vadd.f32 %v14201_v15, %v1696_v39  ;;  %v10955_v59 = vpop.f32.mrb[53].mxu0 }
 0x79c   : > { %vm1700_vm8 = vcmp.gt.f32.partialorder %v1697_v54, 0.0  ;;  %v1701_v16 = vmul.f32 0.2, %v1697_v54 }
 0x79e   : > { %v1702_v31 = vsel %vm1700_vm8, %v1697_v54, %v1701_v16 }
 0x79f   : > { %1703 = vst.msk [vmem:[%s14209_s7] sm:$0xff] %vm270_vm0, %v1702_v31  ;;  %v10967_v11 = vpop.f32.mrb[36].mxu1 }
 0x7a0   : > { %v1889_v55 = vpop.f32.mrb[37].mxu1 }
 0x7a1   : > { %v12730_v60 = vpack.c.bf16 %v10967_v11, %v1889_v55 }
 0x7a3   : > { %12731 = vmatprep.subr.bf16.mxu1 %v12730_v60 }
 0x7a4   : > { %12733 = vmatpush3.bf16.msra.mxu1 %v12730_v60 }
 0x7a5   : > { %12758 = vmatprep.subr.bf16.mxu1 %v15770_v4 }
 0x7a7   : > { %10973 = vmatmul.mubr.msk.f32.vlgmr.msra.gmra.mrb[38].mxu1 %vm1265_vm4, %v14034_v50 }
 0x7a8   : > { %10975 = vmatprep.mubr.msk.f32.mxu1 %vm1265_vm4, %v14036_v3  ;;  %12760 = vmatpush3.bf16.msra.mxu1 %v14100_v44 }
 0x7a9   : > { %12761 = vmatprep.subr.bf16.mxu1 %v15770_v4 }
 0x7ab   : > { %10976 = vmatmul.mubr.msk.f32.gmra.mrb[40].mxu1 %vm1265_vm4, %v14042_v5 }
 0x7ac   : > { %10978 = vmatprep.mubr.msk.f32.mxu1 %vm1265_vm4, %v14044_v6  ;;  %12763 = vmatpush3.bf16.msra.mxu1 %v14103_v49 }
 0x7ad   : > { %12764 = vmatprep.subr.bf16.mxu1 %v15770_v4 }
 0x7af   : > { %10979 = vmatmul.mubr.msk.f32.gmra.mrb[42].mxu1 %vm1265_vm4, %v14050_v9 }
 0x7b0   : > { %10981 = vmatprep.mubr.msk.f32.mxu1 %vm1265_vm4, %v14052_v10  ;;  %12766 = vmatpush3.bf16.msra.mxu1 %v14107_v56 }
 0x7b1   : > { %12767 = vmatprep.subr.bf16.mxu1 %v15770_v4 }
 0x7b3   : > { %10982 = vmatmul.mubr.msk.f32.gmra.mrb[44].mxu1 %vm1265_vm4, %v14058_v13 }
 0x7b4   : > { %10984 = vmatprep.mubr.msk.f32.mxu1 %vm1265_vm4, %v14060_v14  ;;  %12769 = vmatpush3.bf16.msra.mxu1 %v14111_v62 }
 0x7b5   : > { %12770 = vmatprep.subr.bf16.mxu1 %v15770_v4 }
 0x7b7   : > { %10985 = vmatmul.mubr.msk.f32.gmra.mrb[46].mxu1 %vm1265_vm4, %v14066_v18 }
 0x7b8   : > { %10987 = vmatprep.mubr.msk.f32.mxu1 %vm1265_vm4, %v14068_v19  ;;  %12772 = vmatpush3.bf16.msra.mxu1 %v14115_v38 }
 0x7b9   : > { %12773 = vmatprep.subr.bf16.mxu1 %v15770_v4 }
 0x7bb   : > { %10988 = vmatmul.mubr.msk.f32.gmra.mrb[48].mxu1 %vm1265_vm4, %v14074_v21 }
 0x7bc   : > { %10990 = vmatprep.mubr.msk.f32.mxu1 %vm1265_vm4, %v14076_v23  ;;  %12775 = vmatpush3.bf16.msra.mxu1 %v14119_v53 }
 0x7bd   : > { %12776 = vmatprep.subr.bf16.mxu1 %v15770_v4 }
 0x7bf   : > { %10991 = vmatmul.mubr.msk.f32.gmra.mrb[50].mxu1 %vm1265_vm4, %v14082_v25 }
 0x7c0   : > { %10993 = vmatprep.mubr.msk.f32.mxu1 %vm1265_vm4, %v14084_v29  ;;  %12778 = vmatpush3.bf16.msra.mxu1 %v14123_v61 }
 0x7c1   : > { %12779 = vmatprep.subr.bf16.mxu1 %v15770_v4 }
 0x7c3   : > { %10994 = vmatmul.mubr.msk.f32.gmra.mrb[52].mxu1 %vm1265_vm4, %v14090_v30 }
 0x7c4   : > { %12781 = vmatpush3.bf16.msra.mxu1 %v14127_v35  ;;  %11063 = vmatprep.mubr.msk.f32.mxu1 %vm13733_vm6, %v15771_v20 }
 0x7c5   : > { %12783 = vmatprep.subr.bf16.mxu1 %v13928_v24 }
 0x87a   : > { %v10974_v2 = vpop.f32.mrb[38].mxu1 }
 0x87b   : > { %v2044_v8 = vmul.f32 %v10974_v2, %v14132_v41  ;;  %v1964_v0 = vpop.f32.mrb[39].mxu1 }
 0x87c   : > { %v2043_v34 = vmul.f32 %v1964_v0, %v14134_v45 }
 0x87e   : > { %v12735_v1 = vpack.c.bf16 %v2044_v8, %v2043_v34  ;;  %v10977_v39 = vpop.f32.mrb[40].mxu1 }
 0x87f   : > { %v2046_v54 = vmul.f32 %v10977_v39, %v14138_v32  ;;  %v1974_v59 = vpop.f32.mrb[41].mxu1 }
 0x880   : > { %v2045_v16 = vmul.f32 %v1974_v59, %v14140_v63  ;;  %12736 = vmatpush3.bf16.msra.mxu0 %v12735_v1 }
 0x881   : > { %12737 = vmatprep.subr.bf16.mxu0 %v15770_v4 }
 0x882   : > { %v12738_v31 = vpack.c.bf16 %v2046_v54, %v2045_v16  ;;  %v10980_v11 = vpop.f32.mrb[42].mxu1 }
 0x883   : > { %v2048_v55 = vmul.f32 %v10980_v11, %v14144_v26  ;;  %v1984_v60 = vpop.f32.mrb[43].mxu1 }
 0x884   : > { %v2047_v2 = vmul.f32 %v1984_v60, %v14146_v40  ;;  %12739 = vmatpush3.bf16.msra.mxu0 %v12738_v31 }
 0x885   : > { %12740 = vmatprep.subr.bf16.mxu0 %v15770_v4 }
 0x886   : > { %v12741_v8 = vpack.c.bf16 %v2048_v55, %v2047_v2  ;;  %v10983_v0 = vpop.f32.mrb[44].mxu1 }
 0x887   : > { %v2050_v34 = vmul.f32 %v10983_v0, %v14151_v57  ;;  %v1994_v39 = vpop.f32.mrb[45].mxu1 }
 0x888   : > { %v2049_v59 = vmul.f32 %v1994_v39, %v14153_v46  ;;  %12742 = vmatpush3.bf16.msra.mxu0 %v12741_v8 }
 0x889   : > { %12743 = vmatprep.subr.bf16.mxu0 %v15770_v4 }
 0x88a   : > { %v12744_v1 = vpack.c.bf16 %v2050_v34, %v2049_v59  ;;  %v10986_v54 = vpop.f32.mrb[46].mxu1 }
 0x88b   : > { %v2052_v16 = vmul.f32 %v10986_v54, %v14158_v33  ;;  %v2004_v11 = vpop.f32.mrb[47].mxu1 }
 0x88c   : > { %v2051_v60 = vmul.f32 %v2004_v11, %v14160_v28  ;;  %12745 = vmatpush3.bf16.msra.mxu0 %v12744_v1 }
 0x88d   : > { %12746 = vmatprep.subr.bf16.mxu0 %v15770_v4 }
 0x88e   : > { %v12747_v31 = vpack.c.bf16 %v2052_v16, %v2051_v60  ;;  %v10989_v55 = vpop.f32.mrb[48].mxu1 }
 0x88f   : > { %v2054_v2 = vmul.f32 %v10989_v55, %v14165_v52  ;;  %v2014_v0 = vpop.f32.mrb[49].mxu1 }
 0x890   : > { %v2053_v39 = vmul.f32 %v2014_v0, %v14167_v36  ;;  %12748 = vmatpush3.bf16.msra.mxu0 %v12747_v31  ;;  %v924_v31 = vmul.f32 0.2, %v13915_v7 }
 0x891   : > { %12749 = vmatprep.subr.bf16.mxu0 %v15770_v4 }
 0x892   : > { %v12750_v8 = vpack.c.bf16 %v2054_v2, %v2053_v39  ;;  %v10992_v34 = vpop.f32.mrb[50].mxu1  ;;  %v2219_v39 = vpop.trf.xlu1 }
 0x893   : > { %v2056_v59 = vmul.f32 %v10992_v34, %v14172_v17  ;;  %v2024_v54 = vpop.f32.mrb[51].mxu1 }
 0x894   : > { %v2055_v11 = vmul.f32 %v2024_v54, %v14174_v12  ;;  %12751 = vmatpush3.bf16.msra.mxu0 %v12750_v8  ;;  %v940_v8 = vsel %vm908_vm9, %v13915_v7, %v924_v31 }
 0x895   : > { %12752 = vmatprep.subr.bf16.mxu0 %v15770_v4 }
 0x896   : > { %v12753_v1 = vpack.c.bf16 %v2056_v59, %v2055_v11  ;;  %v10995_v16 = vpop.f32.mrb[52].mxu1  ;;  %v2220_v34 = vpop.trf.xlu1 }
 0x897   : > { %v2058_v60 = vmul.f32 %v10995_v16, %v14179_v43  ;;  %v2034_v55 = vpop.f32.mrb[53].mxu1 }
 0x898   : > { %v2057_v0 = vmul.f32 %v2034_v55, %v14181_v47  ;;  %12754 = vmatpush3.bf16.msra.mxu0 %v12753_v1 }
 0x899   : > { %12755 = vmatprep.subr.bf16.mxu0 %v15770_v4 }
 0x89a   : > { %v12756_v2 = vpack.c.bf16 %v2058_v60, %v2057_v0 }
 0x89c   : > { %12757 = vmatpush3.bf16.msra.mxu0 %v12756_v2 }
 0x89d   : > { %11066 = vmatprep.subr.mxu0 %v13937_v37 }
 0x89f   : > { %11029 = vmatmul.mubr.f32.vlgmr.msra.gmra.mrb[54].mxu0 %v940_v8 }
 0x8a0   : > { %11067 = vmatpush3.msra.mxu0 %v13937_v37  ;;  %11068 = vmatprep.mubr.msk.f32.mxu0 %vm270_vm0, %v2219_v39 }
 0x8a3   : > { %11069 = vmatmul.mubr.msk.f32.vlgmr.msra.gmra.mrb[56].mxu0 %vm270_vm0, %v2220_v34 }
 0x8a4   : > { %11082 = vmatprep.mubr.msk.f32.mxu0 %vm1265_vm4, %v14030_v58 }
 0x972   : > { %v2125_v59 = vpop.f32.mrb[54].mxu0 }
 0x973   : > { %v11030_v54 = vpop.f32.mrb[55].mxu0  ;;  %11064 = vmatmul.mubr.f32.vlgmr.msra.gmra.mrb[54].mxu1 %v2125_v59 }
 0x974   : > { %12785 = vmatpush3.bf16.msra.mxu1 %v13928_v24 }
 0x975   : > { %12790 = vmatprep.subr.bf16.mxu1 %v15770_v4 }
 0x976   : > { %v11070_v7 = vpop.f32.mrb[56].mxu0 }
 0x977   : > { %v2307_v11 = vpop.f32.mrb[57].mxu0 }
 0x978   : > { %11075 = vmatprep.mubr.msk.f32.mxu1 %vm1265_vm4, %v2307_v11 }
 0x979   : > { %11076 = vmatmul.mubr.msk.f32.vlgmr.msra.gmra.mrb[56].mxu1 %vm1265_vm4, %v11070_v7 }
 0x97a   : > { %11138 = vmatprep.mubr.msk.f32.mxu1 %vm13733_vm6, %v15771_v20 }
 0xa46   : > { %v2195_v37 = vpop.f32.mrb[54].mxu1 }
 0xa47   : > { %v2196_v1 = vadd.f32 %v14201_v15, %v2195_v37  ;;  %v11065_v16 = vpop.f32.mrb[55].mxu1 }
 0xa49   : > { %vm2199_vm10 = vcmp.gt.f32.partialorder %v2196_v1, 0.0  ;;  %v2200_v60 = vmul.f32 0.2, %v2196_v1 }
 0xa4b   : > { %v2201_v55 = vsel %vm2199_vm10, %v2196_v1, %v2200_v60 }
 0xa4c   : > { %2202 = vst.msk [vmem:[%s14209_s7 + $0x8] sm:$0xff] %vm270_vm0, %v2201_v55  ;;  %v11077_v0 = vpop.f32.mrb[56].mxu1 }
 0xa4d   : > { %v2388_v31 = vpop.f32.mrb[57].mxu1 }
 0xa4e   : > { %v12786_v2 = vpack.c.bf16 %v11077_v0, %v2388_v31 }
 0xa50   : > { %12787 = vmatprep.subr.bf16.mxu0 %v12786_v2 }
 0xa51   : > { %12789 = vmatpush3.bf16.msra.mxu0 %v12786_v2 }
 0xa52   : > { %12814 = vmatprep.subr.bf16.mxu0 %v15770_v4 }
 0xa54   : > { %11083 = vmatmul.mubr.msk.f32.vlgmr.msra.gmra.mrb[58].mxu0 %vm1265_vm4, %v14034_v50 }
 0xa55   : > { %11085 = vmatprep.mubr.msk.f32.mxu0 %vm1265_vm4, %v14036_v3  ;;  %12816 = vmatpush3.bf16.msra.mxu0 %v14100_v44 }
 0xa56   : > { %12817 = vmatprep.subr.bf16.mxu0 %v15770_v4 }
 0xa58   : > { %11086 = vmatmul.mubr.msk.f32.gmra.mrb[60].mxu0 %vm1265_vm4, %v14042_v5 }
 0xa59   : > { %11088 = vmatprep.mubr.msk.f32.mxu0 %vm1265_vm4, %v14044_v6  ;;  %12819 = vmatpush3.bf16.msra.mxu0 %v14103_v49 }
 0xa5a   : > { %12820 = vmatprep.subr.bf16.mxu0 %v15770_v4 }
 0xa5c   : > { %11089 = vmatmul.mubr.msk.f32.gmra.mrb[62].mxu0 %vm1265_vm4, %v14050_v9 }
 0xa5d   : > { %11091 = vmatprep.mubr.msk.f32.mxu0 %vm1265_vm4, %v14052_v10  ;;  %12822 = vmatpush3.bf16.msra.mxu0 %v14107_v56 }
 0xa5e   : > { %12823 = vmatprep.subr.bf16.mxu0 %v15770_v4 }
 0xa60   : > { %11092 = vmatmul.mubr.msk.f32.gmra.mrb[64].mxu0 %vm1265_vm4, %v14058_v13 }
 0xa61   : > { %11094 = vmatprep.mubr.msk.f32.mxu0 %vm1265_vm4, %v14060_v14  ;;  %12825 = vmatpush3.bf16.msra.mxu0 %v14111_v62 }
 0xa62   : > { %12826 = vmatprep.subr.bf16.mxu0 %v15770_v4 }
 0xa64   : > { %11095 = vmatmul.mubr.msk.f32.gmra.mrb[66].mxu0 %vm1265_vm4, %v14066_v18 }
 0xa65   : > { %11097 = vmatprep.mubr.msk.f32.mxu0 %vm1265_vm4, %v14068_v19  ;;  %12828 = vmatpush3.bf16.msra.mxu0 %v14115_v38 }
 0xa66   : > { %12829 = vmatprep.subr.bf16.mxu0 %v15770_v4 }
 0xa68   : > { %11098 = vmatmul.mubr.msk.f32.gmra.mrb[68].mxu0 %vm1265_vm4, %v14074_v21 }
 0xa69   : > { %11100 = vmatprep.mubr.msk.f32.mxu0 %vm1265_vm4, %v14076_v23  ;;  %12831 = vmatpush3.bf16.msra.mxu0 %v14119_v53 }
 0xa6a   : > { %12832 = vmatprep.subr.bf16.mxu0 %v15770_v4 }
 0xa6c   : > { %11101 = vmatmul.mubr.msk.f32.gmra.mrb[70].mxu0 %vm1265_vm4, %v14082_v25 }
 0xa6d   : > { %11103 = vmatprep.mubr.msk.f32.mxu0 %vm1265_vm4, %v14084_v29  ;;  %12834 = vmatpush3.bf16.msra.mxu0 %v14123_v61 }
 0xa6e   : > { %12835 = vmatprep.subr.bf16.mxu0 %v15770_v4 }
 0xa70   : > { %11104 = vmatmul.mubr.msk.f32.gmra.mrb[72].mxu0 %vm1265_vm4, %v14090_v30 }
 0xa71   : > { %12837 = vmatpush3.bf16.msra.mxu0 %v14127_v35  ;;  %11173 = vmatprep.mubr.msk.f32.mxu0 %vm13733_vm6, %v15771_v20 }
 0xa72   : > { %12839 = vmatprep.subr.bf16.mxu0 %v13928_v24 }
 0xb27   : > { %v11084_v39 = vpop.f32.mrb[58].mxu0 }
 0xb28   : > { %v2543_v8 = vmul.f32 %v11084_v39, %v14132_v41  ;;  %v2463_v34 = vpop.f32.mrb[59].mxu0 }
 0xb29   : > { %v2542_v59 = vmul.f32 %v2463_v34, %v14134_v45 }
 0xb2b   : > { %v12791_v54 = vpack.c.bf16 %v2543_v8, %v2542_v59  ;;  %v11087_v7 = vpop.f32.mrb[60].mxu0 }
 0xb2c   : > { %v2545_v11 = vmul.f32 %v11087_v7, %v14138_v32  ;;  %v2473_v37 = vpop.f32.mrb[61].mxu0 }
 0xb2d   : > { %v2544_v1 = vmul.f32 %v2473_v37, %v14140_v63  ;;  %12792 = vmatpush3.bf16.msra.mxu1 %v12791_v54 }
 0xb2e   : > { %12793 = vmatprep.subr.bf16.mxu1 %v15770_v4 }
 0xb2f   : > { %v12794_v16 = vpack.c.bf16 %v2545_v11, %v2544_v1  ;;  %v11090_v60 = vpop.f32.mrb[62].mxu0 }
 0xb30   : > { %v2547_v55 = vmul.f32 %v11090_v60, %v14144_v26  ;;  %v2483_v0 = vpop.f32.mrb[63].mxu0 }
 0xb31   : > { %v2546_v31 = vmul.f32 %v2483_v0, %v14146_v40  ;;  %12795 = vmatpush3.bf16.msra.mxu1 %v12794_v16 }
 0xb32   : > { %12796 = vmatprep.subr.bf16.mxu1 %v15770_v4 }
 0xb33   : > { %v12797_v2 = vpack.c.bf16 %v2547_v55, %v2546_v31  ;;  %v11093_v39 = vpop.f32.mrb[64].mxu0 }
 0xb34   : > { %v2549_v8 = vmul.f32 %v11093_v39, %v14151_v57  ;;  %v2493_v34 = vpop.f32.mrb[65].mxu0 }
 0xb35   : > { %v2548_v59 = vmul.f32 %v2493_v34, %v14153_v46  ;;  %12798 = vmatpush3.bf16.msra.mxu1 %v12797_v2 }
 0xb36   : > { %12799 = vmatprep.subr.bf16.mxu1 %v15770_v4 }
 0xb37   : > { %v12800_v54 = vpack.c.bf16 %v2549_v8, %v2548_v59  ;;  %v11096_v7 = vpop.f32.mrb[66].mxu0 }
 0xb38   : > { %v2551_v11 = vmul.f32 %v11096_v7, %v14158_v33  ;;  %v2503_v37 = vpop.f32.mrb[67].mxu0 }
 0xb39   : > { %v2550_v1 = vmul.f32 %v2503_v37, %v14160_v28  ;;  %12801 = vmatpush3.bf16.msra.mxu1 %v12800_v54 }
 0xb3a   : > { %12802 = vmatprep.subr.bf16.mxu1 %v15770_v4 }
 0xb3b   : > { %v12803_v16 = vpack.c.bf16 %v2551_v11, %v2550_v1  ;;  %v11099_v60 = vpop.f32.mrb[68].mxu0 }
 0xb3c   : > { %v2553_v55 = vmul.f32 %v11099_v60, %v14165_v52  ;;  %v2513_v0 = vpop.f32.mrb[69].mxu0 }
 0xb3d   : > { %v2552_v31 = vmul.f32 %v2513_v0, %v14167_v36  ;;  %12804 = vmatpush3.bf16.msra.mxu1 %v12803_v16  ;;  %v925_v16 = vmul.f32 0.2, %v13932_v27 }
 0xb3e   : > { %12805 = vmatprep.subr.bf16.mxu1 %v15770_v4 }
 0xb3f   : > { %v12806_v2 = vpack.c.bf16 %v2553_v55, %v2552_v31  ;;  %v11102_v39 = vpop.f32.mrb[70].mxu0  ;;  %v2718_v55 = vpop.trf.xlu1  ;;  %v941_v0 = vsel %vm909_vm11, %v13932_v27, %v925_v16 }
 0xb40   : > { %v2555_v8 = vmul.f32 %v11102_v39, %v14172_v17  ;;  %v2523_v34 = vpop.f32.mrb[71].mxu0 }
 0xb41   : > { %v2554_v59 = vmul.f32 %v2523_v34, %v14174_v12  ;;  %12807 = vmatpush3.bf16.msra.mxu1 %v12806_v2 }
 0xb42   : > { %12808 = vmatprep.subr.bf16.mxu1 %v15770_v4 }
 0xb43   : > { %v12809_v54 = vpack.c.bf16 %v2555_v8, %v2554_v59  ;;  %v11105_v7 = vpop.f32.mrb[72].mxu0  ;;  %v2719_v31 = vpop.trf.xlu1 }
 0xb44   : > { %v2557_v11 = vmul.f32 %v11105_v7, %v14179_v43  ;;  %v2533_v37 = vpop.f32.mrb[73].mxu0 }
 0xb45   : > { %v2556_v1 = vmul.f32 %v2533_v37, %v14181_v47  ;;  %12810 = vmatpush3.bf16.msra.mxu1 %v12809_v54 }
 0xb46   : > { %12811 = vmatprep.subr.bf16.mxu1 %v15770_v4 }
 0xb47   : > { %v12812_v60 = vpack.c.bf16 %v2557_v11, %v2556_v1 }
 0xb49   : > { %12813 = vmatpush3.bf16.msra.mxu1 %v12812_v60 }
 0xb4a   : > { %11176 = vmatprep.subr.mxu1 %v13947_v48 }
 0xb4c   : > { %11139 = vmatmul.mubr.f32.vlgmr.msra.gmra.mrb[58].mxu1 %v941_v0 }
 0xb4d   : > { %11177 = vmatpush3.msra.mxu1 %v13947_v48  ;;  %11178 = vmatprep.mubr.msk.f32.mxu1 %vm270_vm0, %v2718_v55 }
 0xb50   : > { %11179 = vmatmul.mubr.msk.f32.vlgmr.msra.gmra.mrb[60].mxu1 %vm270_vm0, %v2719_v31 }
 0xb51   : > { %11192 = vmatprep.mubr.msk.f32.mxu1 %vm1265_vm4, %v14030_v58 }
 0xc1f   : > { %v2624_v2 = vpop.f32.mrb[58].mxu1 }
 0xc20   : > { %v11140_v39 = vpop.f32.mrb[59].mxu1  ;;  %11174 = vmatmul.mubr.f32.vlgmr.msra.gmra.mrb[74].mxu0 %v2624_v2 }
 0xc21   : > { %12841 = vmatpush3.bf16.msra.mxu0 %v13928_v24 }
 0xc22   : > { %12846 = vmatprep.subr.bf16.mxu0 %v15770_v4 }
 0xc23   : > { %v11180_v27 = vpop.f32.mrb[60].mxu1 }
 0xc24   : > { %v2806_v8 = vpop.f32.mrb[61].mxu1 }
 0xc25   : > { %11185 = vmatprep.mubr.msk.f32.mxu0 %vm1265_vm4, %v2806_v8 }
 0xc26   : > { %11186 = vmatmul.mubr.msk.f32.vlgmr.msra.gmra.mrb[76].mxu0 %vm1265_vm4, %v11180_v27 }
 0xc27   : > { %11248 = vmatprep.mubr.msk.f32.mxu0 %vm13733_vm6, %v15771_v20 }
 0xcf3   : > { %v2694_v48 = vpop.f32.mrb[74].mxu0 }
 0xcf4   : > { %v2695_v58 = vadd.f32 %v14201_v15, %v2694_v48  ;;  %v11175_v34 = vpop.f32.mrb[75].mxu0 }
 0xcf6   : > { %vm2698_vm12 = vcmp.gt.f32.partialorder %v2695_v58, 0.0  ;;  %v2699_v59 = vmul.f32 0.2, %v2695_v58 }
 0xcf8   : > { %v2700_v54 = vsel %vm2698_vm12, %v2695_v58, %v2699_v59 }
 0xcf9   : > { %2701 = vst.msk [vmem:[%s14209_s7 + $0x10] sm:$0xff] %vm270_vm0, %v2700_v54  ;;  %v11187_v7 = vpop.f32.mrb[76].mxu0 }
 0xcfa   : > { %v2887_v11 = vpop.f32.mrb[77].mxu0 }
 0xcfb   : > { %v12842_v37 = vpack.c.bf16 %v11187_v7, %v2887_v11 }
 0xcfd   : > { %12843 = vmatprep.subr.bf16.mxu1 %v12842_v37 }
 0xcfe   : > { %12845 = vmatpush3.bf16.msra.mxu1 %v12842_v37 }
 0xcff   : > { %12870 = vmatprep.subr.bf16.mxu1 %v15770_v4 }
 0xd01   : > { %11193 = vmatmul.mubr.msk.f32.vlgmr.msra.gmra.mrb[62].mxu1 %vm1265_vm4, %v14034_v50 }
 0xd02   : > { %11195 = vmatprep.mubr.msk.f32.mxu1 %vm1265_vm4, %v14036_v3  ;;  %12872 = vmatpush3.bf16.msra.mxu1 %v14100_v44 }
 0xd03   : > { %12873 = vmatprep.subr.bf16.mxu1 %v15770_v4 }
 0xd05   : > { %11196 = vmatmul.mubr.msk.f32.gmra.mrb[64].mxu1 %vm1265_vm4, %v14042_v5 }
 0xd06   : > { %11198 = vmatprep.mubr.msk.f32.mxu1 %vm1265_vm4, %v14044_v6  ;;  %12875 = vmatpush3.bf16.msra.mxu1 %v14103_v49 }
 0xd07   : > { %12876 = vmatprep.subr.bf16.mxu1 %v15770_v4 }
 0xd09   : > { %11199 = vmatmul.mubr.msk.f32.gmra.mrb[66].mxu1 %vm1265_vm4, %v14050_v9 }
 0xd0a   : > { %11201 = vmatprep.mubr.msk.f32.mxu1 %vm1265_vm4, %v14052_v10  ;;  %12878 = vmatpush3.bf16.msra.mxu1 %v14107_v56 }
 0xd0b   : > { %12879 = vmatprep.subr.bf16.mxu1 %v15770_v4 }
 0xd0d   : > { %11202 = vmatmul.mubr.msk.f32.gmra.mrb[68].mxu1 %vm1265_vm4, %v14058_v13 }
 0xd0e   : > { %11204 = vmatprep.mubr.msk.f32.mxu1 %vm1265_vm4, %v14060_v14  ;;  %12881 = vmatpush3.bf16.msra.mxu1 %v14111_v62 }
 0xd0f   : > { %12882 = vmatprep.subr.bf16.mxu1 %v15770_v4 }
 0xd11   : > { %11205 = vmatmul.mubr.msk.f32.gmra.mrb[70].mxu1 %vm1265_vm4, %v14066_v18 }
 0xd12   : > { %11207 = vmatprep.mubr.msk.f32.mxu1 %vm1265_vm4, %v14068_v19  ;;  %12884 = vmatpush3.bf16.msra.mxu1 %v14115_v38 }
 0xd13   : > { %12885 = vmatprep.subr.bf16.mxu1 %v15770_v4 }
 0xd15   : > { %11208 = vmatmul.mubr.msk.f32.gmra.mrb[72].mxu1 %vm1265_vm4, %v14074_v21 }
 0xd16   : > { %11210 = vmatprep.mubr.msk.f32.mxu1 %vm1265_vm4, %v14076_v23  ;;  %12887 = vmatpush3.bf16.msra.mxu1 %v14119_v53 }
 0xd17   : > { %12888 = vmatprep.subr.bf16.mxu1 %v15770_v4 }
 0xd19   : > { %11211 = vmatmul.mubr.msk.f32.gmra.mrb[74].mxu1 %vm1265_vm4, %v14082_v25 }
 0xd1a   : > { %11213 = vmatprep.mubr.msk.f32.mxu1 %vm1265_vm4, %v14084_v29  ;;  %12890 = vmatpush3.bf16.msra.mxu1 %v14123_v61 }
 0xd1b   : > { %12891 = vmatprep.subr.bf16.mxu1 %v15770_v4 }
 0xd1d   : > { %11214 = vmatmul.mubr.msk.f32.gmra.mrb[76].mxu1 %vm1265_vm4, %v14090_v30 }
 0xd1e   : > { %12893 = vmatpush3.bf16.msra.mxu1 %v14127_v35  ;;  %11283 = vmatprep.mubr.msk.f32.mxu1 %vm13733_vm6, %v15771_v20 }
 0xd1f   : > { %12895 = vmatprep.subr.bf16.mxu1 %v13928_v24 }
 0xdd4   : > { %v11194_v50 = vpop.f32.mrb[62].mxu1 }
 0xdd5   : > { %v3042_v3 = vmul.f32 %v11194_v50, %v14132_v41  ;;  %v2962_v5 = vpop.f32.mrb[63].mxu1 }
 0xdd6   : > { %v3041_v6 = vmul.f32 %v2962_v5, %v14134_v45 }
 0xdd8   : > { %v12847_v9 = vpack.c.bf16 %v3042_v3, %v3041_v6  ;;  %v11197_v10 = vpop.f32.mrb[64].mxu1 }
 0xdd9   : > { %v3044_v13 = vmul.f32 %v11197_v10, %v14138_v32  ;;  %v2972_v14 = vpop.f32.mrb[65].mxu1 }
 0xdda   : > { %v3043_v18 = vmul.f32 %v2972_v14, %v14140_v63  ;;  %12848 = vmatpush3.bf16.msra.mxu0 %v12847_v9 }
 0xddb   : > { %12849 = vmatprep.subr.bf16.mxu0 %v15770_v4 }
 0xddc   : > { %v12850_v19 = vpack.c.bf16 %v3044_v13, %v3043_v18  ;;  %v11200_v21 = vpop.f32.mrb[66].mxu1  ;;  %v926_v13 = vmul.f32 0.2, %v13926_v22  ;;  %v3217_v18 = vpop.trf.xlu0 }
 0xddd   : > { %v3046_v23 = vmul.f32 %v11200_v21, %v14144_v26  ;;  %v2982_v25 = vpop.f32.mrb[67].mxu1 }
 0xdde   : > { %v3045_v29 = vmul.f32 %v2982_v25, %v14146_v40  ;;  %12851 = vmatpush3.bf16.msra.mxu0 %v12850_v19  ;;  %v942_v19 = vsel %vm910_vm13, %v13926_v22, %v926_v13 }
 0xddf   : > { %12852 = vmatprep.subr.bf16.mxu0 %v15770_v4 }
 0xde0   : > { %v12853_v30 = vpack.c.bf16 %v3046_v23, %v3045_v29  ;;  %v11203_v1 = vpop.f32.mrb[68].mxu1  ;;  %v3218_v21 = vpop.trf.xlu0  ;;  %v14472_v23 = vld [vmem:[#allocation2 + $0x230] sm:$0xff] }
 0xde1   : > { %v3048_v16 = vmul.f32 %v11203_v1, %v14151_v57  ;;  %v2992_v60 = vpop.f32.mrb[69].mxu1 }
 0xde2   : > { %v3047_v55 = vmul.f32 %v2992_v60, %v14153_v46  ;;  %12854 = vmatpush3.bf16.msra.mxu0 %v12853_v30 }
 0xde3   : > { %12855 = vmatprep.subr.bf16.mxu0 %v15770_v4 }
 0xde4   : > { %v12856_v0 = vpack.c.bf16 %v3048_v16, %v3047_v55  ;;  %v11206_v31 = vpop.f32.mrb[70].mxu1 }
 0xde5   : > { %v3050_v2 = vmul.f32 %v11206_v31, %v14158_v33  ;;  %v3002_v39 = vpop.f32.mrb[71].mxu1 }
 0xde6   : > { %v3049_v27 = vmul.f32 %v3002_v39, %v14160_v28  ;;  %12857 = vmatpush3.bf16.msra.mxu0 %v12856_v0  ;;  %v14486_v39 = vld [vmem:[#allocation2 + $0x238] sm:$0xff] }
 0xde7   : > { %12858 = vmatprep.subr.bf16.mxu0 %v15770_v4 }
 0xde8   : > { %v12859_v8 = vpack.c.bf16 %v3050_v2, %v3049_v27  ;;  %v11209_v48 = vpop.f32.mrb[72].mxu1  ;;  %v14490_v27 = vld [vmem:[#allocation2 + $0x240] sm:$0xff] }
 0xde9   : > { %v3052_v58 = vmul.f32 %v11209_v48, %v14165_v52  ;;  %v3012_v34 = vpop.f32.mrb[73].mxu1  ;;  %v14500_v48 = vld [vmem:[#allocation2 + $0x250] sm:$0xff] }
 0xdea   : > { %v3051_v59 = vmul.f32 %v3012_v34, %v14167_v36  ;;  %12860 = vmatpush3.bf16.msra.mxu0 %v12859_v8  ;;  %v14496_v8 = vld [vmem:[#allocation2 + $0x248] sm:$0xff]  ;;  %v14510_v34 = vld [vmem:[#allocation2 + $0x260] sm:$0xff] }
 0xdeb   : > { %12861 = vmatprep.subr.bf16.mxu0 %v15770_v4 }
 0xdec   : > { %v12862_v54 = vpack.c.bf16 %v3052_v58, %v3051_v59  ;;  %v11212_v7 = vpop.f32.mrb[74].mxu1  ;;  %v14506_v58 = vld [vmem:[#allocation2 + $0x258] sm:$0xff]  ;;  %v14516_v59 = vld [vmem:[#allocation2 + $0x268] sm:$0xff] }
 0xded   : > { %v3054_v11 = vmul.f32 %v11212_v7, %v14172_v17  ;;  %v3022_v37 = vpop.f32.mrb[75].mxu1  ;;  %v14526_v7 = vld [vmem:[#allocation2 + $0x278] sm:$0xff] }
 0xdee   : > { %v3053_v50 = vmul.f32 %v3022_v37, %v14174_v12  ;;  %12863 = vmatpush3.bf16.msra.mxu0 %v12862_v54  ;;  %v14520_v54 = vld [vmem:[#allocation2 + $0x270] sm:$0xff]  ;;  %v14536_v37 = vld [vmem:[#allocation2 + $0x288] sm:$0xff] }
 0xdef   : > { %12864 = vmatprep.subr.bf16.mxu0 %v15770_v4 }
 0xdf0   : > { %v12865_v3 = vpack.c.bf16 %v3054_v11, %v3053_v50  ;;  %v11215_v5 = vpop.f32.mrb[76].mxu1  ;;  %v14530_v11 = vld [vmem:[#allocation2 + $0x280] sm:$0xff]  ;;  %v14540_v50 = vld [vmem:[#allocation2 + $0x290] sm:$0xff] }
 0xdf1   : > { %v3056_v6 = vmul.f32 %v11215_v5, %v14179_v43  ;;  %v3032_v9 = vpop.f32.mrb[77].mxu1  ;;  %v14550_v5 = vld [vmem:[#allocation2 + $0x2a0] sm:$0xff] }
 0xdf2   : > { %v3055_v10 = vmul.f32 %v3032_v9, %v14181_v47  ;;  %12866 = vmatpush3.bf16.msra.mxu0 %v12865_v3  ;;  %v14546_v3 = vld [vmem:[#allocation2 + $0x298] sm:$0xff] }
 0xdf3   : > { %12867 = vmatprep.subr.bf16.mxu0 %v15770_v4 }
 0xdf4   : > { %v12868_v14 = vpack.c.bf16 %v3056_v6, %v3055_v10  ;;  %v14556_v6 = vld [vmem:[#allocation2 + $0x2a8] sm:$0xff] }
 0xdf6   : > { %12869 = vmatpush3.bf16.msra.mxu0 %v12868_v14 }
 0xdf7   : > { %11286 = vmatprep.subr.mxu0 %v13949_v51 }
 0xdf9   : > { %11249 = vmatmul.mubr.f32.vlgmr.msra.gmra.mrb[78].mxu0 %v942_v19 }
 0xdfa   : > { %11287 = vmatpush3.msra.mxu0 %v13949_v51  ;;  %11288 = vmatprep.mubr.msk.f32.mxu0 %vm270_vm0, %v3217_v18 }
 0xdfd   : > { %11289 = vmatmul.mubr.msk.f32.vlgmr.msra.gmra.mrb[80].mxu0 %vm270_vm0, %v3218_v21 }
 0xdfe   : > { %11302 = vmatprep.mubr.msk.f32.mxu0 %vm1265_vm4, %v14472_v23 }
 0xecc   : > { %v3123_v25 = vpop.f32.mrb[78].mxu0 }
 0xecd   : > { %v11250_v29 = vpop.f32.mrb[79].mxu0  ;;  %11284 = vmatmul.mubr.f32.vlgmr.msra.gmra.mrb[78].mxu1 %v3123_v25 }
 0xece   : > { %12897 = vmatpush3.bf16.msra.mxu1 %v13928_v24 }
 0xecf   : > { %12902 = vmatprep.subr.bf16.mxu1 %v15770_v4 }
 0xed0   : > { %v11290_v22 = vpop.f32.mrb[80].mxu0 }
 0xed1   : > { %v3305_v51 = vpop.f32.mrb[81].mxu0 }
 0xed2   : > { %11295 = vmatprep.mubr.msk.f32.mxu1 %vm1265_vm4, %v3305_v51 }
 0xed3   : > { %11296 = vmatmul.mubr.msk.f32.vlgmr.msra.gmra.mrb[80].mxu1 %vm1265_vm4, %v11290_v22 }
 0xed4   : > { %11358 = vmatprep.mubr.msk.f32.mxu1 %vm13733_vm6, %v15771_v20 }
 0xfa0   : > { %v3193_v30 = vpop.f32.mrb[78].mxu1 }
 0xfa1   : > { %v3194_v1 = vadd.f32 %v14201_v15, %v3193_v30  ;;  %v11285_v16 = vpop.f32.mrb[79].mxu1 }
 0xfa3   : > { %vm3197_vm14 = vcmp.gt.f32.partialorder %v3194_v1, 0.0  ;;  %v3198_v60 = vmul.f32 0.2, %v3194_v1 }
 0xfa5   : > { %v3199_v55 = vsel %vm3197_vm14, %v3194_v1, %v3198_v60 }
 0xfa6   : > { %3200 = vst.msk [vmem:[%s14209_s7 + $0x18] sm:$0xff] %vm270_vm0, %v3199_v55  ;;  %v11297_v0 = vpop.f32.mrb[80].mxu1 }
 0xfa7   : > { %v3386_v31 = vpop.f32.mrb[81].mxu1 }
 0xfa8   : > { %v12898_v2 = vpack.c.bf16 %v11297_v0, %v3386_v31 }
 0xfaa   : > { %12899 = vmatprep.subr.bf16.mxu0 %v12898_v2 }
 0xfab   : > { %12901 = vmatpush3.bf16.msra.mxu0 %v12898_v2 }
 0xfac   : > { %12926 = vmatprep.subr.bf16.mxu0 %v15770_v4 }
 0xfae   : > { %11303 = vmatmul.mubr.msk.f32.vlgmr.msra.gmra.mrb[82].mxu0 %vm1265_vm4, %v14486_v39 }
 0xfaf   : > { %11305 = vmatprep.mubr.msk.f32.mxu0 %vm1265_vm4, %v14490_v27  ;;  %12928 = vmatpush3.bf16.msra.mxu0 %v14100_v44 }
 0xfb0   : > { %12929 = vmatprep.subr.bf16.mxu0 %v15770_v4 }
 0xfb2   : > { %11306 = vmatmul.mubr.msk.f32.gmra.mrb[84].mxu0 %vm1265_vm4, %v14496_v8 }
 0xfb3   : > { %11308 = vmatprep.mubr.msk.f32.mxu0 %vm1265_vm4, %v14500_v48  ;;  %12931 = vmatpush3.bf16.msra.mxu0 %v14103_v49 }
 0xfb4   : > { %12932 = vmatprep.subr.bf16.mxu0 %v15770_v4 }
 0xfb6   : > { %11309 = vmatmul.mubr.msk.f32.gmra.mrb[86].mxu0 %vm1265_vm4, %v14506_v58 }
 0xfb7   : > { %11311 = vmatprep.mubr.msk.f32.mxu0 %vm1265_vm4, %v14510_v34  ;;  %12934 = vmatpush3.bf16.msra.mxu0 %v14107_v56 }
 0xfb8   : > { %12935 = vmatprep.subr.bf16.mxu0 %v15770_v4 }
 0xfba   : > { %11312 = vmatmul.mubr.msk.f32.gmra.mrb[88].mxu0 %vm1265_vm4, %v14516_v59 }
 0xfbb   : > { %11314 = vmatprep.mubr.msk.f32.mxu0 %vm1265_vm4, %v14520_v54  ;;  %12937 = vmatpush3.bf16.msra.mxu0 %v14111_v62 }
 0xfbc   : > { %12938 = vmatprep.subr.bf16.mxu0 %v15770_v4 }
 0xfbe   : > { %11315 = vmatmul.mubr.msk.f32.gmra.mrb[90].mxu0 %vm1265_vm4, %v14526_v7 }
 0xfbf   : > { %11317 = vmatprep.mubr.msk.f32.mxu0 %vm1265_vm4, %v14530_v11  ;;  %12940 = vmatpush3.bf16.msra.mxu0 %v14115_v38 }
 0xfc0   : > { %12941 = vmatprep.subr.bf16.mxu0 %v15770_v4 }
 0xfc2   : > { %11318 = vmatmul.mubr.msk.f32.gmra.mrb[92].mxu0 %vm1265_vm4, %v14536_v37 }
 0xfc3   : > { %11320 = vmatprep.mubr.msk.f32.mxu0 %vm1265_vm4, %v14540_v50  ;;  %12943 = vmatpush3.bf16.msra.mxu0 %v14119_v53 }
 0xfc4   : > { %12944 = vmatprep.subr.bf16.mxu0 %v15770_v4 }
 0xfc6   : > { %11321 = vmatmul.mubr.msk.f32.gmra.mrb[94].mxu0 %vm1265_vm4, %v14546_v3 }
 0xfc7   : > { %11323 = vmatprep.mubr.msk.f32.mxu0 %vm1265_vm4, %v14550_v5  ;;  %12946 = vmatpush3.bf16.msra.mxu0 %v14123_v61 }
 0xfc8   : > { %12947 = vmatprep.subr.bf16.mxu0 %v15770_v4 }
 0xfca   : > { %11324 = vmatmul.mubr.msk.f32.gmra.mrb[96].mxu0 %vm1265_vm4, %v14556_v6 }
 0xfcb   : > { %12949 = vmatpush3.bf16.msra.mxu0 %v14127_v35  ;;  %11393 = vmatprep.mubr.msk.f32.mxu0 %vm13733_vm6, %v15771_v20 }
 0xfcc   : > { %12951 = vmatprep.subr.bf16.mxu0 %v13928_v24 }
0x1081   : > { %v11304_v9 = vpop.f32.mrb[82].mxu0 }
0x1082   : > { %v3541_v10 = vmul.f32 %v11304_v9, %v14132_v41  ;;  %v3461_v13 = vpop.f32.mrb[83].mxu0 }
0x1083   : > { %v3540_v14 = vmul.f32 %v3461_v13, %v14134_v45 }
0x1085   : > { %v12903_v18 = vpack.c.bf16 %v3541_v10, %v3540_v14  ;;  %v11307_v19 = vpop.f32.mrb[84].mxu0 }
0x1086   : > { %v3543_v21 = vmul.f32 %v11307_v19, %v14138_v32  ;;  %v3471_v25 = vpop.f32.mrb[85].mxu0 }
0x1087   : > { %v3542_v29 = vmul.f32 %v3471_v25, %v14140_v63  ;;  %12904 = vmatpush3.bf16.msra.mxu1 %v12903_v18 }
0x1088   : > { %12905 = vmatprep.subr.bf16.mxu1 %v15770_v4 }
0x1089   : > { %v12906_v22 = vpack.c.bf16 %v3543_v21, %v3542_v29  ;;  %v11310_v51 = vpop.f32.mrb[86].mxu0  ;;  %v927_v29 = vmul.f32 0.2, %v13944_v42 }
0x108a   : > { %v3545_v30 = vmul.f32 %v11310_v51, %v14144_v26  ;;  %v3481_v1 = vpop.f32.mrb[87].mxu0 }
0x108b   : > { %v3544_v41 = vmul.f32 %v3481_v1, %v14146_v40  ;;  %12907 = vmatpush3.bf16.msra.mxu1 %v12906_v22  ;;  %v943_v51 = vsel %vm911_vm15, %v13944_v42, %v927_v29 }
0x108c   : > { %12908 = vmatprep.subr.bf16.mxu1 %v15770_v4 }
0x108d   : > { %v12909_v45 = vpack.c.bf16 %v3545_v30, %v3544_v41  ;;  %v11313_v16 = vpop.f32.mrb[88].mxu0 }
0x108e   : > { %v3547_v32 = vmul.f32 %v11313_v16, %v14151_v57  ;;  %v3491_v60 = vpop.f32.mrb[89].mxu0 }
0x108f   : > { %v3546_v63 = vmul.f32 %v3491_v60, %v14153_v46  ;;  %12910 = vmatpush3.bf16.msra.mxu1 %v12909_v45 }
0x1090   : > { %12911 = vmatprep.subr.bf16.mxu1 %v15770_v4 }
0x1091   : > { %v12912_v55 = vpack.c.bf16 %v3547_v32, %v3546_v63  ;;  %v11316_v0 = vpop.f32.mrb[90].mxu0 }
0x1092   : > { %v3549_v26 = vmul.f32 %v11316_v0, %v14158_v33  ;;  %v3501_v31 = vpop.f32.mrb[91].mxu0 }
0x1093   : > { %v3548_v40 = vmul.f32 %v3501_v31, %v14160_v28  ;;  %12913 = vmatpush3.bf16.msra.mxu1 %v12912_v55 }
0x1094   : > { %12914 = vmatprep.subr.bf16.mxu1 %v15770_v4 }
0x1095   : > { %v12915_v2 = vpack.c.bf16 %v3549_v26, %v3548_v40  ;;  %v11319_v9 = vpop.f32.mrb[92].mxu0  ;;  %v14654_v26 = vld [vmem:[#allocation2 + $0x1b8] sm:$0xff] }
0x1096   : > { %v3551_v57 = vmul.f32 %v11319_v9, %v14165_v52  ;;  %v3511_v10 = vpop.f32.mrb[93].mxu0 }
0x1097   : > { %v3550_v46 = vmul.f32 %v3511_v10, %v14167_v36  ;;  %12916 = vmatpush3.bf16.msra.mxu1 %v12915_v2  ;;  %v14657_v2 = vld [vmem:[#allocation2 + $0x1b0] sm:$0xff] }
0x1098   : > { %12917 = vmatprep.subr.bf16.mxu1 %v15770_v4 }
0x1099   : > { %v12918_v13 = vpack.c.bf16 %v3551_v57, %v3550_v46  ;;  %v11322_v14 = vpop.f32.mrb[94].mxu0  ;;  %v14660_v46 = vld [vmem:[#allocation2 + $0x1c8] sm:$0xff] }
0x109a   : > { %v3553_v33 = vmul.f32 %v11322_v14, %v14172_v17  ;;  %v3521_v18 = vpop.f32.mrb[95].mxu0  ;;  %v3716_v17 = vpop.trf.xlu1 }
0x109b   : > { %v3552_v28 = vmul.f32 %v3521_v18, %v14174_v12  ;;  %12919 = vmatpush3.bf16.msra.mxu1 %v12918_v13  ;;  %v15772_v12 = vld [vmem:[#allocation11_spill] sm:$0xff] }
0x109c   : > { %12920 = vmatprep.subr.bf16.mxu1 %v15770_v4 }
0x109d   : > { %v12921_v19 = vpack.c.bf16 %v3553_v33, %v3552_v28  ;;  %v11325_v21 = vpop.f32.mrb[96].mxu0  ;;  %v14663_v33 = vld [vmem:[#allocation2 + $0x1c0] sm:$0xff] }
0x109e   : > { %v3555_v52 = vmul.f32 %v11325_v21, %v14179_v43  ;;  %v3531_v25 = vpop.f32.mrb[97].mxu0  ;;  %v3717_v43 = vpop.trf.xlu1  ;;  %v14667_v21 = vld [vmem:[#allocation2 + $0x1d8] sm:$0xff] }
0x109f   : > { %v3554_v36 = vmul.f32 %v3531_v25, %v14181_v47  ;;  %12922 = vmatpush3.bf16.msra.mxu1 %v12921_v19 }
0x10a0   : > { %12923 = vmatprep.subr.bf16.mxu1 %v15770_v4 }
0x10a1   : > { %v12924_v22 = vpack.c.bf16 %v3555_v52, %v3554_v36  ;;  %v14670_v36 = vld [vmem:[#allocation2 + $0x1d0] sm:$0xff] }
0x10a3   : > { %12925 = vmatpush3.bf16.msra.mxu1 %v12924_v22 }
0x10a4   : > { %11396 = vmatprep.subr.mxu1 %v15772_v12 }
0x10a6   : > { %11359 = vmatmul.mubr.f32.vlgmr.msra.gmra.mrb[82].mxu1 %v943_v51 }
0x10a7   : > { %11397 = vmatpush3.msra.mxu1 %v15772_v12  ;;  %11398 = vmatprep.mubr.msk.f32.mxu1 %vm270_vm0, %v3716_v17  ;;  %v14674_v12 = vld [vmem:[#allocation2 + $0x1e8] sm:$0xff] }
0x10aa   : > { %11399 = vmatmul.mubr.msk.f32.vlgmr.msra.gmra.mrb[84].mxu1 %vm270_vm0, %v3717_v43 }
0x10ab   : > { %11412 = vmatprep.mubr.msk.f32.mxu1 %vm1265_vm4, %v14472_v23 }
0x1179   : > { %v3622_v47 = vpop.f32.mrb[82].mxu1 }
0x117a   : > { %v11360_v30 = vpop.f32.mrb[83].mxu1  ;;  %11394 = vmatmul.mubr.f32.vlgmr.msra.gmra.mrb[98].mxu0 %v3622_v47  ;;  %v14677_v47 = vld [vmem:[#allocation2 + $0x1e0] sm:$0xff] }
0x117b   : > { %12953 = vmatpush3.bf16.msra.mxu0 %v13928_v24 }
0x117c   : > { %12958 = vmatprep.subr.bf16.mxu0 %v15770_v4 }
0x117d   : > { %v11400_v42 = vpop.f32.mrb[84].mxu1 }
0x117e   : > { %v3804_v1 = vpop.f32.mrb[85].mxu1 }
0x117f   : > { %11405 = vmatprep.mubr.msk.f32.mxu0 %vm1265_vm4, %v3804_v1 }
0x1180   : > { %11406 = vmatmul.mubr.msk.f32.vlgmr.msra.gmra.mrb[100].mxu0 %vm1265_vm4, %v11400_v42 }
0x1181   : > { %11468 = vmatprep.mubr.msk.f32.mxu0 %vm13733_vm6, %v15771_v20 }
0x124d   : > { %v3692_v41 = vpop.f32.mrb[98].mxu0 }
0x124e   : > { %v3693_v45 = vadd.f32 %v14201_v15, %v3692_v41  ;;  %v11395_v16 = vpop.f32.mrb[99].mxu0  ;;  %v14681_v41 = vld [vmem:[#allocation2 + $0x1f8] sm:$0xff] }
0x1250   : > { %vm3696_vm1 = vcmp.gt.f32.partialorder %v3693_v45, 0.0  ;;  %v3697_v32 = vmul.f32 0.2, %v3693_v45 }
0x1252   : > { %v3698_v60 = vsel %vm3696_vm1, %v3693_v45, %v3697_v32  ;;  %v14684_v32 = vld [vmem:[#allocation2 + $0x1f0] sm:$0xff] }
0x1253   : > { %3699 = vst.msk [vmem:[%s14209_s7 + $0x20] sm:$0xff] %vm270_vm0, %v3698_v60  ;;  %v11407_v63 = vpop.f32.mrb[100].mxu0 }
0x1254   : > { %v3885_v55 = vpop.f32.mrb[101].mxu0 }
0x1255   : > { %v12954_v0 = vpack.c.bf16 %v11407_v63, %v3885_v55 }
0x1257   : > { %12955 = vmatprep.subr.bf16.mxu1 %v12954_v0 }
0x1258   : > { %12957 = vmatpush3.bf16.msra.mxu1 %v12954_v0  ;;  %v14688_v0 = vld [vmem:[#allocation2 + $0x208] sm:$0xff] }
0x1259   : > { %12982 = vmatprep.subr.bf16.mxu1 %v15770_v4 }
0x125b   : > { %11413 = vmatmul.mubr.msk.f32.vlgmr.msra.gmra.mrb[86].mxu1 %vm1265_vm4, %v14486_v39 }
0x125c   : > { %11415 = vmatprep.mubr.msk.f32.mxu1 %vm1265_vm4, %v14490_v27  ;;  %12984 = vmatpush3.bf16.msra.mxu1 %v14100_v44 }
0x125d   : > { %12985 = vmatprep.subr.bf16.mxu1 %v15770_v4 }
0x125f   : > { %11416 = vmatmul.mubr.msk.f32.gmra.mrb[88].mxu1 %vm1265_vm4, %v14496_v8 }
0x1260   : > { %11418 = vmatprep.mubr.msk.f32.mxu1 %vm1265_vm4, %v14500_v48  ;;  %12987 = vmatpush3.bf16.msra.mxu1 %v14103_v49 }
0x1261   : > { %12988 = vmatprep.subr.bf16.mxu1 %v15770_v4 }
0x1263   : > { %11419 = vmatmul.mubr.msk.f32.gmra.mrb[90].mxu1 %vm1265_vm4, %v14506_v58 }
0x1264   : > { %11421 = vmatprep.mubr.msk.f32.mxu1 %vm1265_vm4, %v14510_v34  ;;  %12990 = vmatpush3.bf16.msra.mxu1 %v14107_v56 }
0x1265   : > { %12991 = vmatprep.subr.bf16.mxu1 %v15770_v4 }
0x1267   : > { %11422 = vmatmul.mubr.msk.f32.gmra.mrb[92].mxu1 %vm1265_vm4, %v14516_v59 }
0x1268   : > { %11424 = vmatprep.mubr.msk.f32.mxu1 %vm1265_vm4, %v14520_v54  ;;  %12993 = vmatpush3.bf16.msra.mxu1 %v14111_v62 }
0x1269   : > { %12994 = vmatprep.subr.bf16.mxu1 %v15770_v4 }
0x126b   : > { %11425 = vmatmul.mubr.msk.f32.gmra.mrb[94].mxu1 %vm1265_vm4, %v14526_v7 }
0x126c   : > { %11427 = vmatprep.mubr.msk.f32.mxu1 %vm1265_vm4, %v14530_v11  ;;  %12996 = vmatpush3.bf16.msra.mxu1 %v14115_v38 }
0x126d   : > { %12997 = vmatprep.subr.bf16.mxu1 %v15770_v4 }
0x126f   : > { %11428 = vmatmul.mubr.msk.f32.gmra.mrb[96].mxu1 %vm1265_vm4, %v14536_v37 }
0x1270   : > { %11430 = vmatprep.mubr.msk.f32.mxu1 %vm1265_vm4, %v14540_v50  ;;  %12999 = vmatpush3.bf16.msra.mxu1 %v14119_v53 }
0x1271   : > { %13000 = vmatprep.subr.bf16.mxu1 %v15770_v4 }
0x1273   : > { %11431 = vmatmul.mubr.msk.f32.gmra.mrb[98].mxu1 %vm1265_vm4, %v14546_v3 }
0x1274   : > { %11433 = vmatprep.mubr.msk.f32.mxu1 %vm1265_vm4, %v14550_v5  ;;  %13002 = vmatpush3.bf16.msra.mxu1 %v14123_v61 }
0x1275   : > { %13003 = vmatprep.subr.bf16.mxu1 %v15770_v4 }
0x1277   : > { %11434 = vmatmul.mubr.msk.f32.gmra.mrb[100].mxu1 %vm1265_vm4, %v14556_v6 }
0x1278   : > { %13005 = vmatpush3.bf16.msra.mxu1 %v14127_v35  ;;  %11503 = vmatprep.mubr.msk.f32.mxu1 %vm13733_vm6, %v15771_v20 }
0x1279   : > { %13007 = vmatprep.subr.bf16.mxu1 %v13928_v24 }
0x132e   : > { %v11414_v15 = vpop.f32.mrb[86].mxu1 }
0x132f   : > { %v4040_v31 = vmul.f32 %v14654_v26, %v11414_v15  ;;  %v3960_v40 = vpop.f32.mrb[87].mxu1 }
0x1330   : > { %v4039_v9 = vmul.f32 %v14657_v2, %v3960_v40  ;;  %v14691_v40 = vld [vmem:[#allocation2 + $0x200] sm:$0xff] }
0x1332   : > { %v12959_v57 = vpack.c.bf16 %v4040_v31, %v4039_v9  ;;  %v11417_v10 = vpop.f32.mrb[88].mxu1 }
0x1333   : > { %v4042_v13 = vmul.f32 %v14660_v46, %v11417_v10  ;;  %v3970_v14 = vpop.f32.mrb[89].mxu1 }
0x1334   : > { %v4041_v18 = vmul.f32 %v14663_v33, %v3970_v14  ;;  %12960 = vmatpush3.bf16.msra.mxu0 %v12959_v57 }
0x1335   : > { %12961 = vmatprep.subr.bf16.mxu0 %v15770_v4 }
0x1336   : > { %v12962_v28 = vpack.c.bf16 %v4042_v13, %v4041_v18  ;;  %v11420_v19 = vpop.f32.mrb[90].mxu1  ;;  %v14695_v13 = vld [vmem:[#allocation2 + $0x218] sm:$0xff] }
0x1337   : > { %v4044_v52 = vmul.f32 %v14667_v21, %v11420_v19  ;;  %v3980_v25 = vpop.f32.mrb[91].mxu1 }
0x1338   : > { %v4043_v29 = vmul.f32 %v14670_v36, %v3980_v25  ;;  %12963 = vmatpush3.bf16.msra.mxu0 %v12962_v28  ;;  %v14698_v28 = vld [vmem:[#allocation2 + $0x210] sm:$0xff] }
0x1339   : > { %12964 = vmatprep.subr.bf16.mxu0 %v15770_v4 }
0x133a   : > { %v12965_v22 = vpack.c.bf16 %v4044_v52, %v4043_v29  ;;  %v11423_v17 = vpop.f32.mrb[92].mxu1  ;;  %v14702_v29 = vld [vmem:[#allocation2 + $0x228] sm:$0xff] }
0x133b   : > { %v4046_v51 = vmul.f32 %v14674_v12, %v11423_v17  ;;  %v3990_v43 = vpop.f32.mrb[93].mxu1 }
0x133c   : > { %v4045_v30 = vmul.f32 %v14677_v47, %v3990_v43  ;;  %12966 = vmatpush3.bf16.msra.mxu0 %v12965_v22 }
0x133d   : > { %12967 = vmatprep.subr.bf16.mxu0 %v15770_v4 }
0x133e   : > { %v12968_v42 = vpack.c.bf16 %v4046_v51, %v4045_v30  ;;  %v11426_v1 = vpop.f32.mrb[94].mxu1  ;;  %v14705_v51 = vld [vmem:[#allocation2 + $0x220] sm:$0xff] }
0x133f   : > { %v4048_v45 = vmul.f32 %v14681_v41, %v11426_v1  ;;  %v4000_v16 = vpop.f32.mrb[95].mxu1  ;;  %v15773_v30 = vld [vmem:[#allocation5_spill] sm:$0xff] }
0x1340   : > { %v4047_v60 = vmul.f32 %v14684_v32, %v4000_v16  ;;  %12969 = vmatpush3.bf16.msra.mxu0 %v12968_v42  ;;  %v928_v42 = vmul.f32 0.2, %v15773_v30  ;;  %vm912_vm2 = vcmp.gt.f32.partialorder %v15773_v30, 0.0  ;;  %v15774_v16 = vld [vmem:[#allocation10_spill] sm:$0xff] }
0x1341   : > { %12970 = vmatprep.subr.bf16.mxu0 %v15770_v4 }
0x1342   : > { %v12971_v63 = vpack.c.bf16 %v4048_v45, %v4047_v60  ;;  %v11429_v55 = vpop.f32.mrb[96].mxu1  ;;  %v4215_v45 = vpop.trf.xlu0  ;;  %v944_v60 = vsel %vm912_vm2, %v15773_v30, %v928_v42 }
0x1343   : > { %v4050_v15 = vmul.f32 %v14688_v0, %v11429_v55  ;;  %v4010_v31 = vpop.f32.mrb[97].mxu1 }
0x1344   : > { %v4049_v9 = vmul.f32 %v14691_v40, %v4010_v31  ;;  %12972 = vmatpush3.bf16.msra.mxu0 %v12971_v63 }
0x1345   : > { %12973 = vmatprep.subr.bf16.mxu0 %v15770_v4 }
0x1346   : > { %v12974_v57 = vpack.c.bf16 %v4050_v15, %v4049_v9  ;;  %v11432_v10 = vpop.f32.mrb[98].mxu1  ;;  %v4216_v63 = vpop.trf.xlu0 }
0x1347   : > { %v4052_v14 = vmul.f32 %v14695_v13, %v11432_v10  ;;  %v4020_v18 = vpop.f32.mrb[99].mxu1  ;;  %v14724_v10 = vld [vmem:[#allocation2 + $0x1a8] ss:$0 sm:$0xff] }
0x1348   : > { %v4051_v19 = vmul.f32 %v14698_v28, %v4020_v18  ;;  %12975 = vmatpush3.bf16.msra.mxu0 %v12974_v57 }
0x1349   : > { %12976 = vmatprep.subr.bf16.mxu0 %v15770_v4 }
0x134a   : > { %v12977_v52 = vpack.c.bf16 %v4052_v14, %v4051_v19  ;;  %v11435_v25 = vpop.f32.mrb[100].mxu1 }
0x134b   : > { %v4054_v22 = vmul.f32 %v14702_v29, %v11435_v25  ;;  %v4030_v17 = vpop.f32.mrb[101].mxu1 }
0x134c   : > { %v4053_v43 = vmul.f32 %v14705_v51, %v4030_v17  ;;  %12978 = vmatpush3.bf16.msra.mxu0 %v12977_v52 }
0x134d   : > { %12979 = vmatprep.subr.bf16.mxu0 %v15770_v4 }
0x134e   : > { %v12980_v1 = vpack.c.bf16 %v4054_v22, %v4053_v43 }
0x1350   : > { %12981 = vmatpush3.bf16.msra.mxu0 %v12980_v1 }
0x1351   : > { %11506 = vmatprep.subr.mxu0 %v15774_v16 }
0x1353   : > { %11469 = vmatmul.mubr.f32.vlgmr.msra.gmra.mrb[102].mxu0 %v944_v60 }
0x1354   : > { %11507 = vmatpush3.msra.mxu0 %v15774_v16  ;;  %11508 = vmatprep.mubr.msk.f32.mxu0 %vm270_vm0, %v4215_v45 }
0x1357   : > { %11509 = vmatmul.mubr.msk.f32.vlgmr.msra.gmra.mrb[104].mxu0 %vm270_vm0, %v4216_v63 }
0x1358   : > { %11522 = vmatprep.mubr.msk.f32.mxu0 %vm1265_vm4, %v14472_v23 }
0x1426   : > { %v4121_v55 = vpop.f32.mrb[102].mxu0 }
0x1427   : > { %v11470_v15 = vpop.f32.mrb[103].mxu0  ;;  %11504 = vmatmul.mubr.f32.vlgmr.msra.gmra.mrb[102].mxu1 %v4121_v55 }
0x1428   : > { %13009 = vmatpush3.bf16.msra.mxu1 %v13928_v24 }
0x1429   : > { %13014 = vmatprep.subr.bf16.mxu1 %v15770_v4 }
0x142a   : > { %v11510_v31 = vpop.f32.mrb[104].mxu0 }
0x142b   : > { %v4303_v9 = vpop.f32.mrb[105].mxu0 }
0x142c   : > { %11515 = vmatprep.mubr.msk.f32.mxu1 %vm1265_vm4, %v4303_v9 }
0x142d   : > { %11516 = vmatmul.mubr.msk.f32.vlgmr.msra.gmra.mrb[104].mxu1 %vm1265_vm4, %v11510_v31 }
0x142e   : > { %11578 = vmatprep.mubr.msk.f32.mxu1 %vm13733_vm6, %v15771_v20 }
0x14fa   : > { %v4191_v57 = vpop.f32.mrb[102].mxu1 }
0x14fb   : > { %v4192_v14 = vadd.f32 %v14724_v10, %v4191_v57  ;;  %v11505_v18 = vpop.f32.mrb[103].mxu1 }
0x14fd   : > { %vm4195_vm3 = vcmp.gt.f32.partialorder %v4192_v14, 0.0  ;;  %v4196_v19 = vmul.f32 0.2, %v4192_v14 }
0x14ff   : > { %v4197_v52 = vsel %vm4195_vm3, %v4192_v14, %v4196_v19 }
0x1500   : > { %4198 = vst.msk [vmem:[%s14209_s7 + $0x28] sm:$0xff] %vm270_vm0, %v4197_v52  ;;  %v11517_v25 = vpop.f32.mrb[104].mxu1 }
0x1501   : > { %v4384_v22 = vpop.f32.mrb[105].mxu1 }
0x1502   : > { %v13010_v17 = vpack.c.bf16 %v11517_v25, %v4384_v22 }
0x1504   : > { %13011 = vmatprep.subr.bf16.mxu0 %v13010_v17 }
0x1505   : > { %13013 = vmatpush3.bf16.msra.mxu0 %v13010_v17 }
0x1506   : > { %13038 = vmatprep.subr.bf16.mxu0 %v15770_v4 }
0x1508   : > { %11523 = vmatmul.mubr.msk.f32.vlgmr.msra.gmra.mrb[106].mxu0 %vm1265_vm4, %v14486_v39 }
0x1509   : > { %11525 = vmatprep.mubr.msk.f32.mxu0 %vm1265_vm4, %v14490_v27  ;;  %13040 = vmatpush3.bf16.msra.mxu0 %v14100_v44 }
0x150a   : > { %13041 = vmatprep.subr.bf16.mxu0 %v15770_v4 }
0x150c   : > { %11526 = vmatmul.mubr.msk.f32.gmra.mrb[108].mxu0 %vm1265_vm4, %v14496_v8 }
0x150d   : > { %11528 = vmatprep.mubr.msk.f32.mxu0 %vm1265_vm4, %v14500_v48  ;;  %13043 = vmatpush3.bf16.msra.mxu0 %v14103_v49 }
0x150e   : > { %13044 = vmatprep.subr.bf16.mxu0 %v15770_v4 }
0x1510   : > { %11529 = vmatmul.mubr.msk.f32.gmra.mrb[110].mxu0 %vm1265_vm4, %v14506_v58 }
0x1511   : > { %11531 = vmatprep.mubr.msk.f32.mxu0 %vm1265_vm4, %v14510_v34  ;;  %13046 = vmatpush3.bf16.msra.mxu0 %v14107_v56 }
0x1512   : > { %13047 = vmatprep.subr.bf16.mxu0 %v15770_v4 }
0x1514   : > { %11532 = vmatmul.mubr.msk.f32.gmra.mrb[112].mxu0 %vm1265_vm4, %v14516_v59 }
0x1515   : > { %11534 = vmatprep.mubr.msk.f32.mxu0 %vm1265_vm4, %v14520_v54  ;;  %13049 = vmatpush3.bf16.msra.mxu0 %v14111_v62 }
0x1516   : > { %13050 = vmatprep.subr.bf16.mxu0 %v15770_v4 }
0x1518   : > { %11535 = vmatmul.mubr.msk.f32.gmra.mrb[114].mxu0 %vm1265_vm4, %v14526_v7 }
0x1519   : > { %11537 = vmatprep.mubr.msk.f32.mxu0 %vm1265_vm4, %v14530_v11  ;;  %13052 = vmatpush3.bf16.msra.mxu0 %v14115_v38 }
0x151a   : > { %13053 = vmatprep.subr.bf16.mxu0 %v15770_v4 }
0x151c   : > { %11538 = vmatmul.mubr.msk.f32.gmra.mrb[116].mxu0 %vm1265_vm4, %v14536_v37 }
0x151d   : > { %11540 = vmatprep.mubr.msk.f32.mxu0 %vm1265_vm4, %v14540_v50  ;;  %13055 = vmatpush3.bf16.msra.mxu0 %v14119_v53 }
0x151e   : > { %13056 = vmatprep.subr.bf16.mxu0 %v15770_v4 }
0x1520   : > { %11541 = vmatmul.mubr.msk.f32.gmra.mrb[118].mxu0 %vm1265_vm4, %v14546_v3 }
0x1521   : > { %11543 = vmatprep.mubr.msk.f32.mxu0 %vm1265_vm4, %v14550_v5  ;;  %13058 = vmatpush3.bf16.msra.mxu0 %v14123_v61 }
0x1522   : > { %13059 = vmatprep.subr.bf16.mxu0 %v15770_v4 }
0x1524   : > { %11544 = vmatmul.mubr.msk.f32.gmra.mrb[120].mxu0 %vm1265_vm4, %v14556_v6 }
0x1525   : > { %13061 = vmatpush3.bf16.msra.mxu0 %v14127_v35  ;;  %11613 = vmatprep.mubr.msk.f32.mxu0 %vm13733_vm6, %v15771_v20 }
0x1526   : > { %13063 = vmatprep.subr.bf16.mxu0 %v13928_v24 }
0x15db   : > { %v11524_v43 = vpop.f32.mrb[106].mxu0 }
0x15dc   : > { %v4539_v30 = vmul.f32 %v14654_v26, %v11524_v43  ;;  %v4459_v42 = vpop.f32.mrb[107].mxu0 }
0x15dd   : > { %v4538_v1 = vmul.f32 %v14657_v2, %v4459_v42 }
0x15df   : > { %v13015_v45 = vpack.c.bf16 %v4539_v30, %v4538_v1  ;;  %v11527_v16 = vpop.f32.mrb[108].mxu0 }
0x15e0   : > { %v4541_v60 = vmul.f32 %v14660_v46, %v11527_v16  ;;  %v4469_v63 = vpop.f32.mrb[109].mxu0 }
0x15e1   : > { %v4540_v55 = vmul.f32 %v14663_v33, %v4469_v63  ;;  %13016 = vmatpush3.bf16.msra.mxu1 %v13015_v45 }
0x15e2   : > { %13017 = vmatprep.subr.bf16.mxu1 %v15770_v4 }
0x15e3   : > { %v13018_v15 = vpack.c.bf16 %v4541_v60, %v4540_v55  ;;  %v11530_v31 = vpop.f32.mrb[110].mxu0 }
0x15e4   : > { %v4543_v9 = vmul.f32 %v14667_v21, %v11530_v31  ;;  %v4479_v57 = vpop.f32.mrb[111].mxu0 }
0x15e5   : > { %v4542_v14 = vmul.f32 %v14670_v36, %v4479_v57  ;;  %13019 = vmatpush3.bf16.msra.mxu1 %v13018_v15 }
0x15e6   : > { %13020 = vmatprep.subr.bf16.mxu1 %v15770_v4 }
0x15e7   : > { %v13021_v18 = vpack.c.bf16 %v4543_v9, %v4542_v14  ;;  %v11533_v19 = vpop.f32.mrb[112].mxu0 }
0x15e8   : > { %v4545_v52 = vmul.f32 %v14674_v12, %v11533_v19  ;;  %v4489_v25 = vpop.f32.mrb[113].mxu0 }
0x15e9   : > { %v4544_v22 = vmul.f32 %v14677_v47, %v4489_v25  ;;  %13022 = vmatpush3.bf16.msra.mxu1 %v13021_v18 }
0x15ea   : > { %13023 = vmatprep.subr.bf16.mxu1 %v15770_v4 }
0x15eb   : > { %v13024_v17 = vpack.c.bf16 %v4545_v52, %v4544_v22  ;;  %v11536_v43 = vpop.f32.mrb[114].mxu0 }
0x15ec   : > { %v4547_v30 = vmul.f32 %v14681_v41, %v11536_v43  ;;  %v4499_v42 = vpop.f32.mrb[115].mxu0 }
0x15ed   : > { %v4546_v1 = vmul.f32 %v14684_v32, %v4499_v42  ;;  %13025 = vmatpush3.bf16.msra.mxu1 %v13024_v17  ;;  %v15775_v17 = vld [vmem:[#allocation7_spill] sm:$0xff]  ;;  %v4714_v42 = vpop.trf.xlu1 }
0x15ee   : > { %13026 = vmatprep.subr.bf16.mxu1 %v15770_v4  ;;  %v929_v43 = vmul.f32 0.2, %v15775_v17  ;;  %vm913_vm5 = vcmp.gt.f32.partialorder %v15775_v17, 0.0 }
0x15ef   : > { %v13027_v45 = vpack.c.bf16 %v4547_v30, %v4546_v1  ;;  %v11539_v16 = vpop.f32.mrb[116].mxu0  ;;  %v15776_v1 = vld [vmem:[#allocation16_spill] sm:$0xff] }
0x15f0   : > { %v4549_v60 = vmul.f32 %v14688_v0, %v11539_v16  ;;  %v4509_v63 = vpop.f32.mrb[117].mxu0 }
0x15f1   : > { %v4548_v55 = vmul.f32 %v14691_v40, %v4509_v63  ;;  %13028 = vmatpush3.bf16.msra.mxu1 %v13027_v45  ;;  %v945_v45 = vsel %vm913_vm5, %v15775_v17, %v929_v43  ;;  %v4715_v16 = vpop.trf.xlu1 }
0x15f2   : > { %13029 = vmatprep.subr.bf16.mxu1 %v15770_v4 }
0x15f3   : > { %v13030_v15 = vpack.c.bf16 %v4549_v60, %v4548_v55  ;;  %v11542_v31 = vpop.f32.mrb[118].mxu0 }
0x15f4   : > { %v4551_v9 = vmul.f32 %v14695_v13, %v11542_v31  ;;  %v4519_v57 = vpop.f32.mrb[119].mxu0 }
0x15f5   : > { %v4550_v14 = vmul.f32 %v14698_v28, %v4519_v57  ;;  %13031 = vmatpush3.bf16.msra.mxu1 %v13030_v15 }
0x15f6   : > { %13032 = vmatprep.subr.bf16.mxu1 %v15770_v4 }
0x15f7   : > { %v13033_v18 = vpack.c.bf16 %v4551_v9, %v4550_v14  ;;  %v11545_v19 = vpop.f32.mrb[120].mxu0 }
0x15f8   : > { %v4553_v52 = vmul.f32 %v14702_v29, %v11545_v19  ;;  %v4529_v25 = vpop.f32.mrb[121].mxu0 }
0x15f9   : > { %v4552_v22 = vmul.f32 %v14705_v51, %v4529_v25  ;;  %13034 = vmatpush3.bf16.msra.mxu1 %v13033_v18 }
0x15fa   : > { %13035 = vmatprep.subr.bf16.mxu1 %v15770_v4 }
0x15fb   : > { %v13036_v30 = vpack.c.bf16 %v4553_v52, %v4552_v22 }
0x15fd   : > { %13037 = vmatpush3.bf16.msra.mxu1 %v13036_v30 }
0x15fe   : > { %11616 = vmatprep.subr.mxu1 %v15776_v1 }
0x1600   : > { %11579 = vmatmul.mubr.f32.vlgmr.msra.gmra.mrb[106].mxu1 %v945_v45 }
0x1601   : > { %11617 = vmatpush3.msra.mxu1 %v15776_v1  ;;  %11618 = vmatprep.mubr.msk.f32.mxu1 %vm270_vm0, %v4714_v42 }
0x1604   : > { %11619 = vmatmul.mubr.msk.f32.vlgmr.msra.gmra.mrb[108].mxu1 %vm270_vm0, %v4715_v16 }
0x1605   : > { %11632 = vmatprep.mubr.msk.f32.mxu1 %vm1265_vm4, %v14472_v23 }
0x16d3   : > { %v4620_v60 = vpop.f32.mrb[106].mxu1 }
0x16d4   : > { %v11580_v63 = vpop.f32.mrb[107].mxu1  ;;  %11614 = vmatmul.mubr.f32.vlgmr.msra.gmra.mrb[122].mxu0 %v4620_v60 }
0x16d5   : > { %13065 = vmatpush3.bf16.msra.mxu0 %v13928_v24 }
0x16d6   : > { %13070 = vmatprep.subr.bf16.mxu0 %v15770_v4 }
0x16d7   : > { %v11620_v55 = vpop.f32.mrb[108].mxu1 }
0x16d8   : > { %v4802_v15 = vpop.f32.mrb[109].mxu1 }
0x16d9   : > { %11625 = vmatprep.mubr.msk.f32.mxu0 %vm1265_vm4, %v4802_v15 }
0x16da   : > { %11626 = vmatmul.mubr.msk.f32.vlgmr.msra.gmra.mrb[124].mxu0 %vm1265_vm4, %v11620_v55 }
0x16db   : > { %11688 = vmatprep.mubr.msk.f32.mxu0 %vm13733_vm6, %v15771_v20 }
0x17a7   : > { %v4690_v31 = vpop.f32.mrb[122].mxu0 }
0x17a8   : > { %v4691_v9 = vadd.f32 %v14724_v10, %v4690_v31  ;;  %v11615_v57 = vpop.f32.mrb[123].mxu0 }
0x17aa   : > { %vm4694_vm7 = vcmp.gt.f32.partialorder %v4691_v9, 0.0  ;;  %v4695_v14 = vmul.f32 0.2, %v4691_v9 }
0x17ac   : > { %v4696_v18 = vsel %vm4694_vm7, %v4691_v9, %v4695_v14 }
0x17ad   : > { %4697 = vst.msk [vmem:[%s14209_s7 + $0x30] sm:$0xff] %vm270_vm0, %v4696_v18  ;;  %v11627_v19 = vpop.f32.mrb[124].mxu0 }
0x17ae   : > { %v4883_v52 = vpop.f32.mrb[125].mxu0 }
0x17af   : > { %v13066_v25 = vpack.c.bf16 %v11627_v19, %v4883_v52 }
0x17b1   : > { %13067 = vmatprep.subr.bf16.mxu1 %v13066_v25 }
0x17b2   : > { %13069 = vmatpush3.bf16.msra.mxu1 %v13066_v25 }
0x17b3   : > { %13094 = vmatprep.subr.bf16.mxu1 %v15770_v4 }
0x17b5   : > { %11633 = vmatmul.mubr.msk.f32.vlgmr.msra.gmra.mrb[110].mxu1 %vm1265_vm4, %v14486_v39 }
0x17b6   : > { %11635 = vmatprep.mubr.msk.f32.mxu1 %vm1265_vm4, %v14490_v27  ;;  %13096 = vmatpush3.bf16.msra.mxu1 %v14100_v44 }
0x17b7   : > { %13097 = vmatprep.subr.bf16.mxu1 %v15770_v4 }
0x17b9   : > { %11636 = vmatmul.mubr.msk.f32.gmra.mrb[112].mxu1 %vm1265_vm4, %v14496_v8 }
0x17ba   : > { %11638 = vmatprep.mubr.msk.f32.mxu1 %vm1265_vm4, %v14500_v48  ;;  %13099 = vmatpush3.bf16.msra.mxu1 %v14103_v49 }
0x17bb   : > { %13100 = vmatprep.subr.bf16.mxu1 %v15770_v4 }
0x17bd   : > { %11639 = vmatmul.mubr.msk.f32.gmra.mrb[114].mxu1 %vm1265_vm4, %v14506_v58 }
0x17be   : > { %11641 = vmatprep.mubr.msk.f32.mxu1 %vm1265_vm4, %v14510_v34  ;;  %13102 = vmatpush3.bf16.msra.mxu1 %v14107_v56 }
0x17bf   : > { %13103 = vmatprep.subr.bf16.mxu1 %v15770_v4 }
0x17c1   : > { %11642 = vmatmul.mubr.msk.f32.gmra.mrb[116].mxu1 %vm1265_vm4, %v14516_v59 }
0x17c2   : > { %11644 = vmatprep.mubr.msk.f32.mxu1 %vm1265_vm4, %v14520_v54  ;;  %13105 = vmatpush3.bf16.msra.mxu1 %v14111_v62 }
0x17c3   : > { %13106 = vmatprep.subr.bf16.mxu1 %v15770_v4 }
0x17c5   : > { %11645 = vmatmul.mubr.msk.f32.gmra.mrb[118].mxu1 %vm1265_vm4, %v14526_v7 }
0x17c6   : > { %11647 = vmatprep.mubr.msk.f32.mxu1 %vm1265_vm4, %v14530_v11  ;;  %13108 = vmatpush3.bf16.msra.mxu1 %v14115_v38 }
0x17c7   : > { %13109 = vmatprep.subr.bf16.mxu1 %v15770_v4 }
0x17c9   : > { %11648 = vmatmul.mubr.msk.f32.gmra.mrb[120].mxu1 %vm1265_vm4, %v14536_v37 }
0x17ca   : > { %11650 = vmatprep.mubr.msk.f32.mxu1 %vm1265_vm4, %v14540_v50  ;;  %13111 = vmatpush3.bf16.msra.mxu1 %v14119_v53 }
0x17cb   : > { %13112 = vmatprep.subr.bf16.mxu1 %v15770_v4 }
0x17cd   : > { %11651 = vmatmul.mubr.msk.f32.gmra.mrb[122].mxu1 %vm1265_vm4, %v14546_v3 }
0x17ce   : > { %11653 = vmatprep.mubr.msk.f32.mxu1 %vm1265_vm4, %v14550_v5  ;;  %13114 = vmatpush3.bf16.msra.mxu1 %v14123_v61 }
0x17cf   : > { %13115 = vmatprep.subr.bf16.mxu1 %v15770_v4 }
0x17d1   : > { %11654 = vmatmul.mubr.msk.f32.gmra.mrb[124].mxu1 %vm1265_vm4, %v14556_v6 }
0x17d2   : > { %13117 = vmatpush3.bf16.msra.mxu1 %v14127_v35  ;;  %11723 = vmatprep.mubr.msk.f32.mxu1 %vm13733_vm6, %v15771_v20 }
0x17d3   : > { %13119 = vmatprep.subr.bf16.mxu1 %v13928_v24 }
0x1888   : > { %v11634_v22 = vpop.f32.mrb[110].mxu1 }
0x1889   : > { %v5038_v17 = vmul.f32 %v14654_v26, %v11634_v22  ;;  %v4958_v43 = vpop.f32.mrb[111].mxu1 }
0x188a   : > { %v5037_v30 = vmul.f32 %v14657_v2, %v4958_v43 }
0x188c   : > { %v13071_v42 = vpack.c.bf16 %v5038_v17, %v5037_v30  ;;  %v11637_v1 = vpop.f32.mrb[112].mxu1 }
0x188d   : > { %v5040_v45 = vmul.f32 %v14660_v46, %v11637_v1  ;;  %v4968_v16 = vpop.f32.mrb[113].mxu1 }
0x188e   : > { %v5039_v60 = vmul.f32 %v14663_v33, %v4968_v16  ;;  %13072 = vmatpush3.bf16.msra.mxu0 %v13071_v42 }
0x188f   : > { %13073 = vmatprep.subr.bf16.mxu0 %v15770_v4 }
0x1890   : > { %v13074_v63 = vpack.c.bf16 %v5040_v45, %v5039_v60  ;;  %v11640_v55 = vpop.f32.mrb[114].mxu1 }
0x1891   : > { %v5042_v15 = vmul.f32 %v14667_v21, %v11640_v55  ;;  %v4978_v31 = vpop.f32.mrb[115].mxu1 }
0x1892   : > { %v5041_v9 = vmul.f32 %v14670_v36, %v4978_v31  ;;  %13075 = vmatpush3.bf16.msra.mxu0 %v13074_v63 }
0x1893   : > { %13076 = vmatprep.subr.bf16.mxu0 %v15770_v4 }
0x1894   : > { %v13077_v57 = vpack.c.bf16 %v5042_v15, %v5041_v9  ;;  %v11643_v14 = vpop.f32.mrb[116].mxu1 }
0x1895   : > { %v5044_v18 = vmul.f32 %v14674_v12, %v11643_v14  ;;  %v4988_v19 = vpop.f32.mrb[117].mxu1 }
0x1896   : > { %v5043_v52 = vmul.f32 %v14677_v47, %v4988_v19  ;;  %13078 = vmatpush3.bf16.msra.mxu0 %v13077_v57 }
0x1897   : > { %13079 = vmatprep.subr.bf16.mxu0 %v15770_v4 }
0x1898   : > { %v13080_v25 = vpack.c.bf16 %v5044_v18, %v5043_v52  ;;  %v11646_v22 = vpop.f32.mrb[118].mxu1 }
0x1899   : > { %v5046_v17 = vmul.f32 %v14681_v41, %v11646_v22  ;;  %v4998_v43 = vpop.f32.mrb[119].mxu1 }
0x189a   : > { %v5045_v30 = vmul.f32 %v14684_v32, %v4998_v43  ;;  %13081 = vmatpush3.bf16.msra.mxu0 %v13080_v25  ;;  %v15777_v25 = vld [vmem:[#allocation6_spill] sm:$0xff]  ;;  %v5213_v43 = vpop.trf.xlu0 }
0x189b   : > { %13082 = vmatprep.subr.bf16.mxu0 %v15770_v4  ;;  %v930_v22 = vmul.f32 0.2, %v15777_v25  ;;  %vm914_vm8 = vcmp.gt.f32.partialorder %v15777_v25, 0.0 }
0x189c   : > { %v13083_v42 = vpack.c.bf16 %v5046_v17, %v5045_v30  ;;  %v11649_v1 = vpop.f32.mrb[120].mxu1  ;;  %v15778_v30 = vld [vmem:[#allocation14_spill] sm:$0xff] }
0x189d   : > { %v5048_v45 = vmul.f32 %v14688_v0, %v11649_v1  ;;  %v5008_v16 = vpop.f32.mrb[121].mxu1 }
0x189e   : > { %v5047_v60 = vmul.f32 %v14691_v40, %v5008_v16  ;;  %13084 = vmatpush3.bf16.msra.mxu0 %v13083_v42  ;;  %v946_v42 = vsel %vm914_vm8, %v15777_v25, %v930_v22  ;;  %v5214_v1 = vpop.trf.xlu0 }
0x189f   : > { %13085 = vmatprep.subr.bf16.mxu0 %v15770_v4 }
0x18a0   : > { %v13086_v63 = vpack.c.bf16 %v5048_v45, %v5047_v60  ;;  %v11652_v55 = vpop.f32.mrb[122].mxu1 }
0x18a1   : > { %v5050_v15 = vmul.f32 %v14695_v13, %v11652_v55  ;;  %v5018_v31 = vpop.f32.mrb[123].mxu1 }
0x18a2   : > { %v5049_v9 = vmul.f32 %v14698_v28, %v5018_v31  ;;  %13087 = vmatpush3.bf16.msra.mxu0 %v13086_v63 }
0x18a3   : > { %13088 = vmatprep.subr.bf16.mxu0 %v15770_v4 }
0x18a4   : > { %v13089_v57 = vpack.c.bf16 %v5050_v15, %v5049_v9  ;;  %v11655_v14 = vpop.f32.mrb[124].mxu1 }
0x18a5   : > { %v5052_v18 = vmul.f32 %v14702_v29, %v11655_v14  ;;  %v5028_v19 = vpop.f32.mrb[125].mxu1 }
0x18a6   : > { %v5051_v52 = vmul.f32 %v14705_v51, %v5028_v19  ;;  %13090 = vmatpush3.bf16.msra.mxu0 %v13089_v57 }
0x18a7   : > { %13091 = vmatprep.subr.bf16.mxu0 %v15770_v4 }
0x18a8   : > { %v13092_v17 = vpack.c.bf16 %v5052_v18, %v5051_v52 }
0x18aa   : > { %13093 = vmatpush3.bf16.msra.mxu0 %v13092_v17 }
0x18ab   : > { %11726 = vmatprep.subr.mxu0 %v15778_v30 }
0x18ad   : > { %11689 = vmatmul.mubr.f32.vlgmr.msra.gmra.mrb[126].mxu0 %v946_v42 }
0x18ae   : > { %11727 = vmatpush3.msra.mxu0 %v15778_v30  ;;  %11728 = vmatprep.mubr.msk.f32.mxu0 %vm270_vm0, %v5213_v43 }
0x18b1   : > { %11729 = vmatmul.mubr.msk.f32.vlgmr.msra.gmra.mrb[128].mxu0 %vm270_vm0, %v5214_v1 }
0x18b2   : > { %11742 = vmatprep.mubr.msk.f32.mxu0 %vm1265_vm4, %v14472_v23 }
0x1980   : > { %v5119_v45 = vpop.f32.mrb[126].mxu0 }
0x1981   : > { %v11690_v16 = vpop.f32.mrb[127].mxu0  ;;  %11724 = vmatmul.mubr.f32.vlgmr.msra.gmra.mrb[126].mxu1 %v5119_v45 }
0x1982   : > { %13121 = vmatpush3.bf16.msra.mxu1 %v13928_v24 }
0x1983   : > { %13126 = vmatprep.subr.bf16.mxu1 %v15770_v4 }
0x1984   : > { %v11730_v60 = vpop.f32.mrb[128].mxu0 }
0x1985   : > { %v5301_v63 = vpop.f32.mrb[129].mxu0 }
0x1986   : > { %11735 = vmatprep.mubr.msk.f32.mxu1 %vm1265_vm4, %v5301_v63 }
0x1987   : > { %11736 = vmatmul.mubr.msk.f32.vlgmr.msra.gmra.mrb[128].mxu1 %vm1265_vm4, %v11730_v60 }
0x1988   : > { %11798 = vmatprep.mubr.msk.f32.mxu1 %vm13733_vm6, %v15771_v20 }
0x1a54   : > { %v5189_v55 = vpop.f32.mrb[126].mxu1 }
0x1a55   : > { %v5190_v23 = vadd.f32 %v14724_v10, %v5189_v55  ;;  %v11725_v15 = vpop.f32.mrb[127].mxu1 }
0x1a57   : > { %vm5193_vm9 = vcmp.gt.f32.partialorder %v5190_v23, 0.0  ;;  %v5194_v31 = vmul.f32 0.2, %v5190_v23 }
0x1a59   : > { %v5195_v9 = vsel %vm5193_vm9, %v5190_v23, %v5194_v31 }
0x1a5a   : > { %5196 = vst.msk [vmem:[%s14209_s7 + $0x38] sm:$0xff] %vm270_vm0, %v5195_v9  ;;  %v11737_v57 = vpop.f32.mrb[128].mxu1 }
0x1a5b   : > { %v5382_v14 = vpop.f32.mrb[129].mxu1 }
0x1a5c   : > { %v13122_v18 = vpack.c.bf16 %v11737_v57, %v5382_v14 }
0x1a5e   : > { %13123 = vmatprep.subr.bf16.mxu0 %v13122_v18 }
0x1a5f   : > { %13125 = vmatpush3.bf16.msra.mxu0 %v13122_v18 }
0x1a60   : > { %13150 = vmatprep.subr.bf16.mxu0 %v15770_v4 }
0x1a62   : > { %11743 = vmatmul.mubr.msk.f32.vlgmr.msra.gmra.mrb[130].mxu0 %vm1265_vm4, %v14486_v39 }
0x1a63   : > { %11745 = vmatprep.mubr.msk.f32.mxu0 %vm1265_vm4, %v14490_v27  ;;  %13152 = vmatpush3.bf16.msra.mxu0 %v14100_v44 }
0x1a64   : > { %13153 = vmatprep.subr.bf16.mxu0 %v15770_v4 }
0x1a66   : > { %11746 = vmatmul.mubr.msk.f32.gmra.mrb[132].mxu0 %vm1265_vm4, %v14496_v8 }
0x1a67   : > { %11748 = vmatprep.mubr.msk.f32.mxu0 %vm1265_vm4, %v14500_v48  ;;  %13155 = vmatpush3.bf16.msra.mxu0 %v14103_v49 }
0x1a68   : > { %13156 = vmatprep.subr.bf16.mxu0 %v15770_v4 }
0x1a6a   : > { %11749 = vmatmul.mubr.msk.f32.gmra.mrb[134].mxu0 %vm1265_vm4, %v14506_v58 }
0x1a6b   : > { %11751 = vmatprep.mubr.msk.f32.mxu0 %vm1265_vm4, %v14510_v34  ;;  %13158 = vmatpush3.bf16.msra.mxu0 %v14107_v56 }
0x1a6c   : > { %13159 = vmatprep.subr.bf16.mxu0 %v15770_v4 }
0x1a6e   : > { %11752 = vmatmul.mubr.msk.f32.gmra.mrb[136].mxu0 %vm1265_vm4, %v14516_v59 }
0x1a6f   : > { %11754 = vmatprep.mubr.msk.f32.mxu0 %vm1265_vm4, %v14520_v54  ;;  %13161 = vmatpush3.bf16.msra.mxu0 %v14111_v62 }
0x1a70   : > { %13162 = vmatprep.subr.bf16.mxu0 %v15770_v4 }
0x1a72   : > { %11755 = vmatmul.mubr.msk.f32.gmra.mrb[138].mxu0 %vm1265_vm4, %v14526_v7 }
0x1a73   : > { %11757 = vmatprep.mubr.msk.f32.mxu0 %vm1265_vm4, %v14530_v11  ;;  %13164 = vmatpush3.bf16.msra.mxu0 %v14115_v38 }
0x1a74   : > { %13165 = vmatprep.subr.bf16.mxu0 %v15770_v4 }
0x1a76   : > { %11758 = vmatmul.mubr.msk.f32.gmra.mrb[140].mxu0 %vm1265_vm4, %v14536_v37 }
0x1a77   : > { %11760 = vmatprep.mubr.msk.f32.mxu0 %vm1265_vm4, %v14540_v50  ;;  %13167 = vmatpush3.bf16.msra.mxu0 %v14119_v53 }
0x1a78   : > { %13168 = vmatprep.subr.bf16.mxu0 %v15770_v4 }
0x1a7a   : > { %11761 = vmatmul.mubr.msk.f32.gmra.mrb[142].mxu0 %vm1265_vm4, %v14546_v3 }
0x1a7b   : > { %11763 = vmatprep.mubr.msk.f32.mxu0 %vm1265_vm4, %v14550_v5  ;;  %13170 = vmatpush3.bf16.msra.mxu0 %v14123_v61 }
0x1a7c   : > { %13171 = vmatprep.subr.bf16.mxu0 %v15770_v4 }
0x1a7e   : > { %11764 = vmatmul.mubr.msk.f32.gmra.mrb[144].mxu0 %vm1265_vm4, %v14556_v6 }
0x1a7f   : > { %13173 = vmatpush3.bf16.msra.mxu0 %v14127_v35  ;;  %11833 = vmatprep.mubr.msk.f32.mxu0 %vm13733_vm6, %v15771_v20 }
0x1a80   : > { %13175 = vmatprep.subr.bf16.mxu0 %v13928_v24 }
0x1b35   : > { %v11744_v39 = vpop.f32.mrb[130].mxu0 }
0x1b36   : > { %v5537_v27 = vmul.f32 %v14654_v26, %v11744_v39  ;;  %v5457_v8 = vpop.f32.mrb[131].mxu0 }
0x1b37   : > { %v5536_v48 = vmul.f32 %v14657_v2, %v5457_v8 }
0x1b39   : > { %v13127_v58 = vpack.c.bf16 %v5537_v27, %v5536_v48  ;;  %v11747_v34 = vpop.f32.mrb[132].mxu0  ;;  %v15779_v48 = vld [vmem:[#allocation9_spill] sm:$0xff] }
0x1b3a   : > { %v5539_v59 = vmul.f32 %v14660_v46, %v11747_v34  ;;  %v5467_v54 = vpop.f32.mrb[133].mxu0  ;;  %vm915_vm10 = vcmp.gt.f32.partialorder %v15779_v48, 0.0 }
0x1b3b   : > { %v5538_v7 = vmul.f32 %v14663_v33, %v5467_v54  ;;  %13128 = vmatpush3.bf16.msra.mxu1 %v13127_v58  ;;  %v931_v58 = vmul.f32 0.2, %v15779_v48  ;;  %v15780_v54 = vld [vmem:[#allocation21_spill] sm:$0xff] }
0x1b3c   : > { %13129 = vmatprep.subr.bf16.mxu1 %v15770_v4 }
0x1b3d   : > { %v13130_v11 = vpack.c.bf16 %v5539_v59, %v5538_v7  ;;  %v11750_v37 = vpop.f32.mrb[134].mxu0  ;;  %v5712_v59 = vpop.trf.xlu1  ;;  %v947_v7 = vsel %vm915_vm10, %v15779_v48, %v931_v58 }
0x1b3e   : > { %v5541_v50 = vmul.f32 %v14667_v21, %v11750_v37  ;;  %v5477_v3 = vpop.f32.mrb[135].mxu0  ;;  %v14988_v37 = vld [vmem:[#allocation2 + $0x230] sm:$0xff] }
0x1b3f   : > { %v5540_v5 = vmul.f32 %v14670_v36, %v5477_v3  ;;  %13131 = vmatpush3.bf16.msra.mxu1 %v13130_v11 }
0x1b40   : > { %13132 = vmatprep.subr.bf16.mxu1 %v15770_v4 }
0x1b41   : > { %v13133_v6 = vpack.c.bf16 %v5541_v50, %v5540_v5  ;;  %v11753_v19 = vpop.f32.mrb[136].mxu0  ;;  %v5713_v11 = vpop.trf.xlu1 }
0x1b42   : > { %v5543_v52 = vmul.f32 %v14674_v12, %v11753_v19  ;;  %v5487_v25 = vpop.f32.mrb[137].mxu0 }
0x1b43   : > { %v5542_v22 = vmul.f32 %v14677_v47, %v5487_v25  ;;  %13134 = vmatpush3.bf16.msra.mxu1 %v13133_v6 }
0x1b44   : > { %13135 = vmatprep.subr.bf16.mxu1 %v15770_v4 }
0x1b45   : > { %v13136_v17 = vpack.c.bf16 %v5543_v52, %v5542_v22  ;;  %v11756_v43 = vpop.f32.mrb[138].mxu0 }
0x1b46   : > { %v5545_v30 = vmul.f32 %v14681_v41, %v11756_v43  ;;  %v5497_v42 = vpop.f32.mrb[139].mxu0 }
0x1b47   : > { %v5544_v1 = vmul.f32 %v14684_v32, %v5497_v42  ;;  %13137 = vmatpush3.bf16.msra.mxu1 %v13136_v17 }
0x1b48   : > { %13138 = vmatprep.subr.bf16.mxu1 %v15770_v4 }
0x1b49   : > { %v13139_v45 = vpack.c.bf16 %v5545_v30, %v5544_v1  ;;  %v11759_v16 = vpop.f32.mrb[140].mxu0  ;;  %v15002_v1 = vld [vmem:[#allocation2 + $0x238] sm:$0xff] }
0x1b4a   : > { %v5547_v60 = vmul.f32 %v14688_v0, %v11759_v16  ;;  %v5507_v63 = vpop.f32.mrb[141].mxu0  ;;  %v15012_v16 = vld [vmem:[#allocation2 + $0x248] sm:$0xff] }
0x1b4b   : > { %v5546_v55 = vmul.f32 %v14691_v40, %v5507_v63  ;;  %13140 = vmatpush3.bf16.msra.mxu1 %v13139_v45  ;;  %v15006_v45 = vld [vmem:[#allocation2 + $0x240] sm:$0xff]  ;;  %v15022_v63 = vld [vmem:[#allocation2 + $0x258] sm:$0xff] }
0x1b4c   : > { %13141 = vmatprep.subr.bf16.mxu1 %v15770_v4 }
0x1b4d   : > { %v13142_v23 = vpack.c.bf16 %v5547_v60, %v5546_v55  ;;  %v11762_v15 = vpop.f32.mrb[142].mxu0  ;;  %v15016_v60 = vld [vmem:[#allocation2 + $0x250] sm:$0xff]  ;;  %v15026_v55 = vld [vmem:[#allocation2 + $0x260] sm:$0xff] }
0x1b4e   : > { %v5549_v31 = vmul.f32 %v14695_v13, %v11762_v15  ;;  %v5517_v9 = vpop.f32.mrb[143].mxu0  ;;  %v15036_v15 = vld [vmem:[#allocation2 + $0x270] sm:$0xff] }
0x1b4f   : > { %v5548_v57 = vmul.f32 %v14698_v28, %v5517_v9  ;;  %13143 = vmatpush3.bf16.msra.mxu1 %v13142_v23  ;;  %v15032_v23 = vld [vmem:[#allocation2 + $0x268] sm:$0xff]  ;;  %v15046_v9 = vld [vmem:[#allocation2 + $0x280] sm:$0xff] }
0x1b50   : > { %13144 = vmatprep.subr.bf16.mxu1 %v15770_v4 }
0x1b51   : > { %v13145_v14 = vpack.c.bf16 %v5549_v31, %v5548_v57  ;;  %v11765_v18 = vpop.f32.mrb[144].mxu0  ;;  %v15042_v31 = vld [vmem:[#allocation2 + $0x278] sm:$0xff]  ;;  %v15052_v57 = vld [vmem:[#allocation2 + $0x288] sm:$0xff] }
0x1b52   : > { %v5551_v39 = vmul.f32 %v14702_v29, %v11765_v18  ;;  %v5527_v27 = vpop.f32.mrb[145].mxu0  ;;  %v15062_v18 = vld [vmem:[#allocation2 + $0x298] sm:$0xff] }
0x1b53   : > { %v5550_v8 = vmul.f32 %v14705_v51, %v5527_v27  ;;  %13146 = vmatpush3.bf16.msra.mxu1 %v13145_v14  ;;  %v15056_v14 = vld [vmem:[#allocation2 + $0x290] sm:$0xff]  ;;  %v15072_v27 = vld [vmem:[#allocation2 + $0x2a8] sm:$0xff] }
0x1b54   : > { %13147 = vmatprep.subr.bf16.mxu1 %v15770_v4 }
0x1b55   : > { %v13148_v34 = vpack.c.bf16 %v5551_v39, %v5550_v8  ;;  %v15066_v39 = vld [vmem:[#allocation2 + $0x2a0] sm:$0xff] }
0x1b57   : > { %13149 = vmatpush3.bf16.msra.mxu1 %v13148_v34 }
0x1b58   : > { %11836 = vmatprep.subr.mxu1 %v15780_v54 }
0x1b5a   : > { %11799 = vmatmul.mubr.f32.vlgmr.msra.gmra.mrb[130].mxu1 %v947_v7 }
0x1b5b   : > { %11837 = vmatpush3.msra.mxu1 %v15780_v54  ;;  %11838 = vmatprep.mubr.msk.f32.mxu1 %vm270_vm0, %v5712_v59 }
0x1b5e   : > { %11839 = vmatmul.mubr.msk.f32.vlgmr.msra.gmra.mrb[132].mxu1 %vm270_vm0, %v5713_v11 }
0x1b5f   : > { %11852 = vmatprep.mubr.msk.f32.mxu1 %vm1265_vm4, %v14988_v37 }
0x1c2d   : > { %v5618_v50 = vpop.f32.mrb[130].mxu1 }
0x1c2e   : > { %v11800_v3 = vpop.f32.mrb[131].mxu1  ;;  %11834 = vmatmul.mubr.f32.vlgmr.msra.gmra.mrb[146].mxu0 %v5618_v50 }
0x1c2f   : > { %13177 = vmatpush3.bf16.msra.mxu0 %v13928_v24 }
0x1c30   : > { %13182 = vmatprep.subr.bf16.mxu0 %v15770_v4 }
0x1c31   : > { %v11840_v5 = vpop.f32.mrb[132].mxu1 }
0x1c32   : > { %v5800_v6 = vpop.f32.mrb[133].mxu1 }
0x1c33   : > { %11845 = vmatprep.mubr.msk.f32.mxu0 %vm1265_vm4, %v5800_v6 }
0x1c34   : > { %11846 = vmatmul.mubr.msk.f32.vlgmr.msra.gmra.mrb[148].mxu0 %vm1265_vm4, %v11840_v5 }
0x1c35   : > { %11908 = vmatprep.mubr.msk.f32.mxu0 %vm13733_vm6, %v15771_v20 }
0x1d01   : > { %v5688_v19 = vpop.f32.mrb[146].mxu0 }
0x1d02   : > { %v5689_v52 = vadd.f32 %v14724_v10, %v5688_v19  ;;  %v11835_v25 = vpop.f32.mrb[147].mxu0 }
0x1d04   : > { %vm5692_vm11 = vcmp.gt.f32.partialorder %v5689_v52, 0.0  ;;  %v5693_v22 = vmul.f32 0.2, %v5689_v52 }
0x1d06   : > { %v5694_v17 = vsel %vm5692_vm11, %v5689_v52, %v5693_v22 }
0x1d07   : > { %5695 = vst.msk [vmem:[%s14209_s7 + $0x40] sm:$0xff] %vm270_vm0, %v5694_v17  ;;  %v11847_v43 = vpop.f32.mrb[148].mxu0 }
0x1d08   : > { %v5881_v30 = vpop.f32.mrb[149].mxu0 }
0x1d09   : > { %v13178_v42 = vpack.c.bf16 %v11847_v43, %v5881_v30 }
0x1d0b   : > { %13179 = vmatprep.subr.bf16.mxu1 %v13178_v42 }
0x1d0c   : > { %13181 = vmatpush3.bf16.msra.mxu1 %v13178_v42 }
0x1d0d   : > { %13206 = vmatprep.subr.bf16.mxu1 %v15770_v4 }
0x1d0f   : > { %11853 = vmatmul.mubr.msk.f32.vlgmr.msra.gmra.mrb[134].mxu1 %vm1265_vm4, %v15002_v1 }
0x1d10   : > { %11855 = vmatprep.mubr.msk.f32.mxu1 %vm1265_vm4, %v15006_v45  ;;  %13208 = vmatpush3.bf16.msra.mxu1 %v14100_v44 }
0x1d11   : > { %13209 = vmatprep.subr.bf16.mxu1 %v15770_v4 }
0x1d13   : > { %11856 = vmatmul.mubr.msk.f32.gmra.mrb[136].mxu1 %vm1265_vm4, %v15012_v16 }
0x1d14   : > { %11858 = vmatprep.mubr.msk.f32.mxu1 %vm1265_vm4, %v15016_v60  ;;  %13211 = vmatpush3.bf16.msra.mxu1 %v14103_v49 }
0x1d15   : > { %13212 = vmatprep.subr.bf16.mxu1 %v15770_v4 }
0x1d17   : > { %11859 = vmatmul.mubr.msk.f32.gmra.mrb[138].mxu1 %vm1265_vm4, %v15022_v63 }
0x1d18   : > { %11861 = vmatprep.mubr.msk.f32.mxu1 %vm1265_vm4, %v15026_v55  ;;  %13214 = vmatpush3.bf16.msra.mxu1 %v14107_v56 }
0x1d19   : > { %13215 = vmatprep.subr.bf16.mxu1 %v15770_v4 }
0x1d1b   : > { %11862 = vmatmul.mubr.msk.f32.gmra.mrb[140].mxu1 %vm1265_vm4, %v15032_v23 }
0x1d1c   : > { %11864 = vmatprep.mubr.msk.f32.mxu1 %vm1265_vm4, %v15036_v15  ;;  %13217 = vmatpush3.bf16.msra.mxu1 %v14111_v62 }
0x1d1d   : > { %13218 = vmatprep.subr.bf16.mxu1 %v15770_v4 }
0x1d1f   : > { %11865 = vmatmul.mubr.msk.f32.gmra.mrb[142].mxu1 %vm1265_vm4, %v15042_v31 }
0x1d20   : > { %11867 = vmatprep.mubr.msk.f32.mxu1 %vm1265_vm4, %v15046_v9  ;;  %13220 = vmatpush3.bf16.msra.mxu1 %v14115_v38 }
0x1d21   : > { %13221 = vmatprep.subr.bf16.mxu1 %v15770_v4 }
0x1d23   : > { %11868 = vmatmul.mubr.msk.f32.gmra.mrb[144].mxu1 %vm1265_vm4, %v15052_v57 }
0x1d24   : > { %11870 = vmatprep.mubr.msk.f32.mxu1 %vm1265_vm4, %v15056_v14  ;;  %13223 = vmatpush3.bf16.msra.mxu1 %v14119_v53 }
0x1d25   : > { %13224 = vmatprep.subr.bf16.mxu1 %v15770_v4 }
0x1d27   : > { %11871 = vmatmul.mubr.msk.f32.gmra.mrb[146].mxu1 %vm1265_vm4, %v15062_v18 }
0x1d28   : > { %11873 = vmatprep.mubr.msk.f32.mxu1 %vm1265_vm4, %v15066_v39  ;;  %13226 = vmatpush3.bf16.msra.mxu1 %v14123_v61 }
0x1d29   : > { %13227 = vmatprep.subr.bf16.mxu1 %v15770_v4 }
0x1d2b   : > { %11874 = vmatmul.mubr.msk.f32.gmra.mrb[148].mxu1 %vm1265_vm4, %v15072_v27 }
0x1d2c   : > { %13229 = vmatpush3.bf16.msra.mxu1 %v14127_v35  ;;  %11943 = vmatprep.mubr.msk.f32.mxu1 %vm13733_vm6, %v15771_v20 }
0x1d2d   : > { %13231 = vmatprep.subr.bf16.mxu1 %v13928_v24 }
0x1de2   : > { %v11854_v8 = vpop.f32.mrb[134].mxu1 }
0x1de3   : > { %v6036_v48 = vmul.f32 %v14654_v26, %v11854_v8  ;;  %v5956_v58 = vpop.f32.mrb[135].mxu1 }
0x1de4   : > { %v6035_v34 = vmul.f32 %v14657_v2, %v5956_v58 }
0x1de6   : > { %v13183_v59 = vpack.c.bf16 %v6036_v48, %v6035_v34  ;;  %v11857_v54 = vpop.f32.mrb[136].mxu1 }
0x1de7   : > { %v6038_v7 = vmul.f32 %v14660_v46, %v11857_v54  ;;  %v5966_v11 = vpop.f32.mrb[137].mxu1 }
0x1de8   : > { %v6037_v50 = vmul.f32 %v14663_v33, %v5966_v11  ;;  %13184 = vmatpush3.bf16.msra.mxu0 %v13183_v59  ;;  %v15781_v11 = vld [vmem:[#allocation8_spill] sm:$0xff] }
0x1de9   : > { %13185 = vmatprep.subr.bf16.mxu0 %v15770_v4  ;;  %vm916_vm12 = vcmp.gt.f32.partialorder %v15781_v11, 0.0 }
0x1dea   : > { %v13186_v3 = vpack.c.bf16 %v6038_v7, %v6037_v50  ;;  %v11860_v5 = vpop.f32.mrb[138].mxu1  ;;  %v932_v50 = vmul.f32 0.2, %v15781_v11 }
0x1deb   : > { %v6040_v6 = vmul.f32 %v14667_v21, %v11860_v5  ;;  %v5976_v19 = vpop.f32.mrb[139].mxu1 }
0x1dec   : > { %v6039_v26 = vmul.f32 %v14670_v36, %v5976_v19  ;;  %13187 = vmatpush3.bf16.msra.mxu0 %v13186_v3  ;;  %v948_v5 = vsel %vm916_vm12, %v15781_v11, %v932_v50  ;;  %v15186_v11 = vld [vmem:[#allocation2 + $0x1d0] sm:$0xff] }
0x1ded   : > { %13188 = vmatprep.subr.bf16.mxu0 %v15770_v4 }
0x1dee   : > { %v13189_v2 = vpack.c.bf16 %v6040_v6, %v6039_v26  ;;  %v11863_v52 = vpop.f32.mrb[140].mxu1 }
0x1def   : > { %v6042_v46 = vmul.f32 %v14674_v12, %v11863_v52  ;;  %v5986_v25 = vpop.f32.mrb[141].mxu1 }
0x1df0   : > { %v6041_v33 = vmul.f32 %v14677_v47, %v5986_v25  ;;  %13190 = vmatpush3.bf16.msra.mxu0 %v13189_v2 }
0x1df1   : > { %13191 = vmatprep.subr.bf16.mxu0 %v15770_v4 }
0x1df2   : > { %v13192_v22 = vpack.c.bf16 %v6042_v46, %v6041_v33  ;;  %v11866_v17 = vpop.f32.mrb[142].mxu1 }
0x1df3   : > { %v6044_v21 = vmul.f32 %v14681_v41, %v11866_v17  ;;  %v5996_v43 = vpop.f32.mrb[143].mxu1 }
0x1df4   : > { %v6043_v36 = vmul.f32 %v14684_v32, %v5996_v43  ;;  %13193 = vmatpush3.bf16.msra.mxu0 %v13192_v22  ;;  %v15170_v43 = vld [vmem:[#allocation2 + $0x1b8] sm:$0xff] }
0x1df5   : > { %13194 = vmatprep.subr.bf16.mxu0 %v15770_v4 }
0x1df6   : > { %v13195_v30 = vpack.c.bf16 %v6044_v21, %v6043_v36  ;;  %v11869_v42 = vpop.f32.mrb[144].mxu1 }
0x1df7   : > { %v6046_v12 = vmul.f32 %v14688_v0, %v11869_v42  ;;  %v6006_v8 = vpop.f32.mrb[145].mxu1  ;;  %v15173_v42 = vld [vmem:[#allocation2 + $0x1b0] sm:$0xff] }
0x1df8   : > { %v6045_v47 = vmul.f32 %v14691_v40, %v6006_v8  ;;  %13196 = vmatpush3.bf16.msra.mxu0 %v13195_v30 }
0x1df9   : > { %13197 = vmatprep.subr.bf16.mxu0 %v15770_v4 }
0x1dfa   : > { %v13198_v48 = vpack.c.bf16 %v6046_v12, %v6045_v47  ;;  %v11872_v58 = vpop.f32.mrb[146].mxu1 }
0x1dfb   : > { %v6048_v41 = vmul.f32 %v14695_v13, %v11872_v58  ;;  %v6016_v34 = vpop.f32.mrb[147].mxu1  ;;  %v6211_v13 = vpop.trf.xlu0 }
0x1dfc   : > { %v6047_v32 = vmul.f32 %v14698_v28, %v6016_v34  ;;  %13199 = vmatpush3.bf16.msra.mxu0 %v13198_v48  ;;  %v15782_v28 = vld [vmem:[#allocation19_spill] sm:$0xff]  ;;  %v15176_v48 = vld [vmem:[#allocation2 + $0x1c8] sm:$0xff]  ;;  %v15179_v34 = vld [vmem:[#allocation2 + $0x1c0] sm:$0xff] }
0x1dfd   : > { %13200 = vmatprep.subr.bf16.mxu0 %v15770_v4 }
0x1dfe   : > { %v13201_v59 = vpack.c.bf16 %v6048_v41, %v6047_v32  ;;  %v11875_v54 = vpop.f32.mrb[148].mxu1 }
0x1dff   : > { %v6050_v0 = vmul.f32 %v14702_v29, %v11875_v54  ;;  %v6026_v7 = vpop.f32.mrb[149].mxu1  ;;  %v6212_v29 = vpop.trf.xlu0 }
0x1e00   : > { %v6049_v40 = vmul.f32 %v14705_v51, %v6026_v7  ;;  %13202 = vmatpush3.bf16.msra.mxu0 %v13201_v59 }
0x1e01   : > { %13203 = vmatprep.subr.bf16.mxu0 %v15770_v4 }
0x1e02   : > { %v13204_v3 = vpack.c.bf16 %v6050_v0, %v6049_v40  ;;  %v15183_v0 = vld [vmem:[#allocation2 + $0x1d8] sm:$0xff] }
0x1e04   : > { %13205 = vmatpush3.bf16.msra.mxu0 %v13204_v3 }
0x1e05   : > { %11946 = vmatprep.subr.mxu0 %v15782_v28 }
0x1e07   : > { %11909 = vmatmul.mubr.f32.vlgmr.msra.gmra.mrb[150].mxu0 %v948_v5 }
0x1e08   : > { %11947 = vmatpush3.msra.mxu0 %v15782_v28  ;;  %11948 = vmatprep.mubr.msk.f32.mxu0 %vm270_vm0, %v6211_v13  ;;  %v15190_v28 = vld [vmem:[#allocation2 + $0x1e8] sm:$0xff] }
0x1e0b   : > { %11949 = vmatmul.mubr.msk.f32.vlgmr.msra.gmra.mrb[152].mxu0 %vm270_vm0, %v6212_v29 }
0x1e0c   : > { %11962 = vmatprep.mubr.msk.f32.mxu0 %vm1265_vm4, %v14988_v37 }
0x1eda   : > { %v6117_v51 = vpop.f32.mrb[150].mxu0 }
0x1edb   : > { %v11910_v6 = vpop.f32.mrb[151].mxu0  ;;  %11944 = vmatmul.mubr.f32.vlgmr.msra.gmra.mrb[150].mxu1 %v6117_v51  ;;  %v15193_v51 = vld [vmem:[#allocation2 + $0x1e0] sm:$0xff] }
0x1edc   : > { %13233 = vmatpush3.bf16.msra.mxu1 %v13928_v24 }
0x1edd   : > { %13238 = vmatprep.subr.bf16.mxu1 %v15770_v4 }
0x1ede   : > { %v11950_v19 = vpop.f32.mrb[152].mxu0 }
0x1edf   : > { %v6299_v26 = vpop.f32.mrb[153].mxu0 }
0x1ee0   : > { %11955 = vmatprep.mubr.msk.f32.mxu1 %vm1265_vm4, %v6299_v26 }
0x1ee1   : > { %11956 = vmatmul.mubr.msk.f32.vlgmr.msra.gmra.mrb[152].mxu1 %vm1265_vm4, %v11950_v19 }
0x1ee2   : > { %12018 = vmatprep.mubr.msk.f32.mxu1 %vm13733_vm6, %v15771_v20 }
0x1fae   : > { %v6187_v2 = vpop.f32.mrb[150].mxu1 }
0x1faf   : > { %v6188_v52 = vadd.f32 %v14724_v10, %v6187_v2  ;;  %v11945_v46 = vpop.f32.mrb[151].mxu1  ;;  %v15197_v2 = vld [vmem:[#allocation2 + $0x1f8] sm:$0xff] }
0x1fb1   : > { %vm6191_vm13 = vcmp.gt.f32.partialorder %v6188_v52, 0.0  ;;  %v6192_v25 = vmul.f32 0.2, %v6188_v52 }
0x1fb3   : > { %v6193_v33 = vsel %vm6191_vm13, %v6188_v52, %v6192_v25  ;;  %v15200_v25 = vld [vmem:[#allocation2 + $0x1f0] sm:$0xff] }
0x1fb4   : > { %6194 = vst.msk [vmem:[%s14209_s7 + $0x48] sm:$0xff] %vm270_vm0, %v6193_v33  ;;  %v11957_v22 = vpop.f32.mrb[152].mxu1 }
0x1fb5   : > { %v6380_v17 = vpop.f32.mrb[153].mxu1 }
0x1fb6   : > { %v13234_v21 = vpack.c.bf16 %v11957_v22, %v6380_v17 }
0x1fb8   : > { %13235 = vmatprep.subr.bf16.mxu0 %v13234_v21 }
0x1fb9   : > { %13237 = vmatpush3.bf16.msra.mxu0 %v13234_v21  ;;  %v15204_v21 = vld [vmem:[#allocation2 + $0x208] sm:$0xff] }
0x1fba   : > { %13262 = vmatprep.subr.bf16.mxu0 %v15770_v4 }
0x1fbc   : > { %11963 = vmatmul.mubr.msk.f32.vlgmr.msra.gmra.mrb[154].mxu0 %vm1265_vm4, %v15002_v1 }
0x1fbd   : > { %11965 = vmatprep.mubr.msk.f32.mxu0 %vm1265_vm4, %v15006_v45  ;;  %13264 = vmatpush3.bf16.msra.mxu0 %v14100_v44 }
0x1fbe   : > { %13265 = vmatprep.subr.bf16.mxu0 %v15770_v4 }
0x1fc0   : > { %11966 = vmatmul.mubr.msk.f32.gmra.mrb[156].mxu0 %vm1265_vm4, %v15012_v16 }
0x1fc1   : > { %11968 = vmatprep.mubr.msk.f32.mxu0 %vm1265_vm4, %v15016_v60  ;;  %13267 = vmatpush3.bf16.msra.mxu0 %v14103_v49 }
0x1fc2   : > { %13268 = vmatprep.subr.bf16.mxu0 %v15770_v4 }
0x1fc4   : > { %11969 = vmatmul.mubr.msk.f32.gmra.mrb[158].mxu0 %vm1265_vm4, %v15022_v63 }
0x1fc5   : > { %11971 = vmatprep.mubr.msk.f32.mxu0 %vm1265_vm4, %v15026_v55  ;;  %13270 = vmatpush3.bf16.msra.mxu0 %v14107_v56 }
0x1fc6   : > { %13271 = vmatprep.subr.bf16.mxu0 %v15770_v4 }
0x1fc8   : > { %11972 = vmatmul.mubr.msk.f32.gmra.mrb[160].mxu0 %vm1265_vm4, %v15032_v23 }
0x1fc9   : > { %11974 = vmatprep.mubr.msk.f32.mxu0 %vm1265_vm4, %v15036_v15  ;;  %13273 = vmatpush3.bf16.msra.mxu0 %v14111_v62 }
0x1fca   : > { %13274 = vmatprep.subr.bf16.mxu0 %v15770_v4 }
0x1fcc   : > { %11975 = vmatmul.mubr.msk.f32.gmra.mrb[162].mxu0 %vm1265_vm4, %v15042_v31 }
0x1fcd   : > { %11977 = vmatprep.mubr.msk.f32.mxu0 %vm1265_vm4, %v15046_v9  ;;  %13276 = vmatpush3.bf16.msra.mxu0 %v14115_v38 }
0x1fce   : > { %13277 = vmatprep.subr.bf16.mxu0 %v15770_v4 }
0x1fd0   : > { %11978 = vmatmul.mubr.msk.f32.gmra.mrb[164].mxu0 %vm1265_vm4, %v15052_v57 }
0x1fd1   : > { %11980 = vmatprep.mubr.msk.f32.mxu0 %vm1265_vm4, %v15056_v14  ;;  %13279 = vmatpush3.bf16.msra.mxu0 %v14119_v53 }
0x1fd2   : > { %13280 = vmatprep.subr.bf16.mxu0 %v15770_v4 }
0x1fd4   : > { %11981 = vmatmul.mubr.msk.f32.gmra.mrb[166].mxu0 %vm1265_vm4, %v15062_v18 }
0x1fd5   : > { %11983 = vmatprep.mubr.msk.f32.mxu0 %vm1265_vm4, %v15066_v39  ;;  %13282 = vmatpush3.bf16.msra.mxu0 %v14123_v61 }
0x1fd6   : > { %13283 = vmatprep.subr.bf16.mxu0 %v15770_v4 }
0x1fd8   : > { %11984 = vmatmul.mubr.msk.f32.gmra.mrb[168].mxu0 %vm1265_vm4, %v15072_v27 }
0x1fd9   : > { %13285 = vmatpush3.bf16.msra.mxu0 %v14127_v35  ;;  %12053 = vmatprep.mubr.msk.f32.mxu0 %vm13733_vm6, %v15771_v20 }
0x1fda   : > { %13287 = vmatprep.subr.bf16.mxu0 %v13928_v24 }
0x208f   : > { %v11964_v10 = vpop.f32.mrb[154].mxu0 }
0x2090   : > { %v6535_v36 = vmul.f32 %v15170_v43, %v11964_v10  ;;  %v6455_v30 = vpop.f32.mrb[155].mxu0 }
0x2091   : > { %v6534_v12 = vmul.f32 %v15173_v42, %v6455_v30  ;;  %v15207_v30 = vld [vmem:[#allocation2 + $0x200] sm:$0xff] }
0x2093   : > { %v13239_v8 = vpack.c.bf16 %v6535_v36, %v6534_v12  ;;  %v11967_v47 = vpop.f32.mrb[156].mxu0 }
0x2094   : > { %v6537_v58 = vmul.f32 %v15176_v48, %v11967_v47  ;;  %v6465_v41 = vpop.f32.mrb[157].mxu0 }
0x2095   : > { %v6536_v32 = vmul.f32 %v15179_v34, %v6465_v41  ;;  %13240 = vmatpush3.bf16.msra.mxu1 %v13239_v8 }
0x2096   : > { %13241 = vmatprep.subr.bf16.mxu1 %v15770_v4 }
0x2097   : > { %v13242_v59 = vpack.c.bf16 %v6537_v58, %v6536_v32  ;;  %v11970_v54 = vpop.f32.mrb[158].mxu0  ;;  %v15211_v58 = vld [vmem:[#allocation2 + $0x218] sm:$0xff] }
0x2098   : > { %v6539_v7 = vmul.f32 %v15183_v0, %v11970_v54  ;;  %v6475_v40 = vpop.f32.mrb[159].mxu0 }
0x2099   : > { %v6538_v50 = vmul.f32 %v15186_v11, %v6475_v40  ;;  %13243 = vmatpush3.bf16.msra.mxu1 %v13242_v59  ;;  %v15214_v59 = vld [vmem:[#allocation2 + $0x210] sm:$0xff] }
0x209a   : > { %13244 = vmatprep.subr.bf16.mxu1 %v15770_v4 }
0x209b   : > { %v13245_v3 = vpack.c.bf16 %v6539_v7, %v6538_v50  ;;  %v11973_v13 = vpop.f32.mrb[160].mxu0  ;;  %v15218_v50 = vld [vmem:[#allocation2 + $0x228] sm:$0xff] }
0x209c   : > { %v6541_v5 = vmul.f32 %v15190_v28, %v11973_v13  ;;  %v6485_v29 = vpop.f32.mrb[161].mxu0 }
0x209d   : > { %v6540_v6 = vmul.f32 %v15193_v51, %v6485_v29  ;;  %13246 = vmatpush3.bf16.msra.mxu1 %v13245_v3 }
0x209e   : > { %13247 = vmatprep.subr.bf16.mxu1 %v15770_v4 }
0x209f   : > { %v13248_v19 = vpack.c.bf16 %v6541_v5, %v6540_v6  ;;  %v11976_v26 = vpop.f32.mrb[162].mxu0  ;;  %v15221_v5 = vld [vmem:[#allocation2 + $0x220] sm:$0xff] }
0x20a0   : > { %v6543_v52 = vmul.f32 %v15197_v2, %v11976_v26  ;;  %v6495_v46 = vpop.f32.mrb[163].mxu0  ;;  %v15783_v6 = vld [vmem:[#allocation13_spill] sm:$0xff] }
0x20a1   : > { %v6542_v33 = vmul.f32 %v15200_v25, %v6495_v46  ;;  %13249 = vmatpush3.bf16.msra.mxu1 %v13248_v19  ;;  %v933_v19 = vmul.f32 0.2, %v15783_v6  ;;  %vm917_vm14 = vcmp.gt.f32.partialorder %v15783_v6, 0.0  ;;  %v15784_v46 = vld [vmem:[#allocation23_spill] sm:$0xff] }
0x20a2   : > { %13250 = vmatprep.subr.bf16.mxu1 %v15770_v4 }
0x20a3   : > { %v13251_v22 = vpack.c.bf16 %v6543_v52, %v6542_v33  ;;  %v11979_v17 = vpop.f32.mrb[164].mxu0  ;;  %v6710_v52 = vpop.trf.xlu1  ;;  %v949_v33 = vsel %vm917_vm14, %v15783_v6, %v933_v19 }
0x20a4   : > { %v6545_v10 = vmul.f32 %v15204_v21, %v11979_v17  ;;  %v6505_v36 = vpop.f32.mrb[165].mxu0 }
0x20a5   : > { %v6544_v12 = vmul.f32 %v15207_v30, %v6505_v36  ;;  %13252 = vmatpush3.bf16.msra.mxu1 %v13251_v22 }
0x20a6   : > { %13253 = vmatprep.subr.bf16.mxu1 %v15770_v4 }
0x20a7   : > { %v13254_v8 = vpack.c.bf16 %v6545_v10, %v6544_v12  ;;  %v11982_v47 = vpop.f32.mrb[166].mxu0  ;;  %v6711_v22 = vpop.trf.xlu1 }
0x20a8   : > { %v6547_v41 = vmul.f32 %v15211_v58, %v11982_v47  ;;  %v6515_v32 = vpop.f32.mrb[167].mxu0  ;;  %v15240_v47 = vld [vmem:[#allocation2 + $0x1a8] ss:$0 sm:$0xff] }
0x20a9   : > { %v6546_v54 = vmul.f32 %v15214_v59, %v6515_v32  ;;  %13255 = vmatpush3.bf16.msra.mxu1 %v13254_v8 }
0x20aa   : > { %13256 = vmatprep.subr.bf16.mxu1 %v15770_v4 }
0x20ab   : > { %v13257_v7 = vpack.c.bf16 %v6547_v41, %v6546_v54  ;;  %v11985_v40 = vpop.f32.mrb[168].mxu0 }
0x20ac   : > { %v6549_v3 = vmul.f32 %v15218_v50, %v11985_v40  ;;  %v6525_v13 = vpop.f32.mrb[169].mxu0 }
0x20ad   : > { %v6548_v29 = vmul.f32 %v15221_v5, %v6525_v13  ;;  %13258 = vmatpush3.bf16.msra.mxu1 %v13257_v7 }
0x20ae   : > { %13259 = vmatprep.subr.bf16.mxu1 %v15770_v4 }
0x20af   : > { %v13260_v26 = vpack.c.bf16 %v6549_v3, %v6548_v29 }
0x20b1   : > { %13261 = vmatpush3.bf16.msra.mxu1 %v13260_v26 }
0x20b2   : > { %12056 = vmatprep.subr.mxu1 %v15784_v46 }
0x20b4   : > { %12019 = vmatmul.mubr.f32.vlgmr.msra.gmra.mrb[154].mxu1 %v949_v33 }
0x20b5   : > { %12057 = vmatpush3.msra.mxu1 %v15784_v46  ;;  %12058 = vmatprep.mubr.msk.f32.mxu1 %vm270_vm0, %v6710_v52 }
0x20b8   : > { %12059 = vmatmul.mubr.msk.f32.vlgmr.msra.gmra.mrb[156].mxu1 %vm270_vm0, %v6711_v22 }
0x20b9   : > { %12072 = vmatprep.mubr.msk.f32.mxu1 %vm1265_vm4, %v14988_v37 }
0x2187   : > { %v6616_v17 = vpop.f32.mrb[154].mxu1 }
0x2188   : > { %v12020_v10 = vpop.f32.mrb[155].mxu1  ;;  %12054 = vmatmul.mubr.f32.vlgmr.msra.gmra.mrb[170].mxu0 %v6616_v17 }
0x2189   : > { %13289 = vmatpush3.bf16.msra.mxu0 %v13928_v24 }
0x218a   : > { %13294 = vmatprep.subr.bf16.mxu0 %v15770_v4 }
0x218b   : > { %v12060_v36 = vpop.f32.mrb[156].mxu1 }
0x218c   : > { %v6798_v12 = vpop.f32.mrb[157].mxu1 }
0x218d   : > { %12065 = vmatprep.mubr.msk.f32.mxu0 %vm1265_vm4, %v6798_v12 }
0x218e   : > { %12066 = vmatmul.mubr.msk.f32.vlgmr.msra.gmra.mrb[172].mxu0 %vm1265_vm4, %v12060_v36 }
0x218f   : > { %12128 = vmatprep.mubr.msk.f32.mxu0 %vm13733_vm6, %v15771_v20 }
0x225b   : > { %v6686_v8 = vpop.f32.mrb[170].mxu0 }
0x225c   : > { %v6687_v41 = vadd.f32 %v15240_v47, %v6686_v8  ;;  %v12055_v32 = vpop.f32.mrb[171].mxu0 }
0x225e   : > { %vm6690_vm15 = vcmp.gt.f32.partialorder %v6687_v41, 0.0  ;;  %v6691_v54 = vmul.f32 0.2, %v6687_v41 }
0x2260   : > { %v6692_v7 = vsel %vm6690_vm15, %v6687_v41, %v6691_v54 }
0x2261   : > { %6693 = vst.msk [vmem:[%s14209_s7 + $0x50] sm:$0xff] %vm270_vm0, %v6692_v7  ;;  %v12067_v40 = vpop.f32.mrb[172].mxu0 }
0x2262   : > { %v6879_v3 = vpop.f32.mrb[173].mxu0 }
0x2263   : > { %v13290_v13 = vpack.c.bf16 %v12067_v40, %v6879_v3 }
0x2265   : > { %13291 = vmatprep.subr.bf16.mxu1 %v13290_v13 }
0x2266   : > { %13293 = vmatpush3.bf16.msra.mxu1 %v13290_v13 }
0x2267   : > { %13318 = vmatprep.subr.bf16.mxu1 %v15770_v4 }
0x2269   : > { %12073 = vmatmul.mubr.msk.f32.vlgmr.msra.gmra.mrb[158].mxu1 %vm1265_vm4, %v15002_v1 }
0x226a   : > { %12075 = vmatprep.mubr.msk.f32.mxu1 %vm1265_vm4, %v15006_v45  ;;  %13320 = vmatpush3.bf16.msra.mxu1 %v14100_v44 }
0x226b   : > { %13321 = vmatprep.subr.bf16.mxu1 %v15770_v4 }
0x226d   : > { %12076 = vmatmul.mubr.msk.f32.gmra.mrb[160].mxu1 %vm1265_vm4, %v15012_v16 }
0x226e   : > { %12078 = vmatprep.mubr.msk.f32.mxu1 %vm1265_vm4, %v15016_v60  ;;  %13323 = vmatpush3.bf16.msra.mxu1 %v14103_v49 }
0x226f   : > { %13324 = vmatprep.subr.bf16.mxu1 %v15770_v4 }
0x2271   : > { %12079 = vmatmul.mubr.msk.f32.gmra.mrb[162].mxu1 %vm1265_vm4, %v15022_v63 }
0x2272   : > { %12081 = vmatprep.mubr.msk.f32.mxu1 %vm1265_vm4, %v15026_v55  ;;  %13326 = vmatpush3.bf16.msra.mxu1 %v14107_v56 }
0x2273   : > { %13327 = vmatprep.subr.bf16.mxu1 %v15770_v4 }
0x2275   : > { %12082 = vmatmul.mubr.msk.f32.gmra.mrb[164].mxu1 %vm1265_vm4, %v15032_v23 }
0x2276   : > { %12084 = vmatprep.mubr.msk.f32.mxu1 %vm1265_vm4, %v15036_v15  ;;  %13329 = vmatpush3.bf16.msra.mxu1 %v14111_v62 }
0x2277   : > { %13330 = vmatprep.subr.bf16.mxu1 %v15770_v4 }
0x2279   : > { %12085 = vmatmul.mubr.msk.f32.gmra.mrb[166].mxu1 %vm1265_vm4, %v15042_v31 }
0x227a   : > { %12087 = vmatprep.mubr.msk.f32.mxu1 %vm1265_vm4, %v15046_v9  ;;  %13332 = vmatpush3.bf16.msra.mxu1 %v14115_v38 }
0x227b   : > { %13333 = vmatprep.subr.bf16.mxu1 %v15770_v4 }
0x227d   : > { %12088 = vmatmul.mubr.msk.f32.gmra.mrb[168].mxu1 %vm1265_vm4, %v15052_v57 }
0x227e   : > { %12090 = vmatprep.mubr.msk.f32.mxu1 %vm1265_vm4, %v15056_v14  ;;  %13335 = vmatpush3.bf16.msra.mxu1 %v14119_v53 }
0x227f   : > { %13336 = vmatprep.subr.bf16.mxu1 %v15770_v4 }
0x2281   : > { %12091 = vmatmul.mubr.msk.f32.gmra.mrb[170].mxu1 %vm1265_vm4, %v15062_v18 }
0x2282   : > { %12093 = vmatprep.mubr.msk.f32.mxu1 %vm1265_vm4, %v15066_v39  ;;  %13338 = vmatpush3.bf16.msra.mxu1 %v14123_v61 }
0x2283   : > { %13339 = vmatprep.subr.bf16.mxu1 %v15770_v4 }
0x2285   : > { %12094 = vmatmul.mubr.msk.f32.gmra.mrb[172].mxu1 %vm1265_vm4, %v15072_v27 }
0x2286   : > { %13341 = vmatpush3.bf16.msra.mxu1 %v14127_v35  ;;  %12163 = vmatprep.mubr.msk.f32.mxu1 %vm13733_vm6, %v15771_v20 }
0x2287   : > { %13343 = vmatprep.subr.bf16.mxu1 %v13928_v24 }
0x233c   : > { %v12074_v29 = vpop.f32.mrb[158].mxu1 }
0x233d   : > { %v7034_v6 = vmul.f32 %v15170_v43, %v12074_v29  ;;  %v6954_v19 = vpop.f32.mrb[159].mxu1 }
0x233e   : > { %v7033_v26 = vmul.f32 %v15173_v42, %v6954_v19 }
0x2340   : > { %v13295_v52 = vpack.c.bf16 %v7034_v6, %v7033_v26  ;;  %v12077_v46 = vpop.f32.mrb[160].mxu1 }
0x2341   : > { %v7036_v33 = vmul.f32 %v15176_v48, %v12077_v46  ;;  %v6964_v22 = vpop.f32.mrb[161].mxu1 }
0x2342   : > { %v7035_v17 = vmul.f32 %v15179_v34, %v6964_v22  ;;  %13296 = vmatpush3.bf16.msra.mxu0 %v13295_v52 }
0x2343   : > { %13297 = vmatprep.subr.bf16.mxu0 %v15770_v4 }
0x2344   : > { %v13298_v10 = vpack.c.bf16 %v7036_v33, %v7035_v17  ;;  %v12080_v36 = vpop.f32.mrb[162].mxu1 }
0x2345   : > { %v7038_v12 = vmul.f32 %v15183_v0, %v12080_v36  ;;  %v6974_v8 = vpop.f32.mrb[163].mxu1 }
0x2346   : > { %v7037_v41 = vmul.f32 %v15186_v11, %v6974_v8  ;;  %13299 = vmatpush3.bf16.msra.mxu0 %v13298_v10 }
0x2347   : > { %13300 = vmatprep.subr.bf16.mxu0 %v15770_v4 }
0x2348   : > { %v13301_v32 = vpack.c.bf16 %v7038_v12, %v7037_v41  ;;  %v12083_v54 = vpop.f32.mrb[164].mxu1 }
0x2349   : > { %v7040_v7 = vmul.f32 %v15190_v28, %v12083_v54  ;;  %v6984_v40 = vpop.f32.mrb[165].mxu1 }
0x234a   : > { %v7039_v3 = vmul.f32 %v15193_v51, %v6984_v40  ;;  %13302 = vmatpush3.bf16.msra.mxu0 %v13301_v32 }
0x234b   : > { %13303 = vmatprep.subr.bf16.mxu0 %v15770_v4 }
0x234c   : > { %v13304_v13 = vpack.c.bf16 %v7040_v7, %v7039_v3  ;;  %v12086_v29 = vpop.f32.mrb[166].mxu1 }
0x234d   : > { %v7042_v6 = vmul.f32 %v15197_v2, %v12086_v29  ;;  %v6994_v19 = vpop.f32.mrb[167].mxu1 }
0x234e   : > { %v7041_v26 = vmul.f32 %v15200_v25, %v6994_v19  ;;  %13305 = vmatpush3.bf16.msra.mxu0 %v13304_v13  ;;  %v15785_v13 = vld [vmem:[#allocation12_spill] sm:$0xff]  ;;  %v7209_v19 = vpop.trf.xlu0 }
0x234f   : > { %13306 = vmatprep.subr.bf16.mxu0 %v15770_v4  ;;  %v934_v29 = vmul.f32 0.2, %v15785_v13  ;;  %vm918_vm1 = vcmp.gt.f32.partialorder %v15785_v13, 0.0 }
0x2350   : > { %v13307_v52 = vpack.c.bf16 %v7042_v6, %v7041_v26  ;;  %v12089_v46 = vpop.f32.mrb[168].mxu1  ;;  %v15786_v26 = vld [vmem:[#allocation22_spill] sm:$0xff] }
0x2351   : > { %v7044_v33 = vmul.f32 %v15204_v21, %v12089_v46  ;;  %v7004_v22 = vpop.f32.mrb[169].mxu1 }
0x2352   : > { %v7043_v17 = vmul.f32 %v15207_v30, %v7004_v22  ;;  %13308 = vmatpush3.bf16.msra.mxu0 %v13307_v52  ;;  %v950_v52 = vsel %vm918_vm1, %v15785_v13, %v934_v29  ;;  %v7210_v46 = vpop.trf.xlu0 }
0x2353   : > { %13309 = vmatprep.subr.bf16.mxu0 %v15770_v4 }
0x2354   : > { %v13310_v10 = vpack.c.bf16 %v7044_v33, %v7043_v17  ;;  %v12092_v36 = vpop.f32.mrb[170].mxu1 }
0x2355   : > { %v7046_v12 = vmul.f32 %v15211_v58, %v12092_v36  ;;  %v7014_v8 = vpop.f32.mrb[171].mxu1 }
0x2356   : > { %v7045_v41 = vmul.f32 %v15214_v59, %v7014_v8  ;;  %13311 = vmatpush3.bf16.msra.mxu0 %v13310_v10 }
0x2357   : > { %13312 = vmatprep.subr.bf16.mxu0 %v15770_v4 }
0x2358   : > { %v13313_v32 = vpack.c.bf16 %v7046_v12, %v7045_v41  ;;  %v12095_v54 = vpop.f32.mrb[172].mxu1 }
0x2359   : > { %v7048_v7 = vmul.f32 %v15218_v50, %v12095_v54  ;;  %v7024_v40 = vpop.f32.mrb[173].mxu1 }
0x235a   : > { %v7047_v3 = vmul.f32 %v15221_v5, %v7024_v40  ;;  %13314 = vmatpush3.bf16.msra.mxu0 %v13313_v32 }
0x235b   : > { %13315 = vmatprep.subr.bf16.mxu0 %v15770_v4 }
0x235c   : > { %v13316_v6 = vpack.c.bf16 %v7048_v7, %v7047_v3 }
0x235e   : > { %13317 = vmatpush3.bf16.msra.mxu0 %v13316_v6 }
0x235f   : > { %12166 = vmatprep.subr.mxu0 %v15786_v26 }
0x2361   : > { %12129 = vmatmul.mubr.f32.vlgmr.msra.gmra.mrb[174].mxu0 %v950_v52 }
0x2362   : > { %12167 = vmatpush3.msra.mxu0 %v15786_v26  ;;  %12168 = vmatprep.mubr.msk.f32.mxu0 %vm270_vm0, %v7209_v19 }
0x2365   : > { %12169 = vmatmul.mubr.msk.f32.vlgmr.msra.gmra.mrb[176].mxu0 %vm270_vm0, %v7210_v46 }
0x2366   : > { %12182 = vmatprep.mubr.msk.f32.mxu0 %vm1265_vm4, %v14988_v37 }
0x2434   : > { %v7115_v33 = vpop.f32.mrb[174].mxu0 }
0x2435   : > { %v12130_v22 = vpop.f32.mrb[175].mxu0  ;;  %12164 = vmatmul.mubr.f32.vlgmr.msra.gmra.mrb[174].mxu1 %v7115_v33 }
0x2436   : > { %13345 = vmatpush3.bf16.msra.mxu1 %v13928_v24 }
0x2437   : > { %13350 = vmatprep.subr.bf16.mxu1 %v15770_v4 }
0x2438   : > { %v12170_v17 = vpop.f32.mrb[176].mxu0 }
0x2439   : > { %v7297_v10 = vpop.f32.mrb[177].mxu0 }
0x243a   : > { %12175 = vmatprep.mubr.msk.f32.mxu1 %vm1265_vm4, %v7297_v10 }
0x243b   : > { %12176 = vmatmul.mubr.msk.f32.vlgmr.msra.gmra.mrb[176].mxu1 %vm1265_vm4, %v12170_v17 }
0x243c   : > { %12238 = vmatprep.mubr.msk.f32.mxu1 %vm13733_vm6, %v15771_v20 }
0x2508   : > { %v7185_v36 = vpop.f32.mrb[174].mxu1 }
0x2509   : > { %v7186_v12 = vadd.f32 %v15240_v47, %v7185_v36  ;;  %v12165_v8 = vpop.f32.mrb[175].mxu1 }
0x250b   : > { %vm7189_vm2 = vcmp.gt.f32.partialorder %v7186_v12, 0.0  ;;  %v7190_v41 = vmul.f32 0.2, %v7186_v12 }
0x250d   : > { %v7191_v32 = vsel %vm7189_vm2, %v7186_v12, %v7190_v41 }
0x250e   : > { %7192 = vst.msk [vmem:[%s14209_s7 + $0x58] sm:$0xff] %vm270_vm0, %v7191_v32  ;;  %v12177_v54 = vpop.f32.mrb[176].mxu1 }
0x250f   : > { %v7378_v7 = vpop.f32.mrb[177].mxu1 }
0x2510   : > { %v13346_v40 = vpack.c.bf16 %v12177_v54, %v7378_v7 }
0x2512   : > { %13347 = vmatprep.subr.bf16.mxu0 %v13346_v40 }
0x2513   : > { %13349 = vmatpush3.bf16.msra.mxu0 %v13346_v40 }
0x2514   : > { %13374 = vmatprep.subr.bf16.mxu0 %v15770_v4 }
0x2516   : > { %12183 = vmatmul.mubr.msk.f32.vlgmr.msra.gmra.mrb[178].mxu0 %vm1265_vm4, %v15002_v1 }
0x2517   : > { %12185 = vmatprep.mubr.msk.f32.mxu0 %vm1265_vm4, %v15006_v45  ;;  %13376 = vmatpush3.bf16.msra.mxu0 %v14100_v44 }
0x2518   : > { %13377 = vmatprep.subr.bf16.mxu0 %v15770_v4 }
0x251a   : > { %12186 = vmatmul.mubr.msk.f32.gmra.mrb[180].mxu0 %vm1265_vm4, %v15012_v16 }
0x251b   : > { %12188 = vmatprep.mubr.msk.f32.mxu0 %vm1265_vm4, %v15016_v60  ;;  %13379 = vmatpush3.bf16.msra.mxu0 %v14103_v49 }
0x251c   : > { %13380 = vmatprep.subr.bf16.mxu0 %v15770_v4 }
0x251e   : > { %12189 = vmatmul.mubr.msk.f32.gmra.mrb[182].mxu0 %vm1265_vm4, %v15022_v63 }
0x251f   : > { %12191 = vmatprep.mubr.msk.f32.mxu0 %vm1265_vm4, %v15026_v55  ;;  %13382 = vmatpush3.bf16.msra.mxu0 %v14107_v56 }
0x2520   : > { %13383 = vmatprep.subr.bf16.mxu0 %v15770_v4 }
0x2522   : > { %12192 = vmatmul.mubr.msk.f32.gmra.mrb[184].mxu0 %vm1265_vm4, %v15032_v23 }
0x2523   : > { %12194 = vmatprep.mubr.msk.f32.mxu0 %vm1265_vm4, %v15036_v15  ;;  %13385 = vmatpush3.bf16.msra.mxu0 %v14111_v62 }
0x2524   : > { %13386 = vmatprep.subr.bf16.mxu0 %v15770_v4 }
0x2526   : > { %12195 = vmatmul.mubr.msk.f32.gmra.mrb[186].mxu0 %vm1265_vm4, %v15042_v31 }
0x2527   : > { %12197 = vmatprep.mubr.msk.f32.mxu0 %vm1265_vm4, %v15046_v9  ;;  %13388 = vmatpush3.bf16.msra.mxu0 %v14115_v38 }
0x2528   : > { %13389 = vmatprep.subr.bf16.mxu0 %v15770_v4 }
0x252a   : > { %12198 = vmatmul.mubr.msk.f32.gmra.mrb[188].mxu0 %vm1265_vm4, %v15052_v57 }
0x252b   : > { %12200 = vmatprep.mubr.msk.f32.mxu0 %vm1265_vm4, %v15056_v14  ;;  %13391 = vmatpush3.bf16.msra.mxu0 %v14119_v53 }
0x252c   : > { %13392 = vmatprep.subr.bf16.mxu0 %v15770_v4 }
0x252e   : > { %12201 = vmatmul.mubr.msk.f32.gmra.mrb[190].mxu0 %vm1265_vm4, %v15062_v18 }
0x252f   : > { %12203 = vmatprep.mubr.msk.f32.mxu0 %vm1265_vm4, %v15066_v39  ;;  %13394 = vmatpush3.bf16.msra.mxu0 %v14123_v61 }
0x2530   : > { %13395 = vmatprep.subr.bf16.mxu0 %v15770_v4 }
0x2532   : > { %12204 = vmatmul.mubr.msk.f32.gmra.mrb[192].mxu0 %vm1265_vm4, %v15072_v27 }
0x2533   : > { %13397 = vmatpush3.bf16.msra.mxu0 %v14127_v35  ;;  %12273 = vmatprep.mubr.msk.f32.mxu0 %vm13733_vm6, %v15771_v20 }
0x2534   : > { %13399 = vmatprep.subr.bf16.mxu0 %v13928_v24 }
0x25e9   : > { %v12184_v3 = vpop.f32.mrb[178].mxu0 }
0x25ea   : > { %v7533_v13 = vmul.f32 %v15170_v43, %v12184_v3  ;;  %v7453_v29 = vpop.f32.mrb[179].mxu0 }
0x25eb   : > { %v7532_v6 = vmul.f32 %v15173_v42, %v7453_v29 }
0x25ed   : > { %v13351_v19 = vpack.c.bf16 %v7533_v13, %v7532_v6  ;;  %v12187_v26 = vpop.f32.mrb[180].mxu0 }
0x25ee   : > { %v7535_v52 = vmul.f32 %v15176_v48, %v12187_v26  ;;  %v7463_v46 = vpop.f32.mrb[181].mxu0 }
0x25ef   : > { %v7534_v33 = vmul.f32 %v15179_v34, %v7463_v46  ;;  %13352 = vmatpush3.bf16.msra.mxu1 %v13351_v19 }
0x25f0   : > { %13353 = vmatprep.subr.bf16.mxu1 %v15770_v4 }
0x25f1   : > { %v13354_v22 = vpack.c.bf16 %v7535_v52, %v7534_v33  ;;  %v12190_v17 = vpop.f32.mrb[182].mxu0 }
0x25f2   : > { %v7537_v10 = vmul.f32 %v15183_v0, %v12190_v17  ;;  %v7473_v36 = vpop.f32.mrb[183].mxu0 }
0x25f3   : > { %v7536_v12 = vmul.f32 %v15186_v11, %v7473_v36  ;;  %13355 = vmatpush3.bf16.msra.mxu1 %v13354_v22 }
0x25f4   : > { %13356 = vmatprep.subr.bf16.mxu1 %v15770_v4 }
0x25f5   : > { %v13357_v8 = vpack.c.bf16 %v7537_v10, %v7536_v12  ;;  %v12193_v41 = vpop.f32.mrb[184].mxu0 }
0x25f6   : > { %v7539_v32 = vmul.f32 %v15190_v28, %v12193_v41  ;;  %v7483_v54 = vpop.f32.mrb[185].mxu0 }
0x25f7   : > { %v7538_v7 = vmul.f32 %v15193_v51, %v7483_v54  ;;  %13358 = vmatpush3.bf16.msra.mxu1 %v13357_v8 }
0x25f8   : > { %13359 = vmatprep.subr.bf16.mxu1 %v15770_v4 }
0x25f9   : > { %v13360_v40 = vpack.c.bf16 %v7539_v32, %v7538_v7  ;;  %v12196_v3 = vpop.f32.mrb[186].mxu0 }
0x25fa   : > { %v7541_v13 = vmul.f32 %v15197_v2, %v12196_v3  ;;  %v7493_v29 = vpop.f32.mrb[187].mxu0 }
0x25fb   : > { %v7540_v6 = vmul.f32 %v15200_v25, %v7493_v29  ;;  %13361 = vmatpush3.bf16.msra.mxu1 %v13360_v40  ;;  %v15787_v40 = vld [vmem:[#allocation17_spill] sm:$0xff]  ;;  %v7708_v29 = vpop.trf.xlu1 }
0x25fc   : > { %13362 = vmatprep.subr.bf16.mxu1 %v15770_v4  ;;  %v935_v3 = vmul.f32 0.2, %v15787_v40  ;;  %vm919_vm3 = vcmp.gt.f32.partialorder %v15787_v40, 0.0 }
0x25fd   : > { %v13363_v19 = vpack.c.bf16 %v7541_v13, %v7540_v6  ;;  %v12199_v26 = vpop.f32.mrb[188].mxu0  ;;  %v15788_v6 = vld [vmem:[#allocation25_spill] sm:$0xff] }
0x25fe   : > { %v7543_v52 = vmul.f32 %v15204_v21, %v12199_v26  ;;  %v7503_v46 = vpop.f32.mrb[189].mxu0 }
0x25ff   : > { %v7542_v33 = vmul.f32 %v15207_v30, %v7503_v46  ;;  %13364 = vmatpush3.bf16.msra.mxu1 %v13363_v19  ;;  %v951_v19 = vsel %vm919_vm3, %v15787_v40, %v935_v3  ;;  %v7709_v26 = vpop.trf.xlu1 }
0x2600   : > { %13365 = vmatprep.subr.bf16.mxu1 %v15770_v4 }
0x2601   : > { %v13366_v22 = vpack.c.bf16 %v7543_v52, %v7542_v33  ;;  %v12202_v17 = vpop.f32.mrb[190].mxu0 }
0x2602   : > { %v7545_v10 = vmul.f32 %v15211_v58, %v12202_v17  ;;  %v7513_v36 = vpop.f32.mrb[191].mxu0 }
0x2603   : > { %v7544_v12 = vmul.f32 %v15214_v59, %v7513_v36  ;;  %13367 = vmatpush3.bf16.msra.mxu1 %v13366_v22 }
0x2604   : > { %13368 = vmatprep.subr.bf16.mxu1 %v15770_v4 }
0x2605   : > { %v13369_v8 = vpack.c.bf16 %v7545_v10, %v7544_v12  ;;  %v12205_v41 = vpop.f32.mrb[192].mxu0 }
0x2606   : > { %v7547_v32 = vmul.f32 %v15218_v50, %v12205_v41  ;;  %v7523_v54 = vpop.f32.mrb[193].mxu0 }
0x2607   : > { %v7546_v7 = vmul.f32 %v15221_v5, %v7523_v54  ;;  %13370 = vmatpush3.bf16.msra.mxu1 %v13369_v8 }
0x2608   : > { %13371 = vmatprep.subr.bf16.mxu1 %v15770_v4 }
0x2609   : > { %v13372_v13 = vpack.c.bf16 %v7547_v32, %v7546_v7 }
0x260b   : > { %13373 = vmatpush3.bf16.msra.mxu1 %v13372_v13 }
0x260c   : > { %12276 = vmatprep.subr.mxu1 %v15788_v6 }
0x260e   : > { %12239 = vmatmul.mubr.f32.vlgmr.msra.gmra.mrb[178].mxu1 %v951_v19 }
0x260f   : > { %12277 = vmatpush3.msra.mxu1 %v15788_v6  ;;  %12278 = vmatprep.mubr.msk.f32.mxu1 %vm270_vm0, %v7708_v29 }
0x2612   : > { %12279 = vmatmul.mubr.msk.f32.vlgmr.msra.gmra.mrb[180].mxu1 %vm270_vm0, %v7709_v26 }
0x2613   : > { %12292 = vmatprep.mubr.msk.f32.mxu1 %vm1265_vm4, %v14988_v37 }
0x26e1   : > { %v7614_v52 = vpop.f32.mrb[178].mxu1 }
0x26e2   : > { %v12240_v46 = vpop.f32.mrb[179].mxu1  ;;  %12274 = vmatmul.mubr.f32.vlgmr.msra.gmra.mrb[194].mxu0 %v7614_v52 }
0x26e3   : > { %13401 = vmatpush3.bf16.msra.mxu0 %v13928_v24 }
0x26e4   : > { %13406 = vmatprep.subr.bf16.mxu0 %v15770_v4 }
0x26e5   : > { %v12280_v33 = vpop.f32.mrb[180].mxu1 }
0x26e6   : > { %v7796_v22 = vpop.f32.mrb[181].mxu1 }
0x26e7   : > { %12285 = vmatprep.mubr.msk.f32.mxu0 %vm1265_vm4, %v7796_v22 }
0x26e8   : > { %12286 = vmatmul.mubr.msk.f32.vlgmr.msra.gmra.mrb[196].mxu0 %vm1265_vm4, %v12280_v33 }
0x26e9   : > { %12348 = vmatprep.mubr.msk.f32.mxu0 %vm13733_vm6, %v15771_v20 }
0x27b5   : > { %v7684_v17 = vpop.f32.mrb[194].mxu0 }
0x27b6   : > { %v7685_v37 = vadd.f32 %v15240_v47, %v7684_v17  ;;  %v12275_v10 = vpop.f32.mrb[195].mxu0 }
0x27b8   : > { %vm7688_vm5 = vcmp.gt.f32.partialorder %v7685_v37, 0.0  ;;  %v7689_v36 = vmul.f32 0.2, %v7685_v37 }
0x27ba   : > { %v7690_v12 = vsel %vm7688_vm5, %v7685_v37, %v7689_v36 }
0x27bb   : > { %7691 = vst.msk [vmem:[%s14209_s7 + $0x60] sm:$0xff] %vm270_vm0, %v7690_v12  ;;  %v12287_v8 = vpop.f32.mrb[196].mxu0 }
0x27bc   : > { %v7877_v41 = vpop.f32.mrb[197].mxu0 }
0x27bd   : > { %v13402_v32 = vpack.c.bf16 %v12287_v8, %v7877_v41 }
0x27bf   : > { %13403 = vmatprep.subr.bf16.mxu1 %v13402_v32 }
0x27c0   : > { %13405 = vmatpush3.bf16.msra.mxu1 %v13402_v32 }
0x27c1   : > { %13430 = vmatprep.subr.bf16.mxu1 %v15770_v4 }
0x27c3   : > { %12293 = vmatmul.mubr.msk.f32.vlgmr.msra.gmra.mrb[182].mxu1 %vm1265_vm4, %v15002_v1 }
0x27c4   : > { %12295 = vmatprep.mubr.msk.f32.mxu1 %vm1265_vm4, %v15006_v45  ;;  %13432 = vmatpush3.bf16.msra.mxu1 %v14100_v44 }
0x27c5   : > { %13433 = vmatprep.subr.bf16.mxu1 %v15770_v4 }
0x27c7   : > { %12296 = vmatmul.mubr.msk.f32.gmra.mrb[184].mxu1 %vm1265_vm4, %v15012_v16 }
0x27c8   : > { %12298 = vmatprep.mubr.msk.f32.mxu1 %vm1265_vm4, %v15016_v60  ;;  %13435 = vmatpush3.bf16.msra.mxu1 %v14103_v49 }
0x27c9   : > { %13436 = vmatprep.subr.bf16.mxu1 %v15770_v4 }
0x27cb   : > { %12299 = vmatmul.mubr.msk.f32.gmra.mrb[186].mxu1 %vm1265_vm4, %v15022_v63 }
0x27cc   : > { %12301 = vmatprep.mubr.msk.f32.mxu1 %vm1265_vm4, %v15026_v55  ;;  %13438 = vmatpush3.bf16.msra.mxu1 %v14107_v56 }
0x27cd   : > { %13439 = vmatprep.subr.bf16.mxu1 %v15770_v4 }
0x27cf   : > { %12302 = vmatmul.mubr.msk.f32.gmra.mrb[188].mxu1 %vm1265_vm4, %v15032_v23 }
0x27d0   : > { %12304 = vmatprep.mubr.msk.f32.mxu1 %vm1265_vm4, %v15036_v15  ;;  %13441 = vmatpush3.bf16.msra.mxu1 %v14111_v62 }
0x27d1   : > { %13442 = vmatprep.subr.bf16.mxu1 %v15770_v4 }
0x27d3   : > { %12305 = vmatmul.mubr.msk.f32.gmra.mrb[190].mxu1 %vm1265_vm4, %v15042_v31 }
0x27d4   : > { %12307 = vmatprep.mubr.msk.f32.mxu1 %vm1265_vm4, %v15046_v9  ;;  %13444 = vmatpush3.bf16.msra.mxu1 %v14115_v38 }
0x27d5   : > { %13445 = vmatprep.subr.bf16.mxu1 %v15770_v4 }
0x27d7   : > { %12308 = vmatmul.mubr.msk.f32.gmra.mrb[192].mxu1 %vm1265_vm4, %v15052_v57 }
0x27d8   : > { %12310 = vmatprep.mubr.msk.f32.mxu1 %vm1265_vm4, %v15056_v14  ;;  %13447 = vmatpush3.bf16.msra.mxu1 %v14119_v53 }
0x27d9   : > { %13448 = vmatprep.subr.bf16.mxu1 %v15770_v4 }
0x27db   : > { %12311 = vmatmul.mubr.msk.f32.gmra.mrb[194].mxu1 %vm1265_vm4, %v15062_v18 }
0x27dc   : > { %12313 = vmatprep.mubr.msk.f32.mxu1 %vm1265_vm4, %v15066_v39  ;;  %13450 = vmatpush3.bf16.msra.mxu1 %v14123_v61 }
0x27dd   : > { %13451 = vmatprep.subr.bf16.mxu1 %v15770_v4 }
0x27df   : > { %12314 = vmatmul.mubr.msk.f32.gmra.mrb[196].mxu1 %vm1265_vm4, %v15072_v27 }
0x27e0   : > { %13453 = vmatpush3.bf16.msra.mxu1 %v14127_v35  ;;  %12383 = vmatprep.mubr.msk.f32.mxu1 %vm13733_vm6, %v15771_v20 }
0x27e1   : > { %13455 = vmatprep.subr.bf16.mxu1 %v13928_v24 }
0x2896   : > { %v12294_v1 = vpop.f32.mrb[182].mxu1 }
0x2897   : > { %v8032_v45 = vmul.f32 %v15170_v43, %v12294_v1  ;;  %v7952_v16 = vpop.f32.mrb[183].mxu1 }
0x2898   : > { %v8031_v60 = vmul.f32 %v15173_v42, %v7952_v16 }
0x289a   : > { %v13407_v63 = vpack.c.bf16 %v8032_v45, %v8031_v60  ;;  %v12297_v55 = vpop.f32.mrb[184].mxu1  ;;  %v15789_v60 = vld [vmem:[#allocation15_spill] sm:$0xff] }
0x289b   : > { %v8034_v23 = vmul.f32 %v15176_v48, %v12297_v55  ;;  %v7962_v15 = vpop.f32.mrb[185].mxu1  ;;  %vm920_vm7 = vcmp.gt.f32.partialorder %v15789_v60, 0.0 }
0x289c   : > { %v8033_v31 = vmul.f32 %v15179_v34, %v7962_v15  ;;  %13408 = vmatpush3.bf16.msra.mxu0 %v13407_v63  ;;  %v936_v63 = vmul.f32 0.2, %v15789_v60  ;;  %v15790_v15 = vld [vmem:[#allocation24_spill] sm:$0xff] }
0x289d   : > { %13409 = vmatprep.subr.bf16.mxu0 %v15770_v4 }
0x289e   : > { %v13410_v9 = vpack.c.bf16 %v8034_v23, %v8033_v31  ;;  %v12300_v57 = vpop.f32.mrb[186].mxu1  ;;  %v8207_v23 = vpop.trf.xlu0  ;;  %v952_v31 = vsel %vm920_vm7, %v15789_v60, %v936_v63 }
0x289f   : > { %v8036_v14 = vmul.f32 %v15183_v0, %v12300_v57  ;;  %v7972_v18 = vpop.f32.mrb[187].mxu1  ;;  %v15504_v57 = vld [vmem:[#allocation2 + $0x230] sm:$0xff] }
0x28a0   : > { %v8035_v39 = vmul.f32 %v15186_v11, %v7972_v18  ;;  %13411 = vmatpush3.bf16.msra.mxu0 %v13410_v9 }
0x28a1   : > { %13412 = vmatprep.subr.bf16.mxu0 %v15770_v4 }
0x28a2   : > { %v13413_v27 = vpack.c.bf16 %v8036_v14, %v8035_v39  ;;  %v12303_v54 = vpop.f32.mrb[188].mxu1  ;;  %v8208_v9 = vpop.trf.xlu0 }
0x28a3   : > { %v8038_v7 = vmul.f32 %v15190_v28, %v12303_v54  ;;  %v7982_v40 = vpop.f32.mrb[189].mxu1 }
0x28a4   : > { %v8037_v3 = vmul.f32 %v15193_v51, %v7982_v40  ;;  %13414 = vmatpush3.bf16.msra.mxu0 %v13413_v27 }
0x28a5   : > { %13415 = vmatprep.subr.bf16.mxu0 %v15770_v4 }
0x28a6   : > { %v13416_v13 = vpack.c.bf16 %v8038_v7, %v8037_v3  ;;  %v12306_v29 = vpop.f32.mrb[190].mxu1 }
0x28a7   : > { %v8040_v6 = vmul.f32 %v15197_v2, %v12306_v29  ;;  %v7992_v19 = vpop.f32.mrb[191].mxu1 }
0x28a8   : > { %v8039_v26 = vmul.f32 %v15200_v25, %v7992_v19  ;;  %13417 = vmatpush3.bf16.msra.mxu0 %v13416_v13 }
0x28a9   : > { %13418 = vmatprep.subr.bf16.mxu0 %v15770_v4 }
0x28aa   : > { %v13419_v52 = vpack.c.bf16 %v8040_v6, %v8039_v26  ;;  %v12309_v46 = vpop.f32.mrb[192].mxu1  ;;  %v15518_v26 = vld [vmem:[#allocation2 + $0x238] sm:$0xff] }
0x28ab   : > { %v8042_v33 = vmul.f32 %v15204_v21, %v12309_v46  ;;  %v8002_v22 = vpop.f32.mrb[193].mxu1  ;;  %v15528_v46 = vld [vmem:[#allocation2 + $0x248] sm:$0xff] }
0x28ac   : > { %v8041_v17 = vmul.f32 %v15207_v30, %v8002_v22  ;;  %13420 = vmatpush3.bf16.msra.mxu0 %v13419_v52  ;;  %v15522_v52 = vld [vmem:[#allocation2 + $0x240] sm:$0xff]  ;;  %v15538_v22 = vld [vmem:[#allocation2 + $0x258] sm:$0xff] }
0x28ad   : > { %13421 = vmatprep.subr.bf16.mxu0 %v15770_v4 }
0x28ae   : > { %v13422_v37 = vpack.c.bf16 %v8042_v33, %v8041_v17  ;;  %v12312_v10 = vpop.f32.mrb[194].mxu1  ;;  %v15532_v33 = vld [vmem:[#allocation2 + $0x250] sm:$0xff]  ;;  %v15542_v17 = vld [vmem:[#allocation2 + $0x260] sm:$0xff] }
0x28af   : > { %v8044_v36 = vmul.f32 %v15211_v58, %v12312_v10  ;;  %v8012_v12 = vpop.f32.mrb[195].mxu1  ;;  %v15552_v10 = vld [vmem:[#allocation2 + $0x270] sm:$0xff] }
0x28b0   : > { %v8043_v8 = vmul.f32 %v15214_v59, %v8012_v12  ;;  %13423 = vmatpush3.bf16.msra.mxu0 %v13422_v37  ;;  %v15548_v37 = vld [vmem:[#allocation2 + $0x268] sm:$0xff]  ;;  %v15562_v12 = vld [vmem:[#allocation2 + $0x280] sm:$0xff] }
0x28b1   : > { %13424 = vmatprep.subr.bf16.mxu0 %v15770_v4 }
0x28b2   : > { %v13425_v41 = vpack.c.bf16 %v8044_v36, %v8043_v8  ;;  %v12315_v32 = vpop.f32.mrb[196].mxu1  ;;  %v15558_v36 = vld [vmem:[#allocation2 + $0x278] sm:$0xff]  ;;  %v15568_v8 = vld [vmem:[#allocation2 + $0x288] sm:$0xff] }
0x28b3   : > { %v8046_v1 = vmul.f32 %v15218_v50, %v12315_v32  ;;  %v8022_v45 = vpop.f32.mrb[197].mxu1  ;;  %v15578_v32 = vld [vmem:[#allocation2 + $0x298] sm:$0xff] }
0x28b4   : > { %v8045_v16 = vmul.f32 %v15221_v5, %v8022_v45  ;;  %13426 = vmatpush3.bf16.msra.mxu0 %v13425_v41  ;;  %v15572_v41 = vld [vmem:[#allocation2 + $0x290] sm:$0xff]  ;;  %v15588_v45 = vld [vmem:[#allocation2 + $0x2a8] sm:$0xff] }
0x28b5   : > { %13427 = vmatprep.subr.bf16.mxu0 %v15770_v4 }
0x28b6   : > { %v13428_v55 = vpack.c.bf16 %v8046_v1, %v8045_v16  ;;  %v15582_v1 = vld [vmem:[#allocation2 + $0x2a0] sm:$0xff] }
0x28b8   : > { %13429 = vmatpush3.bf16.msra.mxu0 %v13428_v55 }
0x28b9   : > { %12386 = vmatprep.subr.mxu0 %v15790_v15 }
0x28bb   : > { %12349 = vmatmul.mubr.f32.vlgmr.msra.gmra.mrb[198].mxu0 %v952_v31 }
0x28bc   : > { %12387 = vmatpush3.msra.mxu0 %v15790_v15  ;;  %12388 = vmatprep.mubr.msk.f32.mxu0 %vm270_vm0, %v8207_v23 }
0x28bf   : > { %12389 = vmatmul.mubr.msk.f32.vlgmr.msra.gmra.mrb[200].mxu0 %vm270_vm0, %v8208_v9 }
0x28c0   : > { %12402 = vmatprep.mubr.msk.f32.mxu0 %vm1265_vm4, %v15504_v57 }
0x298e   : > { %v8113_v14 = vpop.f32.mrb[198].mxu0 }
0x298f   : > { %v12350_v18 = vpop.f32.mrb[199].mxu0  ;;  %12384 = vmatmul.mubr.f32.vlgmr.msra.gmra.mrb[198].mxu1 %v8113_v14 }
0x2990   : > { %13457 = vmatpush3.bf16.msra.mxu1 %v13928_v24 }
0x2991   : > { %13462 = vmatprep.subr.bf16.mxu1 %v15770_v4 }
0x2992   : > { %v12390_v39 = vpop.f32.mrb[200].mxu0 }
0x2993   : > { %v8295_v27 = vpop.f32.mrb[201].mxu0 }
0x2994   : > { %12395 = vmatprep.mubr.msk.f32.mxu1 %vm1265_vm4, %v8295_v27 }
0x2995   : > { %12396 = vmatmul.mubr.msk.f32.vlgmr.msra.gmra.mrb[200].mxu1 %vm1265_vm4, %v12390_v39 }
0x2996   : > { %12458 = vmatprep.mubr.msk.f32.mxu1 %vm13733_vm6, %v15771_v20 }
0x2a62   : > { %v8183_v54 = vpop.f32.mrb[198].mxu1 }
0x2a63   : > { %v8184_v7 = vadd.f32 %v15240_v47, %v8183_v54  ;;  %v12385_v40 = vpop.f32.mrb[199].mxu1 }
0x2a65   : > { %vm8187_vm8 = vcmp.gt.f32.partialorder %v8184_v7, 0.0  ;;  %v8188_v3 = vmul.f32 0.2, %v8184_v7 }
0x2a67   : > { %v8189_v13 = vsel %vm8187_vm8, %v8184_v7, %v8188_v3 }
0x2a68   : > { %8190 = vst.msk [vmem:[%s14209_s7 + $0x68] sm:$0xff] %vm270_vm0, %v8189_v13  ;;  %v12397_v29 = vpop.f32.mrb[200].mxu1 }
0x2a69   : > { %v8376_v6 = vpop.f32.mrb[201].mxu1 }
0x2a6a   : > { %v13458_v19 = vpack.c.bf16 %v12397_v29, %v8376_v6 }
0x2a6c   : > { %13459 = vmatprep.subr.bf16.mxu0 %v13458_v19 }
0x2a6d   : > { %13461 = vmatpush3.bf16.msra.mxu0 %v13458_v19 }
0x2a6e   : > { %13486 = vmatprep.subr.bf16.mxu0 %v15770_v4 }
0x2a70   : > { %12403 = vmatmul.mubr.msk.f32.vlgmr.msra.gmra.mrb[202].mxu0 %vm1265_vm4, %v15518_v26 }
0x2a71   : > { %12405 = vmatprep.mubr.msk.f32.mxu0 %vm1265_vm4, %v15522_v52  ;;  %13488 = vmatpush3.bf16.msra.mxu0 %v14100_v44 }
0x2a72   : > { %13489 = vmatprep.subr.bf16.mxu0 %v15770_v4 }
0x2a74   : > { %12406 = vmatmul.mubr.msk.f32.gmra.mrb[204].mxu0 %vm1265_vm4, %v15528_v46 }
0x2a75   : > { %12408 = vmatprep.mubr.msk.f32.mxu0 %vm1265_vm4, %v15532_v33  ;;  %13491 = vmatpush3.bf16.msra.mxu0 %v14103_v49 }
0x2a76   : > { %13492 = vmatprep.subr.bf16.mxu0 %v15770_v4 }
0x2a78   : > { %12409 = vmatmul.mubr.msk.f32.gmra.mrb[206].mxu0 %vm1265_vm4, %v15538_v22 }
0x2a79   : > { %12411 = vmatprep.mubr.msk.f32.mxu0 %vm1265_vm4, %v15542_v17  ;;  %13494 = vmatpush3.bf16.msra.mxu0 %v14107_v56 }
0x2a7a   : > { %13495 = vmatprep.subr.bf16.mxu0 %v15770_v4 }
0x2a7c   : > { %12412 = vmatmul.mubr.msk.f32.gmra.mrb[208].mxu0 %vm1265_vm4, %v15548_v37 }
0x2a7d   : > { %12414 = vmatprep.mubr.msk.f32.mxu0 %vm1265_vm4, %v15552_v10  ;;  %13497 = vmatpush3.bf16.msra.mxu0 %v14111_v62 }
0x2a7e   : > { %13498 = vmatprep.subr.bf16.mxu0 %v15770_v4 }
0x2a80   : > { %12415 = vmatmul.mubr.msk.f32.gmra.mrb[210].mxu0 %vm1265_vm4, %v15558_v36 }
0x2a81   : > { %12417 = vmatprep.mubr.msk.f32.mxu0 %vm1265_vm4, %v15562_v12  ;;  %13500 = vmatpush3.bf16.msra.mxu0 %v14115_v38 }
0x2a82   : > { %13501 = vmatprep.subr.bf16.mxu0 %v15770_v4 }
0x2a84   : > { %12418 = vmatmul.mubr.msk.f32.gmra.mrb[212].mxu0 %vm1265_vm4, %v15568_v8 }
0x2a85   : > { %12420 = vmatprep.mubr.msk.f32.mxu0 %vm1265_vm4, %v15572_v41  ;;  %13503 = vmatpush3.bf16.msra.mxu0 %v14119_v53 }
0x2a86   : > { %13504 = vmatprep.subr.bf16.mxu0 %v15770_v4 }
0x2a88   : > { %12421 = vmatmul.mubr.msk.f32.gmra.mrb[214].mxu0 %vm1265_vm4, %v15578_v32 }
0x2a89   : > { %12423 = vmatprep.mubr.msk.f32.mxu0 %vm1265_vm4, %v15582_v1  ;;  %13506 = vmatpush3.bf16.msra.mxu0 %v14123_v61 }
0x2a8a   : > { %13507 = vmatprep.subr.bf16.mxu0 %v15770_v4 }
0x2a8c   : > { %12424 = vmatmul.mubr.msk.f32.gmra.mrb[216].mxu0 %vm1265_vm4, %v15588_v45 }
0x2a8d   : > { %13509 = vmatpush3.bf16.msra.mxu0 %v14127_v35  ;;  %12493 = vmatprep.mubr.msk.f32.mxu0 %vm13733_vm6, %v15771_v20 }
0x2a8e   : > { %13511 = vmatprep.subr.bf16.mxu0 %v13928_v24 }
0x2b43   : > { %v12404_v16 = vpop.f32.mrb[202].mxu0 }
0x2b44   : > { %v8531_v60 = vmul.f32 %v15170_v43, %v12404_v16  ;;  %v8451_v63 = vpop.f32.mrb[203].mxu0 }
0x2b45   : > { %v8530_v55 = vmul.f32 %v15173_v42, %v8451_v63 }
0x2b47   : > { %v13463_v23 = vpack.c.bf16 %v8531_v60, %v8530_v55  ;;  %v12407_v15 = vpop.f32.mrb[204].mxu0 }
0x2b48   : > { %v8533_v31 = vmul.f32 %v15176_v48, %v12407_v15  ;;  %v8461_v9 = vpop.f32.mrb[205].mxu0 }
0x2b49   : > { %v8532_v14 = vmul.f32 %v15179_v34, %v8461_v9  ;;  %13464 = vmatpush3.bf16.msra.mxu1 %v13463_v23  ;;  %v15791_v9 = vld [vmem:[#allocation20_spill] sm:$0xff] }
0x2b4a   : > { %13465 = vmatprep.subr.bf16.mxu1 %v15770_v4  ;;  %vm921_vm9 = vcmp.gt.f32.partialorder %v15791_v9, 0.0 }
0x2b4b   : > { %v13466_v18 = vpack.c.bf16 %v8533_v31, %v8532_v14  ;;  %v12410_v39 = vpop.f32.mrb[206].mxu0  ;;  %v937_v14 = vmul.f32 0.2, %v15791_v9 }
0x2b4c   : > { %v8535_v27 = vmul.f32 %v15183_v0, %v12410_v39  ;;  %v8471_v54 = vpop.f32.mrb[207].mxu0 }
0x2b4d   : > { %v8534_v43 = vmul.f32 %v15186_v11, %v8471_v54  ;;  %13467 = vmatpush3.bf16.msra.mxu1 %v13466_v18  ;;  %v953_v39 = vsel %vm921_vm9, %v15791_v9, %v937_v14 }
0x2b4e   : > { %13468 = vmatprep.subr.bf16.mxu1 %v15770_v4 }
0x2b4f   : > { %v13469_v42 = vpack.c.bf16 %v8535_v27, %v8534_v43  ;;  %v12413_v7 = vpop.f32.mrb[208].mxu0 }
0x2b50   : > { %v8537_v48 = vmul.f32 %v15190_v28, %v12413_v7  ;;  %v8481_v40 = vpop.f32.mrb[209].mxu0 }
0x2b51   : > { %v8536_v34 = vmul.f32 %v15193_v51, %v8481_v40  ;;  %13470 = vmatpush3.bf16.msra.mxu1 %v13469_v42 }
0x2b52   : > { %13471 = vmatprep.subr.bf16.mxu1 %v15770_v4 }
0x2b53   : > { %v13472_v3 = vpack.c.bf16 %v8537_v48, %v8536_v34  ;;  %v12416_v13 = vpop.f32.mrb[210].mxu0 }
0x2b54   : > { %v8539_v0 = vmul.f32 %v15197_v2, %v12416_v13  ;;  %v8491_v29 = vpop.f32.mrb[211].mxu0  ;;  %v13679_v13 = vld [vmem:[#allocation2 + $0x1e0] sm:$0xff] }
0x2b55   : > { %v8538_v11 = vmul.f32 %v15200_v25, %v8491_v29  ;;  %13473 = vmatpush3.bf16.msra.mxu1 %v13472_v3 }
0x2b56   : > { %13474 = vmatprep.subr.bf16.mxu1 %v15770_v4 }
0x2b57   : > { %v13475_v6 = vpack.c.bf16 %v8539_v0, %v8538_v11  ;;  %v12419_v19 = vpop.f32.mrb[212].mxu0 }
0x2b58   : > { %v8541_v28 = vmul.f32 %v15204_v21, %v12419_v19  ;;  %v8501_v16 = vpop.f32.mrb[213].mxu0 }
0x2b59   : > { %v8540_v51 = vmul.f32 %v15207_v30, %v8501_v16  ;;  %13476 = vmatpush3.bf16.msra.mxu1 %v13475_v6  ;;  %v13680_v6 = vld [vmem:[#allocation2 + $0x1f8] sm:$0xff]  ;;  %v13681_v16 = vld [vmem:[#allocation2 + $0x1f0] sm:$0xff] }
0x2b5a   : > { %13477 = vmatprep.subr.bf16.mxu1 %v15770_v4 }
0x2b5b   : > { %v13478_v60 = vpack.c.bf16 %v8541_v28, %v8540_v51  ;;  %v12422_v63 = vpop.f32.mrb[214].mxu0 }
0x2b5c   : > { %v8543_v2 = vmul.f32 %v15211_v58, %v12422_v63  ;;  %v8511_v55 = vpop.f32.mrb[215].mxu0  ;;  %v8706_v58 = vpop.trf.xlu1 }
0x2b5d   : > { %v8542_v25 = vmul.f32 %v15214_v59, %v8511_v55  ;;  %13479 = vmatpush3.bf16.msra.mxu1 %v13478_v60  ;;  %v15792_v59 = vld [vmem:[#allocation26_spill] sm:$0xff] }
0x2b5e   : > { %13480 = vmatprep.subr.bf16.mxu1 %v15770_v4 }
0x2b5f   : > { %v13481_v23 = vpack.c.bf16 %v8543_v2, %v8542_v25  ;;  %v12425_v15 = vpop.f32.mrb[216].mxu0  ;;  %v13682_v2 = vld [vmem:[#allocation2 + $0x208] sm:$0xff] }
0x2b60   : > { %v8545_v21 = vmul.f32 %v15218_v50, %v12425_v15  ;;  %v8521_v31 = vpop.f32.mrb[217].mxu0  ;;  %v8707_v50 = vpop.trf.xlu1 }
0x2b61   : > { %v8544_v30 = vmul.f32 %v15221_v5, %v8521_v31  ;;  %13482 = vmatpush3.bf16.msra.mxu1 %v13481_v23  ;;  %v13683_v23 = vld [vmem:[#allocation2 + $0x200] sm:$0xff] }
0x2b62   : > { %13483 = vmatprep.subr.bf16.mxu1 %v15770_v4 }
0x2b63   : > { %v13484_v18 = vpack.c.bf16 %v8545_v21, %v8544_v30  ;;  %v13684_v30 = vld [vmem:[#allocation2 + $0x218] sm:$0xff] }
0x2b65   : > { %13485 = vmatpush3.bf16.msra.mxu1 %v13484_v18  ;;  %v13685_v18 = vld [vmem:[#allocation2 + $0x210] sm:$0xff] }
0x2b66   : > { %12496 = vmatprep.subr.mxu1 %v15792_v59 }
0x2b68   : > { %12459 = vmatmul.mubr.f32.vlgmr.msra.gmra.mrb[202].mxu1 %v953_v39 }
0x2b69   : > { %12497 = vmatpush3.msra.mxu1 %v15792_v59  ;;  %12498 = vmatprep.mubr.msk.f32.mxu1 %vm270_vm0, %v8706_v58 }
0x2b6c   : > { %12499 = vmatmul.mubr.msk.f32.vlgmr.msra.gmra.mrb[204].mxu1 %vm270_vm0, %v8707_v50  ;;  %v13686_v50 = vld [vmem:[#allocation2 + $0x228] sm:$0xff] }
0x2b6d   : > { %12512 = vmatprep.mubr.msk.f32.mxu1 %vm1265_vm4, %v15504_v57 }
0x2c3b   : > { %v8612_v5 = vpop.f32.mrb[202].mxu1 }
0x2c3c   : > { %v12460_v27 = vpop.f32.mrb[203].mxu1  ;;  %12494 = vmatmul.mubr.f32.vlgmr.msra.gmra.mrb[218].mxu0 %v8612_v5 }
0x2c3d   : > { %13513 = vmatpush3.bf16.msra.mxu0 %v13928_v24 }
0x2c3e   : > { %13518 = vmatprep.subr.bf16.mxu0 %v15770_v4 }
0x2c3f   : > { %v12500_v54 = vpop.f32.mrb[204].mxu1 }
0x2c40   : > { %v8794_v43 = vpop.f32.mrb[205].mxu1 }
0x2c41   : > { %12505 = vmatprep.mubr.msk.f32.mxu0 %vm1265_vm4, %v8794_v43 }
0x2c42   : > { %12506 = vmatmul.mubr.msk.f32.vlgmr.msra.gmra.mrb[220].mxu0 %vm1265_vm4, %v12500_v54  ;;  %v13687_v54 = vld [vmem:[#allocation2 + $0x220] sm:$0xff] }
0x2c43   : > { %12568 = vmatprep.mubr.msk.f32.mxu0 %vm13733_vm6, %v15771_v20 }
0x2d0f   : > { %v8682_v42 = vpop.f32.mrb[218].mxu0 }
0x2d10   : > { %v8683_v57 = vadd.f32 %v15240_v47, %v8682_v42  ;;  %v12495_v7 = vpop.f32.mrb[219].mxu0  ;;  %v15793_v42 = vld [vmem:[#allocation18_spill] sm:$0xff] }
0x2d12   : > { %vm8686_vm10 = vcmp.gt.f32.partialorder %v8683_v57, 0.0  ;;  %v8687_v48 = vmul.f32 0.2, %v8683_v57 }
0x2d14   : > { %v8688_v40 = vsel %vm8686_vm10, %v8683_v57, %v8687_v48  ;;  %v938_v57 = vmul.f32 0.2, %v15793_v42 }
0x2d15   : > { %8689 = vst.msk [vmem:[%s14209_s7 + $0x70] sm:$0xff] %vm270_vm0, %v8688_v40  ;;  %v12507_v24 = vpop.f32.mrb[220].mxu0 }
0x2d16   : > { %v8875_v34 = vpop.f32.mrb[221].mxu0 }
0x2d17   : > { %v13514_v3 = vpack.c.bf16 %v12507_v24, %v8875_v34 }
0x2d19   : > { %13515 = vmatprep.subr.bf16.mxu1 %v13514_v3 }
0x2d1a   : > { %13517 = vmatpush3.bf16.msra.mxu1 %v13514_v3  ;;  %v13688_v3 = vld [vmem:[#allocation2 + $0x1a8] ss:$0 sm:$0xff] }
0x2d1b   : > { %13542 = vmatprep.subr.bf16.mxu1 %v15770_v4 }
0x2d1d   : > { %12513 = vmatmul.mubr.msk.f32.vlgmr.msra.gmra.mrb[206].mxu1 %vm1265_vm4, %v15518_v26 }
0x2d1e   : > { %12515 = vmatprep.mubr.msk.f32.mxu1 %vm1265_vm4, %v15522_v52  ;;  %13544 = vmatpush3.bf16.msra.mxu1 %v14100_v44  ;;  %v13674_v52 = vld [vmem:[#allocation2 + $0x1c8] sm:$0xff] }
0x2d1f   : > { %13545 = vmatprep.subr.bf16.mxu1 %v15770_v4 }
0x2d21   : > { %12516 = vmatmul.mubr.msk.f32.gmra.mrb[208].mxu1 %vm1265_vm4, %v15528_v46 }
0x2d22   : > { %12518 = vmatprep.mubr.msk.f32.mxu1 %vm1265_vm4, %v15532_v33  ;;  %13547 = vmatpush3.bf16.msra.mxu1 %v14103_v49  ;;  %v13672_v49 = vld [vmem:[#allocation2 + $0x1b8] sm:$0xff]  ;;  %v13675_v33 = vld [vmem:[#allocation2 + $0x1c0] sm:$0xff] }
0x2d23   : > { %13548 = vmatprep.subr.bf16.mxu1 %v15770_v4 }
0x2d25   : > { %12519 = vmatmul.mubr.msk.f32.gmra.mrb[210].mxu1 %vm1265_vm4, %v15538_v22 }
0x2d26   : > { %12521 = vmatprep.mubr.msk.f32.mxu1 %vm1265_vm4, %v15542_v17  ;;  %13550 = vmatpush3.bf16.msra.mxu1 %v14107_v56 }
0x2d27   : > { %13551 = vmatprep.subr.bf16.mxu1 %v15770_v4 }
0x2d29   : > { %12522 = vmatmul.mubr.msk.f32.gmra.mrb[212].mxu1 %vm1265_vm4, %v15548_v37  ;;  %v13676_v37 = vld [vmem:[#allocation2 + $0x1d8] sm:$0xff] }
0x2d2a   : > { %12524 = vmatprep.mubr.msk.f32.mxu1 %vm1265_vm4, %v15552_v10  ;;  %13553 = vmatpush3.bf16.msra.mxu1 %v14111_v62 }
0x2d2b   : > { %13554 = vmatprep.subr.bf16.mxu1 %v15770_v4 }
0x2d2d   : > { %12525 = vmatmul.mubr.msk.f32.gmra.mrb[214].mxu1 %vm1265_vm4, %v15558_v36  ;;  %v13677_v36 = vld [vmem:[#allocation2 + $0x1d0] sm:$0xff] }
0x2d2e   : > { %12527 = vmatprep.mubr.msk.f32.mxu1 %vm1265_vm4, %v15562_v12  ;;  %13556 = vmatpush3.bf16.msra.mxu1 %v14115_v38  ;;  %v13673_v38 = vld [vmem:[#allocation2 + $0x1b0] sm:$0xff] }
0x2d2f   : > { %13557 = vmatprep.subr.bf16.mxu1 %v15770_v4 }
0x2d31   : > { %12528 = vmatmul.mubr.msk.f32.gmra.mrb[216].mxu1 %vm1265_vm4, %v15568_v8 }
0x2d32   : > { %12530 = vmatprep.mubr.msk.f32.mxu1 %vm1265_vm4, %v15572_v41  ;;  %13559 = vmatpush3.bf16.msra.mxu1 %v14119_v53 }
0x2d33   : > { %13560 = vmatprep.subr.bf16.mxu1 %v15770_v4 }
0x2d35   : > { %12531 = vmatmul.mubr.msk.f32.gmra.mrb[218].mxu1 %vm1265_vm4, %v15578_v32  ;;  %v13678_v32 = vld [vmem:[#allocation2 + $0x1e8] sm:$0xff] }
0x2d36   : > { %12533 = vmatprep.mubr.msk.f32.mxu1 %vm1265_vm4, %v15582_v1  ;;  %13562 = vmatpush3.bf16.msra.mxu1 %v14123_v61 }
0x2d37   : > { %13563 = vmatprep.subr.bf16.mxu1 %v15770_v4 }
0x2d39   : > { %12534 = vmatmul.mubr.msk.f32.gmra.mrb[220].mxu1 %vm1265_vm4, %v15588_v45  ;;  %vm922_vm4 = vcmp.gt.f32.partialorder %v15793_v42, 0.0 }
0x2d3a   : > { %13565 = vmatpush3.bf16.msra.mxu1 %v14127_v35  ;;  %12603 = vmatprep.mubr.msk.f32.mxu1 %vm13733_vm6, %v15771_v20  ;;  %v954_v48 = vsel %vm922_vm4, %v15793_v42, %v938_v57 }
0x2df0   : > { %v12514_v44 = vpop.f32.mrb[206].mxu1 }
0x2df1   : > { %v9030_v56 = vmul.f32 %v13672_v49, %v12514_v44  ;;  %v8950_v62 = vpop.f32.mrb[207].mxu1 }
0x2df2   : > { %v9029_v53 = vmul.f32 %v13673_v38, %v8950_v62 }
0x2df4   : > { %v13519_v47 = vpack.c.bf16 %v9030_v56, %v9029_v53  ;;  %v12517_v26 = vpop.f32.mrb[208].mxu1 }
0x2df5   : > { %v9032_v61 = vmul.f32 %v13674_v52, %v12517_v26  ;;  %v8960_v46 = vpop.f32.mrb[209].mxu1 }
0x2df6   : > { %v9031_v22 = vmul.f32 %v13675_v33, %v8960_v46  ;;  %13520 = vmatpush3.bf16.msra.mxu0 %v13519_v47 }
0x2df7   : > { %13521 = vmatprep.subr.bf16.mxu0 %v15770_v4 }
0x2df8   : > { %v13522_v35 = vpack.c.bf16 %v9032_v61, %v9031_v22  ;;  %v12520_v17 = vpop.f32.mrb[210].mxu1 }
0x2df9   : > { %v9034_v20 = vmul.f32 %v13676_v37, %v12520_v17  ;;  %v8970_v10 = vpop.f32.mrb[211].mxu1 }
0x2dfa   : > { %v9033_v12 = vmul.f32 %v13677_v36, %v8970_v10  ;;  %13523 = vmatpush3.bf16.msra.mxu0 %v13522_v35 }
0x2dfb   : > { %13524 = vmatprep.subr.bf16.mxu0 %v15770_v4 }
0x2dfc   : > { %v13525_v8 = vpack.c.bf16 %v9034_v20, %v9033_v12  ;;  %v12523_v41 = vpop.f32.mrb[212].mxu1 }
0x2dfd   : > { %v9036_v1 = vmul.f32 %v13678_v32, %v12523_v41  ;;  %v8980_v45 = vpop.f32.mrb[213].mxu1 }
0x2dfe   : > { %v9035_v0 = vmul.f32 %v13679_v13, %v8980_v45  ;;  %13526 = vmatpush3.bf16.msra.mxu0 %v13525_v8 }
0x2dff   : > { %13527 = vmatprep.subr.bf16.mxu0 %v15770_v4 }
0x2e00   : > { %v13528_v29 = vpack.c.bf16 %v9036_v1, %v9035_v0  ;;  %v12526_v11 = vpop.f32.mrb[214].mxu1 }
0x2e01   : > { %v9038_v19 = vmul.f32 %v13680_v6, %v12526_v11  ;;  %v8990_v28 = vpop.f32.mrb[215].mxu1 }
0x2e02   : > { %v9037_v51 = vmul.f32 %v13681_v16, %v8990_v28  ;;  %13529 = vmatpush3.bf16.msra.mxu0 %v13528_v29 }
0x2e03   : > { %13530 = vmatprep.subr.bf16.mxu0 %v15770_v4 }
0x2e04   : > { %v13531_v60 = vpack.c.bf16 %v9038_v19, %v9037_v51  ;;  %v12529_v63 = vpop.f32.mrb[216].mxu1 }
0x2e05   : > { %v9040_v55 = vmul.f32 %v13682_v2, %v12529_v63  ;;  %v9000_v25 = vpop.f32.mrb[217].mxu1 }
0x2e06   : > { %v9039_v15 = vmul.f32 %v13683_v23, %v9000_v25  ;;  %13532 = vmatpush3.bf16.msra.mxu0 %v13531_v60 }
0x2e07   : > { %13533 = vmatprep.subr.bf16.mxu0 %v15770_v4 }
0x2e08   : > { %v13534_v21 = vpack.c.bf16 %v9040_v55, %v9039_v15  ;;  %v12532_v31 = vpop.f32.mrb[218].mxu1 }
0x2e09   : > { %v9042_v9 = vmul.f32 %v13684_v30, %v12532_v31  ;;  %v9010_v14 = vpop.f32.mrb[219].mxu1 }
0x2e0a   : > { %v9041_v58 = vmul.f32 %v13685_v18, %v9010_v14  ;;  %13535 = vmatpush3.bf16.msra.mxu0 %v13534_v21 }
0x2e0b   : > { %13536 = vmatprep.subr.bf16.mxu0 %v15770_v4 }
0x2e0c   : > { %v13537_v59 = vpack.c.bf16 %v9042_v9, %v9041_v58  ;;  %v12535_v39 = vpop.f32.mrb[220].mxu1 }
0x2e0d   : > { %v9044_v5 = vmul.f32 %v13686_v50, %v12535_v39  ;;  %v9020_v27 = vpop.f32.mrb[221].mxu1 }
0x2e0e   : > { %v9043_v43 = vmul.f32 %v13687_v54, %v9020_v27  ;;  %13538 = vmatpush3.bf16.msra.mxu0 %v13537_v59 }
0x2e0f   : > { %13539 = vmatprep.subr.bf16.mxu0 %v15770_v4 }
0x2e10   : > { %v13540_v7 = vpack.c.bf16 %v9044_v5, %v9043_v43 }
0x2e12   : > { %13541 = vmatpush3.bf16.msra.mxu0 %v13540_v7 }
0x2e15   : > { %12569 = vmatmul.mubr.f32.vlgmr.msra.gmra.mrb[222].mxu0 %v954_v48 }
0x2ee8   : > { %v9111_v40 = vpop.f32.mrb[222].mxu0 }
0x2ee9   : > { %v12570_v24 = vpop.f32.mrb[223].mxu0  ;;  %12604 = vmatmul.mubr.f32.vlgmr.msra.gmra.mrb[222].mxu1 %v9111_v40 }
0x2fbc   : > { %v9181_v34 = vpop.f32.mrb[222].mxu1 }
0x2fbd   : > { %v9182_v44 = vadd.f32 %v13688_v3, %v9181_v34  ;;  %v12605_v49 = vpop.f32.mrb[223].mxu1 }
0x2fbf   : > { %vm9185_vm6 = vcmp.gt.f32.partialorder %v9182_v44, 0.0  ;;  %v9186_v56 = vmul.f32 0.2, %v9182_v44 }
0x2fc1   : > { %v9187_v4 = vsel %vm9185_vm6, %v9182_v44, %v9186_v56 }
0x2fc2   : > { %9188 = vst.msk [vmem:[%s14209_s7 + $0x78] sm:$0xff] %vm270_vm0, %v9187_v4 }
0x2fc3 PF: > { %s13_s9 = sadd.s32 1, %s13727_s9  }
0x2fc4   : > { %p10_p3 = scmp.ge.s32.totalorder %s13_s9, 4  }
0x2fc6   :  { %12 = sbr.rel (!%p10_p3) target bundleno = 1 (0x1), region = 63 }
0x2fcd   :  { %9211 = vsyncpa [#allocation3], 1 }
0x2fce   :  { %9213 = vsyncpa [#allocation3 + $0x1], 1 }

</bundles_post_ra>
